<compile_context>
chip_gen: v6e
topology: v6e:2x2x1
jax: 0.10.0
libtpu: 0.0.40
codegen_flags: <defaults>
</compile_context>

<pallas_src>
import functools

import jax
import jax.numpy as jnp
import numpy as np
from jax.experimental import pallas as pl
from jax.experimental.pallas import tpu as pltpu

NEG_SLOPE = 0.1


def _leaky(v):
    return jnp.where(v >= 0, v, NEG_SLOPE * v)


def _round_up(x, m):
    return -(-x // m) * m


# ----------------------------------------------------------------------------
# Fused InterGroup kernel.  grid = (batch, n_block).
# Layouts (lanes = pixels, sublanes = channels):
#   x_am   : (C, hp)   hp = (h+2)*(w+2), single zero-haloed view
#   x_lfsa : (2C, Mr)  Mr = round_up(A*A*hp, 128), per-view zero-haloed grids,
#            rows [0:C] = LF channels, [C:2C] = SA channels
# ----------------------------------------------------------------------------
def _inter_group_kernel(x_am_ref, x_lfsa_ref, mask_ref,
                        w_am_ref, w_am2a_ref, w_am2b_ref,
                        w_lfam_ref, w_amlf_ref, w1_ref, w2_ref,
                        out_am_ref, out_lfsa_ref,
                        xs_ref, mid_ref, slab1_ref, slab2_ref, lfstk_ref,
                        *, A, C, h, w, P, Mr):
    AA = A * A
    hp = (h + 2) * (w + 2)
    C2, C4, C5, C6 = 2 * C, 4 * C, 5 * C, 6 * C
    f32 = jnp.float32
    bf16 = jnp.bfloat16

    blk = pl.program_id(1)

    @pl.when(blk == 0)
    def _init():
        # The output refs are the VMEM-resident activation chain across blocks.
        out_am_ref[0] = x_am_ref[0]
        out_lfsa_ref[0] = x_lfsa_ref[0]
        # Zero the shift scratches (end pads / halo ring) once per batch only.
        xs_ref[...] = jnp.zeros(xs_ref.shape, bf16)
        mid_ref[...] = jnp.zeros(mid_ref.shape, bf16)

    x_am = out_am_ref[0]                      # (C, hp)  f32, zero halos
    act = out_lfsa_ref[0]                     # (2C, Mr) f32
    mask = mask_ref[...]                      # (1, Mr)  f32: 1 on real pixels

    # bf16 conv-input copy with zeroed halos into the end-padded shift scratch.
    xs_ref[:, P:P + Mr] = (act * mask).astype(bf16)

    # ------------------- angular-mixed branch (all f32, tiny) ---------------
    am1 = jnp.dot(w_am_ref[0], x_am, preferred_element_type=f32)
    # lf_am_conv == per-view 1x1 summed over views: one K = A*A*C dot on a
    # view-stacked copy of the LF half (no zero-padded SA half any more).
    for k in range(AA):
        lfstk_ref[k * C:(k + 1) * C, :] = (
            xs_ref[:C, P + k * hp:P + (k + 1) * hp].astype(f32))
    am2 = _leaky(jnp.dot(w_lfam_ref[0], lfstk_ref[...],
                         preferred_element_type=f32))
    pre = (jnp.dot(w_am2a_ref[0], am1, preferred_element_type=f32) +
           jnp.dot(w_am2b_ref[0], am2, preferred_element_type=f32))
    out_am_ref[0] = _leaky(pre) + x_am

    # ---------- am_lf_conv (1x1 -> A*A*C) + PixelShuffle(A): one stacked dot,
    # ---------- then one per-view packing pass into mid[4C:5C] --------------
    lf2 = jnp.dot(w_amlf_ref[0], x_am, preferred_element_type=f32)   # (AA*C, hp)
    for k in range(AA):
        mid_ref[C4:C5, P + k * hp:P + (k + 1) * hp] = (
            lf2[k * C:(k + 1) * C, :].astype(bf16))

    # ---------- stage 1: fused [lf_Conv | sa_Conv] on [x_lf | x_sa] ----------
    # One im2col dot, K = 9*2C.
    for t in range(9):
        s = (t // 3 - 1) * (w + 2) + (t % 3 - 1)
        slab1_ref[t * C2:(t + 1) * C2, :] = xs_ref[:, P + s:P + s + Mr]
    h1 = jnp.dot(w1_ref[0], slab1_ref[...], preferred_element_type=f32)  # (4C, Mr)
    mid_ref[0:C4, P:P + Mr] = (h1 * mask).astype(bf16)

    # ---------- stage 2: fused [lf_Conv2 | sa_Conv2] + LeakyReLU + residual --
    # One im2col dot, K = 9*6C (mid padded 5C -> 6C for tile alignment).
    for t in range(9):
        s = (t // 3 - 1) * (w + 2) + (t % 3 - 1)
        slab2_ref[t * C6:(t + 1) * C6, :] = mid_ref[:, P + s:P + s + Mr]
    h2 = jnp.dot(w2_ref[0], slab2_ref[...], preferred_element_type=f32)  # (2C, Mr)
    out_lfsa_ref[0] = _leaky(h2) + act


def inter_group_pallas(gp, mask, x_am_p, x_lfsa_p, *, A, C, h, w):
    B = x_am_p.shape[0]
    n_block = gp["W1"].shape[0]
    AA = A * A
    hp = (h + 2) * (w + 2)
    Mp = AA * hp
    Mr = _round_up(Mp, 128)
    P = 128                                   # end pad >= w+3, lane aligned
    assert P >= w + 3
    assert x_lfsa_p.shape == (B, 2 * C, Mr)

    kern = functools.partial(_inter_group_kernel, A=A, C=C, h=h, w=w, P=P, Mr=Mr)

    def x_spec(shp):
        return pl.BlockSpec(shp, lambda b, k: (b, 0, 0))

    def w_spec(shp):
        return pl.BlockSpec(shp, lambda b, k: (k, 0, 0))

    out_am_p, out_lfsa_p = pl.pallas_call(
        kern,
        out_shape=(jax.ShapeDtypeStruct((B, C, hp), jnp.float32),
                   jax.ShapeDtypeStruct((B, 2 * C, Mr), jnp.float32)),
        grid=(B, n_block),
        in_specs=[x_spec((1, C, hp)),                       # x_am (halo layout)
                  x_spec((1, 2 * C, Mr)),                   # packed [lf | sa]
                  pl.BlockSpec((1, Mr), lambda b, k: (0, 0)),  # interior mask
                  w_spec((1, C, C)),                        # am_Conv
                  w_spec((1, C, C)),                        # am_Conv2 (am1 half)
                  w_spec((1, C, C)),                        # am_Conv2 (am2 half)
                  w_spec((1, C, AA * C)),                   # lf_am_conv (view-stacked)
                  w_spec((1, AA * C, C)),                   # am_lf_conv (view-stacked)
                  w_spec((1, 4 * C, 18 * C)),               # stage-1 im2col weight
                  w_spec((1, 2 * C, 54 * C))],              # stage-2 im2col weight
        out_specs=(x_spec((1, C, hp)), x_spec((1, 2 * C, Mr))),
        scratch_shapes=[pltpu.VMEM((2 * C, Mr + 2 * P), jnp.bfloat16),   # xs
                        pltpu.VMEM((6 * C, Mr + 2 * P), jnp.bfloat16),   # mid
                        pltpu.VMEM((18 * C, Mr), jnp.bfloat16),          # slab1
                        pltpu.VMEM((54 * C, Mr), jnp.bfloat16),          # slab2
                        pltpu.VMEM((AA * C, hp), jnp.float32)],          # lf view stack
        compiler_params=pltpu.CompilerParams(
            dimension_semantics=("parallel", "arbitrary")),
    )(x_am_p, x_lfsa_p, mask,
      gp["w_am"], gp["w_am2a"], gp["w_am2b"],
      gp["w_lfam"], gp["w_amlf"], gp["W1"], gp["W2"])
    return out_am_p, out_lfsa_p


# ----------------------------------------------------------------------------
# One-time weight packing (PyTorch OIHW -> stacked, kernel-ready matrices)
# ----------------------------------------------------------------------------
def prepare_group_params(params, A, C):
    AA = A * A
    f32 = jnp.float32
    W1s, W2s, wam, wam2a, wam2b, wlfam, wamlf = [], [], [], [], [], [], []
    for p in params:
        wl = jnp.transpose(p["lf_Conv"], (2, 3, 0, 1)).reshape(9, C, C)
        ws = jnp.transpose(p["sa_Conv"], (2, 3, 0, 1)).reshape(9, C, C)
        wl2 = jnp.transpose(p["lf_Conv2"], (2, 3, 0, 1)).reshape(9, C, 3 * C)
        ws2 = jnp.transpose(p["sa_Conv2"], (2, 3, 0, 1)).reshape(9, C, 2 * C)

        # stage-1 fused weight; mid rows [lf_Conv(x_lf)|lf_Conv(x_sa)|sa_Conv(x_sa)|sa_Conv(x_lf)]
        W1 = jnp.zeros((9, 4 * C, 2 * C), f32)
        W1 = W1.at[:, 0 * C:1 * C, 0:C].set(wl)
        W1 = W1.at[:, 1 * C:2 * C, C:2 * C].set(wl)
        W1 = W1.at[:, 2 * C:3 * C, C:2 * C].set(ws)
        W1 = W1.at[:, 3 * C:4 * C, 0:C].set(ws)
        W1s.append(jnp.transpose(W1, (1, 0, 2)).reshape(4 * C, 18 * C))

        # stage-2 fused weight over mid rows [lf1|lf3|sa1|sa2|lf2|pad]
        W2 = jnp.zeros((9, 2 * C, 6 * C), f32)
        W2 = W2.at[:, 0:C, 0 * C:1 * C].set(wl2[:, :, 0:C])          # lf_Conv2 . inter_lf1
        W2 = W2.at[:, 0:C, 4 * C:5 * C].set(wl2[:, :, C:2 * C])      # lf_Conv2 . inter_lf2
        W2 = W2.at[:, 0:C, 1 * C:2 * C].set(wl2[:, :, 2 * C:3 * C])  # lf_Conv2 . inter_lf3
        W2 = W2.at[:, C:2 * C, 2 * C:3 * C].set(ws2[:, :, 0:C])      # sa_Conv2 . inter_sa1
        W2 = W2.at[:, C:2 * C, 3 * C:4 * C].set(ws2[:, :, C:2 * C])  # sa_Conv2 . inter_sa2
        W2s.append(jnp.transpose(W2, (1, 0, 2)).reshape(2 * C, 54 * C))

        wam.append(p["am_Conv"][:, :, 0, 0])
        wam2a.append(p["am_Conv2"][:, 0:C, 0, 0])
        wam2b.append(p["am_Conv2"][:, C:2 * C, 0, 0])

        # lf_am_conv: view-stacked columns (k*C + cin), LF half only.
        wlf = jnp.transpose(p["lf_am_conv"], (2, 3, 0, 1)).reshape(AA, C, C)
        wlfam.append(jnp.transpose(wlf, (1, 0, 2)).reshape(C, AA * C))

        # am_lf_conv + PixelShuffle(A): view-stacked rows (k*C + cout).
        wal = jnp.transpose(p["am_lf_conv"][:, :, 0, 0].reshape(C, AA, C), (1, 0, 2))
        wamlf.append(wal.reshape(AA * C, C))

    bf = lambda xs: jnp.stack(xs).astype(jnp.bfloat16)
    f3 = lambda xs: jnp.stack(xs).astype(jnp.float32)
    return dict(W1=bf(W1s), W2=bf(W2s),
                w_am=f3(wam), w_am2a=f3(wam2a), w_am2b=f3(wam2b),
                w_lfam=f3(wlfam), w_amlf=f3(wamlf))


def make_interior_mask(A, h, w):
    """1 on true pixels, 0 on the per-view halo ring and lane-rounding pad."""
    hp = (h + 2) * (w + 2)
    Mp = A * A * hp
    Mr = _round_up(Mp, 128)
    view = np.zeros((h + 2, w + 2), np.float32)
    view[1:h + 1, 1:w + 1] = 1.0
    m = np.zeros((1, Mr), np.float32)
    m[0, :Mp] = np.tile(view.reshape(-1), A * A)
    return jnp.asarray(m)


# ----------------------------------------------------------------------------
# Layout conversions (run once per InterGroup, pure XLA)
# ----------------------------------------------------------------------------
def to_padded_layout(x_am, x_lf, x_sa, A):
    B, C, h, w = x_am.shape
    AA = A * A
    hp = (h + 2) * (w + 2)
    Mp = AA * hp
    Mr = _round_up(Mp, 128)
    pad2 = lambda z: jnp.pad(z, [(0, 0)] * (z.ndim - 2) + [(1, 1), (1, 1)])

    x_am_p = pad2(x_am).reshape(B, C, hp)
    lf = x_lf.reshape(B, C, h, A, w, A)
    lf = jnp.transpose(lf, (0, 1, 3, 5, 2, 4))        # (B, C, A, A, h, w)
    lf = pad2(lf).reshape(B, C, Mp)
    sa = x_sa.reshape(B, AA, C, h, w)
    sa = jnp.transpose(sa, (0, 2, 1, 3, 4))           # (B, C, AA, h, w)
    sa = pad2(sa).reshape(B, C, Mp)
    lfsa = jnp.concatenate([lf, sa], axis=1)
    lfsa = jnp.pad(lfsa, ((0, 0), (0, 0), (0, Mr - Mp)))
    return x_am_p.astype(jnp.float32), lfsa.astype(jnp.float32)


def from_padded_layout(out_am_p, out_lfsa_p, A, C, h, w):
    B = out_am_p.shape[0]
    AA = A * A
    hp = (h + 2) * (w + 2)
    Mp = AA * hp
    am = out_am_p.reshape(B, C, h + 2, w + 2)[:, :, 1:h + 1, 1:w + 1]
    lfsa = out_lfsa_p[:, :, :Mp].reshape(B, 2 * C, AA, h + 2, w + 2)
    lfsa = lfsa[:, :, :, 1:h + 1, 1:w + 1]
    lf = lfsa[:, :C].reshape(B, C, A, A, h, w)
    lf = jnp.transpose(lf, (0, 1, 4, 2, 5, 3)).reshape(B, C, A * h, A * w)
    sa = lfsa[:, C:]                                  # (B, C, AA, h, w)
    sa = jnp.transpose(sa, (0, 2, 1, 3, 4)).reshape(B * AA, C, h, w)
    return am, lf, sa


# ----------------------------------------------------------------------------
# Deterministic parameter init (PyTorch OIHW weight layout)
# ----------------------------------------------------------------------------
def init_block_params(key, A, C):
    ks = jax.random.split(key, 8)

    def conv_w(k, cout, cin, kh, kw):
        scale = 1.0 / np.sqrt(cin * kh * kw)
        return jax.random.normal(k, (cout, cin, kh, kw), jnp.float32) * scale

    return dict(
        sa_Conv=conv_w(ks[0], C, C, 3, 3),
        sa_Conv2=conv_w(ks[1], C, 2 * C, 3, 3),
        am_Conv=conv_w(ks[2], C, C, 1, 1),
        am_Conv2=conv_w(ks[3], C, 2 * C, 1, 1),
        lf_Conv=conv_w(ks[4], C, C, 3, 3),
        lf_Conv2=conv_w(ks[5], C, 3 * C, 3, 3),
        lf_am_conv=conv_w(ks[6], C, C, A, A),
        am_lf_conv=conv_w(ks[7], A * A * C, C, 1, 1),
    )


# ----------------------------------------------------------------------------
# Pure-JAX NCHW reference (mirrors the PyTorch module exactly, fp32)
# ----------------------------------------------------------------------------
def ref_conv(x, w, stride=1, padding=0, dilation=1):
    return jax.lax.conv_general_dilated(
        x, w, (stride, stride), [(padding, padding), (padding, padding)],
        rhs_dilation=(dilation, dilation),
        dimension_numbers=("NCHW", "OIHW", "NCHW"),
        precision=jax.lax.Precision.HIGHEST)


def ref_LF_to_SA(img, A):
    B, C, UH, VW = img.shape
    h, w = UH // A, VW // A
    x = img.reshape(B, C, h, A, w, A)
    x = jnp.transpose(x, (0, 3, 5, 1, 2, 4))
    return x.reshape(B * A * A, C, h, w)


def ref_SA_to_LF(x, A):
    BAA, C, h, w = x.shape
    B = BAA // (A * A)
    x = x.reshape(B, A, A, C, h, w)
    x = jnp.transpose(x, (0, 3, 4, 1, 5, 2))
    return x.reshape(B, C, A * h, A * w)


def ref_pixel_shuffle(x, r):
    B, C, H, W = x.shape
    c = C // (r * r)
    x = x.reshape(B, c, r, r, H, W)
    x = jnp.transpose(x, (0, 1, 4, 2, 5, 3))
    return x.reshape(B, c, H * r, W * r)


def ref_block(p, x_am, x_lf, x_sa, A):
    inter_am1 = ref_conv(x_am, p["am_Conv"])
    inter_am2 = _leaky(ref_conv(x_lf, p["lf_am_conv"], stride=A))
    inter_am = jnp.concatenate([inter_am1, inter_am2], 1)
    out_am = _leaky(ref_conv(inter_am, p["am_Conv2"])) + x_am

    inter_lf1 = ref_conv(x_lf, p["lf_Conv"], padding=A, dilation=A)
    inter_lf2 = ref_pixel_shuffle(ref_conv(x_am, p["am_lf_conv"]), A)
    inter_lf3 = ref_conv(ref_SA_to_LF(x_sa, A), p["lf_Conv"], padding=A, dilation=A)
    inter_lf = jnp.concatenate([inter_lf1, inter_lf2, inter_lf3], 1)
    out_lf = _leaky(ref_conv(inter_lf, p["lf_Conv2"], padding=A, dilation=A)) + x_lf

    inter_sa1 = ref_conv(x_sa, p["sa_Conv"], padding=1)
    inter_sa2 = ref_conv(ref_LF_to_SA(x_lf, A), p["sa_Conv"], padding=1)
    inter_sa = jnp.concatenate([inter_sa1, inter_sa2], 1)
    out_sa = _leaky(ref_conv(inter_sa, p["sa_Conv2"], padding=1)) + x_sa
    return out_am, out_lf, out_sa


# ----------------------------------------------------------------------------
if __name__ == "__main__":
    A, C, h, w, B, n_block = 3, 8, 8, 8, 2, 2

    key = jax.random.PRNGKey(0)
    kp, ka, kl, ks = jax.random.split(key, 4)
    params = [init_block_params(k, A, C) for k in jax.random.split(kp, n_block)]

    # Inputs in PyTorch (NCHW / macropixel LF / sub-aperture stack) convention.
    x_am = jax.random.normal(ka, (B, C, h, w), jnp.float32)
    x_lf = jax.random.normal(kl, (B, C, A * h, A * w), jnp.float32)
    x_sa = jax.random.normal(ks, (B * A * A, C, h, w), jnp.float32)

    # ---- Pallas pipeline: one fused kernel for the whole InterGroup ----
    gp = prepare_group_params(params, A, C)
    mask = make_interior_mask(A, h, w)

    @jax.jit
    def fwd(gp, mask, x_am, x_lf, x_sa):
        x_am_p, x_lfsa_p = to_padded_layout(x_am, x_lf, x_sa, A)
        o_am_p, o_lfsa_p = inter_group_pallas(gp, mask, x_am_p, x_lfsa_p,
                                              A=A, C=C, h=h, w=w)
        return from_padded_layout(o_am_p, o_lfsa_p, A, C, h, w)

    out_am, out_lf, out_sa = fwd(gp, mask, x_am, x_lf, x_sa)
    jax.block_until_ready((out_am, out_lf, out_sa))

    # ---- reference check (pure JAX fp32, mirrors PyTorch InterGroup) ----
    r_am, r_lf, r_sa = x_am, x_lf, x_sa
    for p in params:
        r_am, r_lf, r_sa = ref_block(p, r_am, r_lf, r_sa, A)

    for got, ref in ((out_am, r_am), (out_lf, r_lf), (out_sa, r_sa)):
        assert got.shape == ref.shape, (got.shape, ref.shape)
        err = float(jnp.max(jnp.abs(got - ref)))
        scale = float(jnp.max(jnp.abs(ref))) + 1e-6
        # bf16 conv inputs / weights (f32 accumulation + f32 residual stream).
        assert np.isfinite(err) and err / scale < 5e-2, f"mismatch: {err} (scale {scale})"

    print("KERNEL_OK")
</pallas_src>

<mosaic_0001>
module attributes {stable_mosaic.version = 11 : i64} {
  func.func @_inter_group_kernel(%arg0: i32, %arg1: i32, %arg2: memref<1x8x100xf32, #tpu.memory_space<vmem>>, %arg3: memref<1x16x1024xf32, #tpu.memory_space<vmem>>, %arg4: memref<1x1024xf32, #tpu.memory_space<vmem>>, %arg5: memref<1x8x8xf32, #tpu.memory_space<vmem>>, %arg6: memref<1x8x8xf32, #tpu.memory_space<vmem>>, %arg7: memref<1x8x8xf32, #tpu.memory_space<vmem>>, %arg8: memref<1x8x72xf32, #tpu.memory_space<vmem>>, %arg9: memref<1x72x8xf32, #tpu.memory_space<vmem>>, %arg10: memref<1x32x144xbf16, #tpu.memory_space<vmem>>, %arg11: memref<1x16x432xbf16, #tpu.memory_space<vmem>>, %arg12: memref<1x8x100xf32, #tpu.memory_space<vmem>>, %arg13: memref<1x16x1024xf32, #tpu.memory_space<vmem>>, %arg14: memref<16x1280xbf16, #tpu.memory_space<vmem>>, %arg15: memref<48x1280xbf16, #tpu.memory_space<vmem>>, %arg16: memref<144x1024xbf16, #tpu.memory_space<vmem>>, %arg17: memref<432x1024xbf16, #tpu.memory_space<vmem>>, %arg18: memref<72x100xf32, #tpu.memory_space<vmem>>) attributes {dimension_semantics = [#tpu.dimension_semantics<parallel>, #tpu.dimension_semantics<arbitrary>], iteration_bounds = array<i64: 2, 2>, scalar_prefetch = 0 : i64, scratch_operands = 5 : i64, tpu.core_type = #tpu.core_type<tc>, window_params = [{transform_indices = @transform_0, window_bounds = array<i64: 1, 8, 100>}, {transform_indices = @transform_1, window_bounds = array<i64: 1, 16, 1024>}, {pipeline_mode = #tpu.pipeline_mode<synchronous>, transform_indices = @transform_2, window_bounds = array<i64: 1, 1024>}, {transform_indices = @transform_3, window_bounds = array<i64: 1, 8, 8>}, {transform_indices = @transform_4, window_bounds = array<i64: 1, 8, 8>}, {transform_indices = @transform_5, window_bounds = array<i64: 1, 8, 8>}, {transform_indices = @transform_6, window_bounds = array<i64: 1, 8, 72>}, {transform_indices = @transform_7, window_bounds = array<i64: 1, 72, 8>}, {transform_indices = @transform_8, window_bounds = array<i64: 1, 32, 144>}, {transform_indices = @transform_9, window_bounds = array<i64: 1, 16, 432>}, {transform_indices = @transform_10, window_bounds = array<i64: 1, 8, 100>}, {transform_indices = @transform_11, window_bounds = array<i64: 1, 16, 1024>}]} {
    %c0_i32 = arith.constant 0 : i32
    %0 = arith.cmpi eq, %arg1, %c0_i32 : i32
    %1 = arith.extui %0 : i1 to i32
    %c0_i32_0 = arith.constant 0 : i32
    %2 = arith.cmpi ne, %1, %c0_i32_0 : i32
    scf.if %2 {
      %c0_149 = arith.constant 0 : index
      %c0_150 = arith.constant 0 : index
      %c0_151 = arith.constant 0 : index
      %154 = vector.load %arg2[%c0_149, %c0_150, %c0_151] : memref<1x8x100xf32, #tpu.memory_space<vmem>>, vector<1x8x100xf32>
      %155 = vector.shape_cast %154 : vector<1x8x100xf32> to vector<8x100xf32>
      %c0_152 = arith.constant 0 : index
      %c0_153 = arith.constant 0 : index
      %c0_154 = arith.constant 0 : index
      %156 = vector.load %arg12[%c0_152, %c0_153, %c0_154] : memref<1x8x100xf32, #tpu.memory_space<vmem>>, vector<1x8x100xf32>
      %157 = vector.shape_cast %156 : vector<1x8x100xf32> to vector<8x100xf32>
      %158 = vector.shape_cast %155 : vector<8x100xf32> to vector<1x8x100xf32>
      tpu.vector_store %arg12[%c0_152, %c0_153, %c0_154], %158 {strides = array<i32>} : memref<1x8x100xf32, #tpu.memory_space<vmem>>, vector<1x8x100xf32>,
      %c0_155 = arith.constant 0 : index
      %c0_156 = arith.constant 0 : index
      %c0_157 = arith.constant 0 : index
      %159 = vector.load %arg3[%c0_155, %c0_156, %c0_157] : memref<1x16x1024xf32, #tpu.memory_space<vmem>>, vector<1x16x1024xf32>
      %160 = vector.shape_cast %159 : vector<1x16x1024xf32> to vector<16x1024xf32>
      %c0_158 = arith.constant 0 : index
      %c0_159 = arith.constant 0 : index
      %c0_160 = arith.constant 0 : index
      %161 = vector.load %arg13[%c0_158, %c0_159, %c0_160] : memref<1x16x1024xf32, #tpu.memory_space<vmem>>, vector<1x16x1024xf32>
      %162 = vector.shape_cast %161 : vector<1x16x1024xf32> to vector<16x1024xf32>
      %163 = vector.shape_cast %160 : vector<16x1024xf32> to vector<1x16x1024xf32>
      tpu.vector_store %arg13[%c0_158, %c0_159, %c0_160], %163 {strides = array<i32>} : memref<1x16x1024xf32, #tpu.memory_space<vmem>>, vector<1x16x1024xf32>,
      %cst_161 = arith.constant 0.000000e+00 : bf16
      %164 = vector.broadcast %cst_161 : bf16 to vector<16x1280xbf16>
      %c0_162 = arith.constant 0 : index
      %c0_163 = arith.constant 0 : index
      %165 = vector.load %arg14[%c0_162, %c0_163] : memref<16x1280xbf16, #tpu.memory_space<vmem>>, vector<16x1280xbf16>
      tpu.vector_store %arg14[%c0_162, %c0_163], %164 {strides = array<i32>} : memref<16x1280xbf16, #tpu.memory_space<vmem>>, vector<16x1280xbf16>,
      %cst_164 = arith.constant 0.000000e+00 : bf16
      %166 = vector.broadcast %cst_164 : bf16 to vector<48x1280xbf16>
      %c0_165 = arith.constant 0 : index
      %c0_166 = arith.constant 0 : index
      %167 = vector.load %arg15[%c0_165, %c0_166] : memref<48x1280xbf16, #tpu.memory_space<vmem>>, vector<48x1280xbf16>
      tpu.vector_store %arg15[%c0_165, %c0_166], %166 {strides = array<i32>} : memref<48x1280xbf16, #tpu.memory_space<vmem>>, vector<48x1280xbf16>,
    } else {
    }
    %c0 = arith.constant 0 : index
    %c0_1 = arith.constant 0 : index
    %c0_2 = arith.constant 0 : index
    %3 = vector.load %arg12[%c0, %c0_1, %c0_2] : memref<1x8x100xf32, #tpu.memory_space<vmem>>, vector<1x8x100xf32>
    %4 = vector.shape_cast %3 : vector<1x8x100xf32> to vector<8x100xf32>
    %c0_3 = arith.constant 0 : index
    %c0_4 = arith.constant 0 : index
    %c0_5 = arith.constant 0 : index
    %5 = vector.load %arg13[%c0_3, %c0_4, %c0_5] : memref<1x16x1024xf32, #tpu.memory_space<vmem>>, vector<1x16x1024xf32>
    %6 = vector.shape_cast %5 : vector<1x16x1024xf32> to vector<16x1024xf32>
    %c0_6 = arith.constant 0 : index
    %c0_7 = arith.constant 0 : index
    %7 = vector.load %arg4[%c0_6, %c0_7] : memref<1x1024xf32, #tpu.memory_space<vmem>>, vector<1x1024xf32>
    %8 = vector.broadcast %7 : vector<1x1024xf32> to vector<16x1024xf32>
    %9 = arith.mulf %6, %8 : vector<16x1024xf32>
    %10 = arith.truncf %9 : vector<16x1024xf32> to vector<16x1024xbf16>
    %c0_8 = arith.constant 0 : index
    %c128 = arith.constant 128 : index
    %11 = vector.load %arg14[%c0_8, %c128] : memref<16x1280xbf16, #tpu.memory_space<vmem>>, vector<16x1024xbf16>
    tpu.vector_store %arg14[%c0_8, %c128], %10 {strides = array<i32>} : memref<16x1280xbf16, #tpu.memory_space<vmem>>, vector<16x1024xbf16>,
    %c0_9 = arith.constant 0 : index
    %c0_10 = arith.constant 0 : index
    %c0_11 = arith.constant 0 : index
    %12 = vector.load %arg5[%c0_9, %c0_10, %c0_11] : memref<1x8x8xf32, #tpu.memory_space<vmem>>, vector<1x8x8xf32>
    %13 = vector.shape_cast %12 : vector<1x8x8xf32> to vector<8x8xf32>
    %cst = arith.constant dense<0.000000e+00> : vector<8x100xf32>
    %14 = tpu.matmul %13, %4, %cst {dimension_numbers = #tpu.dot_dimension_numbers<[1], [0], [0], [1], [0, 0, 1, 1], [], []>} : vector<8x8xf32>, vector<8x100xf32>, vector<8x100xf32> -> vector<8x100xf32>
    %c0_12 = arith.constant 0 : index
    %c128_13 = arith.constant 128 : index
    %15 = vector.load %arg14[%c0_12, %c128_13] : memref<16x1280xbf16, #tpu.memory_space<vmem>>, vector<8x100xbf16>
    %16 = arith.extf %15 : vector<8x100xbf16> to vector<8x100xf32>
    %c0_14 = arith.constant 0 : index
    %c0_15 = arith.constant 0 : index
    %17 = vector.load %arg18[%c0_14, %c0_15] : memref<72x100xf32, #tpu.memory_space<vmem>>, vector<8x100xf32>
    tpu.vector_store %arg18[%c0_14, %c0_15], %16 {strides = array<i32>} : memref<72x100xf32, #tpu.memory_space<vmem>>, vector<8x100xf32>,
    %c0_16 = arith.constant 0 : index
    %c228 = arith.constant 228 : index
    %18 = vector.load %arg14[%c0_16, %c228] : memref<16x1280xbf16, #tpu.memory_space<vmem>>, vector<8x100xbf16>
    %19 = arith.extf %18 : vector<8x100xbf16> to vector<8x100xf32>
    %c8 = arith.constant 8 : index
    %c0_17 = arith.constant 0 : index
    %20 = vector.load %arg18[%c8, %c0_17] : memref<72x100xf32, #tpu.memory_space<vmem>>, vector<8x100xf32>
    tpu.vector_store %arg18[%c8, %c0_17], %19 {strides = array<i32>} : memref<72x100xf32, #tpu.memory_space<vmem>>, vector<8x100xf32>,
    %c0_18 = arith.constant 0 : index
    %c328 = arith.constant 328 : index
    %21 = vector.load %arg14[%c0_18, %c328] : memref<16x1280xbf16, #tpu.memory_space<vmem>>, vector<8x100xbf16>
    %22 = arith.extf %21 : vector<8x100xbf16> to vector<8x100xf32>
    %c16 = arith.constant 16 : index
    %c0_19 = arith.constant 0 : index
    %23 = vector.load %arg18[%c16, %c0_19] : memref<72x100xf32, #tpu.memory_space<vmem>>, vector<8x100xf32>
    tpu.vector_store %arg18[%c16, %c0_19], %22 {strides = array<i32>} : memref<72x100xf32, #tpu.memory_space<vmem>>, vector<8x100xf32>,
    %c0_20 = arith.constant 0 : index
    %c428 = arith.constant 428 : index
    %24 = vector.load %arg14[%c0_20, %c428] : memref<16x1280xbf16, #tpu.memory_space<vmem>>, vector<8x100xbf16>
    %25 = arith.extf %24 : vector<8x100xbf16> to vector<8x100xf32>
    %c24 = arith.constant 24 : index
    %c0_21 = arith.constant 0 : index
    %26 = vector.load %arg18[%c24, %c0_21] : memref<72x100xf32, #tpu.memory_space<vmem>>, vector<8x100xf32>
    tpu.vector_store %arg18[%c24, %c0_21], %25 {strides = array<i32>} : memref<72x100xf32, #tpu.memory_space<vmem>>, vector<8x100xf32>,
    %c0_22 = arith.constant 0 : index
    %c528 = arith.constant 528 : index
    %27 = vector.load %arg14[%c0_22, %c528] : memref<16x1280xbf16, #tpu.memory_space<vmem>>, vector<8x100xbf16>
    %28 = arith.extf %27 : vector<8x100xbf16> to vector<8x100xf32>
    %c32 = arith.constant 32 : index
    %c0_23 = arith.constant 0 : index
    %29 = vector.load %arg18[%c32, %c0_23] : memref<72x100xf32, #tpu.memory_space<vmem>>, vector<8x100xf32>
    tpu.vector_store %arg18[%c32, %c0_23], %28 {strides = array<i32>} : memref<72x100xf32, #tpu.memory_space<vmem>>, vector<8x100xf32>,
    %c0_24 = arith.constant 0 : index
    %c628 = arith.constant 628 : index
    %30 = vector.load %arg14[%c0_24, %c628] : memref<16x1280xbf16, #tpu.memory_space<vmem>>, vector<8x100xbf16>
    %31 = arith.extf %30 : vector<8x100xbf16> to vector<8x100xf32>
    %c40 = arith.constant 40 : index
    %c0_25 = arith.constant 0 : index
    %32 = vector.load %arg18[%c40, %c0_25] : memref<72x100xf32, #tpu.memory_space<vmem>>, vector<8x100xf32>
    tpu.vector_store %arg18[%c40, %c0_25], %31 {strides = array<i32>} : memref<72x100xf32, #tpu.memory_space<vmem>>, vector<8x100xf32>,
    %c0_26 = arith.constant 0 : index
    %c728 = arith.constant 728 : index
    %33 = vector.load %arg14[%c0_26, %c728] : memref<16x1280xbf16, #tpu.memory_space<vmem>>, vector<8x100xbf16>
    %34 = arith.extf %33 : vector<8x100xbf16> to vector<8x100xf32>
    %c48 = arith.constant 48 : index
    %c0_27 = arith.constant 0 : index
    %35 = vector.load %arg18[%c48, %c0_27] : memref<72x100xf32, #tpu.memory_space<vmem>>, vector<8x100xf32>
    tpu.vector_store %arg18[%c48, %c0_27], %34 {strides = array<i32>} : memref<72x100xf32, #tpu.memory_space<vmem>>, vector<8x100xf32>,
    %c0_28 = arith.constant 0 : index
    %c828 = arith.constant 828 : index
    %36 = vector.load %arg14[%c0_28, %c828] : memref<16x1280xbf16, #tpu.memory_space<vmem>>, vector<8x100xbf16>
    %37 = arith.extf %36 : vector<8x100xbf16> to vector<8x100xf32>
    %c56 = arith.constant 56 : index
    %c0_29 = arith.constant 0 : index
    %38 = vector.load %arg18[%c56, %c0_29] : memref<72x100xf32, #tpu.memory_space<vmem>>, vector<8x100xf32>
    tpu.vector_store %arg18[%c56, %c0_29], %37 {strides = array<i32>} : memref<72x100xf32, #tpu.memory_space<vmem>>, vector<8x100xf32>,
    %c0_30 = arith.constant 0 : index
    %c928 = arith.constant 928 : index
    %39 = vector.load %arg14[%c0_30, %c928] : memref<16x1280xbf16, #tpu.memory_space<vmem>>, vector<8x100xbf16>
    %40 = arith.extf %39 : vector<8x100xbf16> to vector<8x100xf32>
    %c64 = arith.constant 64 : index
    %c0_31 = arith.constant 0 : index
    %41 = vector.load %arg18[%c64, %c0_31] : memref<72x100xf32, #tpu.memory_space<vmem>>, vector<8x100xf32>
    tpu.vector_store %arg18[%c64, %c0_31], %40 {strides = array<i32>} : memref<72x100xf32, #tpu.memory_space<vmem>>, vector<8x100xf32>,
    %c0_32 = arith.constant 0 : index
    %c0_33 = arith.constant 0 : index
    %c0_34 = arith.constant 0 : index
    %42 = vector.load %arg8[%c0_32, %c0_33, %c0_34] : memref<1x8x72xf32, #tpu.memory_space<vmem>>, vector<1x8x72xf32>
    %43 = vector.shape_cast %42 : vector<1x8x72xf32> to vector<8x72xf32>
    %c0_35 = arith.constant 0 : index
    %c0_36 = arith.constant 0 : index
    %44 = vector.load %arg18[%c0_35, %c0_36] : memref<72x100xf32, #tpu.memory_space<vmem>>, vector<72x100xf32>
    %cst_37 = arith.constant dense<0.000000e+00> : vector<8x100xf32>
    %45 = tpu.matmul %43, %44, %cst_37 {dimension_numbers = #tpu.dot_dimension_numbers<[1], [0], [0], [1], [0, 0, 1, 1], [], []>} : vector<8x72xf32>, vector<72x100xf32>, vector<8x100xf32> -> vector<8x100xf32>
    %cst_38 = arith.constant 0.000000e+00 : f32
    %46 = vector.broadcast %cst_38 : f32 to vector<8x100xf32>
    %47 = arith.cmpf oge, %45, %46 : vector<8x100xf32>
    %cst_39 = arith.constant 1.000000e-01 : f32
    %48 = vector.broadcast %cst_39 : f32 to vector<8x100xf32>
    %49 = arith.mulf %48, %45 : vector<8x100xf32>
    %50 = arith.select %47, %45, %49 : vector<8x100xi1>, vector<8x100xf32>
    %c0_40 = arith.constant 0 : index
    %c0_41 = arith.constant 0 : index
    %c0_42 = arith.constant 0 : index
    %51 = vector.load %arg6[%c0_40, %c0_41, %c0_42] : memref<1x8x8xf32, #tpu.memory_space<vmem>>, vector<1x8x8xf32>
    %52 = vector.shape_cast %51 : vector<1x8x8xf32> to vector<8x8xf32>
    %cst_43 = arith.constant dense<0.000000e+00> : vector<8x100xf32>
    %53 = tpu.matmul %52, %14, %cst_43 {dimension_numbers = #tpu.dot_dimension_numbers<[1], [0], [0], [1], [0, 0, 1, 1], [], []>} : vector<8x8xf32>, vector<8x100xf32>, vector<8x100xf32> -> vector<8x100xf32>
    %c0_44 = arith.constant 0 : index
    %c0_45 = arith.constant 0 : index
    %c0_46 = arith.constant 0 : index
    %54 = vector.load %arg7[%c0_44, %c0_45, %c0_46] : memref<1x8x8xf32, #tpu.memory_space<vmem>>, vector<1x8x8xf32>
    %55 = vector.shape_cast %54 : vector<1x8x8xf32> to vector<8x8xf32>
    %cst_47 = arith.constant dense<0.000000e+00> : vector<8x100xf32>
    %56 = tpu.matmul %55, %50, %cst_47 {dimension_numbers = #tpu.dot_dimension_numbers<[1], [0], [0], [1], [0, 0, 1, 1], [], []>} : vector<8x8xf32>, vector<8x100xf32>, vector<8x100xf32> -> vector<8x100xf32>
    %57 = arith.addf %53, %56 : vector<8x100xf32>
    %cst_48 = arith.constant 0.000000e+00 : f32
    %58 = vector.broadcast %cst_48 : f32 to vector<8x100xf32>
    %59 = arith.cmpf oge, %57, %58 : vector<8x100xf32>
    %cst_49 = arith.constant 1.000000e-01 : f32
    %60 = vector.broadcast %cst_49 : f32 to vector<8x100xf32>
    %61 = arith.mulf %60, %57 : vector<8x100xf32>
    %62 = arith.select %59, %57, %61 : vector<8x100xi1>, vector<8x100xf32>
    %63 = arith.addf %62, %4 : vector<8x100xf32>
    %c0_50 = arith.constant 0 : index
    %c0_51 = arith.constant 0 : index
    %c0_52 = arith.constant 0 : index
    %64 = vector.load %arg12[%c0_50, %c0_51, %c0_52] : memref<1x8x100xf32, #tpu.memory_space<vmem>>, vector<1x8x100xf32>
    %65 = vector.shape_cast %64 : vector<1x8x100xf32> to vector<8x100xf32>
    %66 = vector.shape_cast %63 : vector<8x100xf32> to vector<1x8x100xf32>
    tpu.vector_store %arg12[%c0_50, %c0_51, %c0_52], %66 {strides = array<i32>} : memref<1x8x100xf32, #tpu.memory_space<vmem>>, vector<1x8x100xf32>,
    %c0_53 = arith.constant 0 : index
    %c0_54 = arith.constant 0 : index
    %c0_55 = arith.constant 0 : index
    %67 = vector.load %arg9[%c0_53, %c0_54, %c0_55] : memref<1x72x8xf32, #tpu.memory_space<vmem>>, vector<1x72x8xf32>
    %68 = vector.shape_cast %67 : vector<1x72x8xf32> to vector<72x8xf32>
    %cst_56 = arith.constant dense<0.000000e+00> : vector<72x100xf32>
    %69 = tpu.matmul %68, %4, %cst_56 {dimension_numbers = #tpu.dot_dimension_numbers<[1], [0], [0], [1], [0, 0, 1, 1], [], []>} : vector<72x8xf32>, vector<8x100xf32>, vector<72x100xf32> -> vector<72x100xf32>
    %70 = vector.extract_strided_slice %69 {offsets = [0, 0], sizes = [8, 100], strides = [1, 1]} : vector<72x100xf32> to vector<8x100xf32>
    %71 = arith.truncf %70 : vector<8x100xf32> to vector<8x100xbf16>
    %c32_57 = arith.constant 32 : index
    %c128_58 = arith.constant 128 : index
    %72 = vector.load %arg15[%c32_57, %c128_58] : memref<48x1280xbf16, #tpu.memory_space<vmem>>, vector<8x100xbf16>
    tpu.vector_store %arg15[%c32_57, %c128_58], %71 {strides = array<i32>} : memref<48x1280xbf16, #tpu.memory_space<vmem>>, vector<8x100xbf16>,
    %73 = vector.extract_strided_slice %69 {offsets = [8, 0], sizes = [8, 100], strides = [1, 1]} : vector<72x100xf32> to vector<8x100xf32>
    %74 = arith.truncf %73 : vector<8x100xf32> to vector<8x100xbf16>
    %c32_59 = arith.constant 32 : index
    %c228_60 = arith.constant 228 : index
    %75 = vector.load %arg15[%c32_59, %c228_60] : memref<48x1280xbf16, #tpu.memory_space<vmem>>, vector<8x100xbf16>
    tpu.vector_store %arg15[%c32_59, %c228_60], %74 {strides = array<i32>} : memref<48x1280xbf16, #tpu.memory_space<vmem>>, vector<8x100xbf16>,
    %76 = vector.extract_strided_slice %69 {offsets = [16, 0], sizes = [8, 100], strides = [1, 1]} : vector<72x100xf32> to vector<8x100xf32>
    %77 = arith.truncf %76 : vector<8x100xf32> to vector<8x100xbf16>
    %c32_61 = arith.constant 32 : index
    %c328_62 = arith.constant 328 : index
    %78 = vector.load %arg15[%c32_61, %c328_62] : memref<48x1280xbf16, #tpu.memory_space<vmem>>, vector<8x100xbf16>
    tpu.vector_store %arg15[%c32_61, %c328_62], %77 {strides = array<i32>} : memref<48x1280xbf16, #tpu.memory_space<vmem>>, vector<8x100xbf16>,
    %79 = vector.extract_strided_slice %69 {offsets = [24, 0], sizes = [8, 100], strides = [1, 1]} : vector<72x100xf32> to vector<8x100xf32>
    %80 = arith.truncf %79 : vector<8x100xf32> to vector<8x100xbf16>
    %c32_63 = arith.constant 32 : index
    %c428_64 = arith.constant 428 : index
    %81 = vector.load %arg15[%c32_63, %c428_64] : memref<48x1280xbf16, #tpu.memory_space<vmem>>, vector<8x100xbf16>
    tpu.vector_store %arg15[%c32_63, %c428_64], %80 {strides = array<i32>} : memref<48x1280xbf16, #tpu.memory_space<vmem>>, vector<8x100xbf16>,
    %82 = vector.extract_strided_slice %69 {offsets = [32, 0], sizes = [8, 100], strides = [1, 1]} : vector<72x100xf32> to vector<8x100xf32>
    %83 = arith.truncf %82 : vector<8x100xf32> to vector<8x100xbf16>
    %c32_65 = arith.constant 32 : index
    %c528_66 = arith.constant 528 : index
    %84 = vector.load %arg15[%c32_65, %c528_66] : memref<48x1280xbf16, #tpu.memory_space<vmem>>, vector<8x100xbf16>
    tpu.vector_store %arg15[%c32_65, %c528_66], %83 {strides = array<i32>} : memref<48x1280xbf16, #tpu.memory_space<vmem>>, vector<8x100xbf16>,
    %85 = vector.extract_strided_slice %69 {offsets = [40, 0], sizes = [8, 100], strides = [1, 1]} : vector<72x100xf32> to vector<8x100xf32>
    %86 = arith.truncf %85 : vector<8x100xf32> to vector<8x100xbf16>
    %c32_67 = arith.constant 32 : index
    %c628_68 = arith.constant 628 : index
    %87 = vector.load %arg15[%c32_67, %c628_68] : memref<48x1280xbf16, #tpu.memory_space<vmem>>, vector<8x100xbf16>
    tpu.vector_store %arg15[%c32_67, %c628_68], %86 {strides = array<i32>} : memref<48x1280xbf16, #tpu.memory_space<vmem>>, vector<8x100xbf16>,
    %88 = vector.extract_strided_slice %69 {offsets = [48, 0], sizes = [8, 100], strides = [1, 1]} : vector<72x100xf32> to vector<8x100xf32>
    %89 = arith.truncf %88 : vector<8x100xf32> to vector<8x100xbf16>
    %c32_69 = arith.constant 32 : index
    %c728_70 = arith.constant 728 : index
    %90 = vector.load %arg15[%c32_69, %c728_70] : memref<48x1280xbf16, #tpu.memory_space<vmem>>, vector<8x100xbf16>
    tpu.vector_store %arg15[%c32_69, %c728_70], %89 {strides = array<i32>} : memref<48x1280xbf16, #tpu.memory_space<vmem>>, vector<8x100xbf16>,
    %91 = vector.extract_strided_slice %69 {offsets = [56, 0], sizes = [8, 100], strides = [1, 1]} : vector<72x100xf32> to vector<8x100xf32>
    %92 = arith.truncf %91 : vector<8x100xf32> to vector<8x100xbf16>
    %c32_71 = arith.constant 32 : index
    %c828_72 = arith.constant 828 : index
    %93 = vector.load %arg15[%c32_71, %c828_72] : memref<48x1280xbf16, #tpu.memory_space<vmem>>, vector<8x100xbf16>
    tpu.vector_store %arg15[%c32_71, %c828_72], %92 {strides = array<i32>} : memref<48x1280xbf16, #tpu.memory_space<vmem>>, vector<8x100xbf16>,
    %94 = vector.extract_strided_slice %69 {offsets = [64, 0], sizes = [8, 100], strides = [1, 1]} : vector<72x100xf32> to vector<8x100xf32>
    %95 = arith.truncf %94 : vector<8x100xf32> to vector<8x100xbf16>
    %c32_73 = arith.constant 32 : index
    %c928_74 = arith.constant 928 : index
    %96 = vector.load %arg15[%c32_73, %c928_74] : memref<48x1280xbf16, #tpu.memory_space<vmem>>, vector<8x100xbf16>
    tpu.vector_store %arg15[%c32_73, %c928_74], %95 {strides = array<i32>} : memref<48x1280xbf16, #tpu.memory_space<vmem>>, vector<8x100xbf16>,
    %c0_75 = arith.constant 0 : index
    %c117 = arith.constant 117 : index
    %97 = vector.load %arg14[%c0_75, %c117] : memref<16x1280xbf16, #tpu.memory_space<vmem>>, vector<16x1024xbf16>
    %c0_76 = arith.constant 0 : index
    %c0_77 = arith.constant 0 : index
    %98 = vector.load %arg16[%c0_76, %c0_77] : memref<144x1024xbf16, #tpu.memory_space<vmem>>, vector<16x1024xbf16>
    tpu.vector_store %arg16[%c0_76, %c0_77], %97 {strides = array<i32>} : memref<144x1024xbf16, #tpu.memory_space<vmem>>, vector<16x1024xbf16>,
    %c0_78 = arith.constant 0 : index
    %c118 = arith.constant 118 : index
    %99 = vector.load %arg14[%c0_78, %c118] : memref<16x1280xbf16, #tpu.memory_space<vmem>>, vector<16x1024xbf16>
    %c16_79 = arith.constant 16 : index
    %c0_80 = arith.constant 0 : index
    %100 = vector.load %arg16[%c16_79, %c0_80] : memref<144x1024xbf16, #tpu.memory_space<vmem>>, vector<16x1024xbf16>
    tpu.vector_store %arg16[%c16_79, %c0_80], %99 {strides = array<i32>} : memref<144x1024xbf16, #tpu.memory_space<vmem>>, vector<16x1024xbf16>,
    %c0_81 = arith.constant 0 : index
    %c119 = arith.constant 119 : index
    %101 = vector.load %arg14[%c0_81, %c119] : memref<16x1280xbf16, #tpu.memory_space<vmem>>, vector<16x1024xbf16>
    %c32_82 = arith.constant 32 : index
    %c0_83 = arith.constant 0 : index
    %102 = vector.load %arg16[%c32_82, %c0_83] : memref<144x1024xbf16, #tpu.memory_space<vmem>>, vector<16x1024xbf16>
    tpu.vector_store %arg16[%c32_82, %c0_83], %101 {strides = array<i32>} : memref<144x1024xbf16, #tpu.memory_space<vmem>>, vector<16x1024xbf16>,
    %c0_84 = arith.constant 0 : index
    %c127 = arith.constant 127 : index
    %103 = vector.load %arg14[%c0_84, %c127] : memref<16x1280xbf16, #tpu.memory_space<vmem>>, vector<16x1024xbf16>
    %c48_85 = arith.constant 48 : index
    %c0_86 = arith.constant 0 : index
    %104 = vector.load %arg16[%c48_85, %c0_86] : memref<144x1024xbf16, #tpu.memory_space<vmem>>, vector<16x1024xbf16>
    tpu.vector_store %arg16[%c48_85, %c0_86], %103 {strides = array<i32>} : memref<144x1024xbf16, #tpu.memory_space<vmem>>, vector<16x1024xbf16>,
    %c0_87 = arith.constant 0 : index
    %c128_88 = arith.constant 128 : index
    %105 = vector.load %arg14[%c0_87, %c128_88] : memref<16x1280xbf16, #tpu.memory_space<vmem>>, vector<16x1024xbf16>
    %c64_89 = arith.constant 64 : index
    %c0_90 = arith.constant 0 : index
    %106 = vector.load %arg16[%c64_89, %c0_90] : memref<144x1024xbf16, #tpu.memory_space<vmem>>, vector<16x1024xbf16>
    tpu.vector_store %arg16[%c64_89, %c0_90], %105 {strides = array<i32>} : memref<144x1024xbf16, #tpu.memory_space<vmem>>, vector<16x1024xbf16>,
    %c0_91 = arith.constant 0 : index
    %c129 = arith.constant 129 : index
    %107 = vector.load %arg14[%c0_91, %c129] : memref<16x1280xbf16, #tpu.memory_space<vmem>>, vector<16x1024xbf16>
    %c80 = arith.constant 80 : index
    %c0_92 = arith.constant 0 : index
    %108 = vector.load %arg16[%c80, %c0_92] : memref<144x1024xbf16, #tpu.memory_space<vmem>>, vector<16x1024xbf16>
    tpu.vector_store %arg16[%c80, %c0_92], %107 {strides = array<i32>} : memref<144x1024xbf16, #tpu.memory_space<vmem>>, vector<16x1024xbf16>,
    %c0_93 = arith.constant 0 : index
    %c137 = arith.constant 137 : index
    %109 = vector.load %arg14[%c0_93, %c137] : memref<16x1280xbf16, #tpu.memory_space<vmem>>, vector<16x1024xbf16>
    %c96 = arith.constant 96 : index
    %c0_94 = arith.constant 0 : index
    %110 = vector.load %arg16[%c96, %c0_94] : memref<144x1024xbf16, #tpu.memory_space<vmem>>, vector<16x1024xbf16>
    tpu.vector_store %arg16[%c96, %c0_94], %109 {strides = array<i32>} : memref<144x1024xbf16, #tpu.memory_space<vmem>>, vector<16x1024xbf16>,
    %c0_95 = arith.constant 0 : index
    %c138 = arith.constant 138 : index
    %111 = vector.load %arg14[%c0_95, %c138] : memref<16x1280xbf16, #tpu.memory_space<vmem>>, vector<16x1024xbf16>
    %c112 = arith.constant 112 : index
    %c0_96 = arith.constant 0 : index
    %112 = vector.load %arg16[%c112, %c0_96] : memref<144x1024xbf16, #tpu.memory_space<vmem>>, vector<16x1024xbf16>
    tpu.vector_store %arg16[%c112, %c0_96], %111 {strides = array<i32>} : memref<144x1024xbf16, #tpu.memory_space<vmem>>, vector<16x1024xbf16>,
    %c0_97 = arith.constant 0 : index
    %c139 = arith.constant 139 : index
    %113 = vector.load %arg14[%c0_97, %c139] : memref<16x1280xbf16, #tpu.memory_space<vmem>>, vector<16x1024xbf16>
    %c128_98 = arith.constant 128 : index
    %c0_99 = arith.constant 0 : index
    %114 = vector.load %arg16[%c128_98, %c0_99] : memref<144x1024xbf16, #tpu.memory_space<vmem>>, vector<16x1024xbf16>
    tpu.vector_store %arg16[%c128_98, %c0_99], %113 {strides = array<i32>} : memref<144x1024xbf16, #tpu.memory_space<vmem>>, vector<16x1024xbf16>,
    %c0_100 = arith.constant 0 : index
    %c0_101 = arith.constant 0 : index
    %c0_102 = arith.constant 0 : index
    %115 = vector.load %arg10[%c0_100, %c0_101, %c0_102] : memref<1x32x144xbf16, #tpu.memory_space<vmem>>, vector<1x32x144xbf16>
    %116 = vector.shape_cast %115 : vector<1x32x144xbf16> to vector<32x144xbf16>
    %c0_103 = arith.constant 0 : index
    %c0_104 = arith.constant 0 : index
    %117 = vector.load %arg16[%c0_103, %c0_104] : memref<144x1024xbf16, #tpu.memory_space<vmem>>, vector<144x1024xbf16>
    %cst_105 = arith.constant dense<0.000000e+00> : vector<32x1024xf32>
    %118 = tpu.matmul %116, %117, %cst_105 {dimension_numbers = #tpu.dot_dimension_numbers<[1], [0], [0], [1], [0, 0, 1, 1], [], []>} : vector<32x144xbf16>, vector<144x1024xbf16>, vector<32x1024xf32> -> vector<32x1024xf32>
    %119 = vector.broadcast %7 : vector<1x1024xf32> to vector<32x1024xf32>
    %120 = arith.mulf %118, %119 : vector<32x1024xf32>
    %121 = arith.truncf %120 : vector<32x1024xf32> to vector<32x1024xbf16>
    %c0_106 = arith.constant 0 : index
    %c128_107 = arith.constant 128 : index
    %122 = vector.load %arg15[%c0_106, %c128_107] : memref<48x1280xbf16, #tpu.memory_space<vmem>>, vector<32x1024xbf16>
    tpu.vector_store %arg15[%c0_106, %c128_107], %121 {strides = array<i32>} : memref<48x1280xbf16, #tpu.memory_space<vmem>>, vector<32x1024xbf16>,
    %c0_108 = arith.constant 0 : index
    %c117_109 = arith.constant 117 : index
    %123 = vector.load %arg15[%c0_108, %c117_109] : memref<48x1280xbf16, #tpu.memory_space<vmem>>, vector<48x1024xbf16>
    %c0_110 = arith.constant 0 : index
    %c0_111 = arith.constant 0 : index
    %124 = vector.load %arg17[%c0_110, %c0_111] : memref<432x1024xbf16, #tpu.memory_space<vmem>>, vector<48x1024xbf16>
    tpu.vector_store %arg17[%c0_110, %c0_111], %123 {strides = array<i32>} : memref<432x1024xbf16, #tpu.memory_space<vmem>>, vector<48x1024xbf16>,
    %c0_112 = arith.constant 0 : index
    %c118_113 = arith.constant 118 : index
    %125 = vector.load %arg15[%c0_112, %c118_113] : memref<48x1280xbf16, #tpu.memory_space<vmem>>, vector<48x1024xbf16>
    %c48_114 = arith.constant 48 : index
    %c0_115 = arith.constant 0 : index
    %126 = vector.load %arg17[%c48_114, %c0_115] : memref<432x1024xbf16, #tpu.memory_space<vmem>>, vector<48x1024xbf16>
    tpu.vector_store %arg17[%c48_114, %c0_115], %125 {strides = array<i32>} : memref<432x1024xbf16, #tpu.memory_space<vmem>>, vector<48x1024xbf16>,
    %c0_116 = arith.constant 0 : index
    %c119_117 = arith.constant 119 : index
    %127 = vector.load %arg15[%c0_116, %c119_117] : memref<48x1280xbf16, #tpu.memory_space<vmem>>, vector<48x1024xbf16>
    %c96_118 = arith.constant 96 : index
    %c0_119 = arith.constant 0 : index
    %128 = vector.load %arg17[%c96_118, %c0_119] : memref<432x1024xbf16, #tpu.memory_space<vmem>>, vector<48x1024xbf16>
    tpu.vector_store %arg17[%c96_118, %c0_119], %127 {strides = array<i32>} : memref<432x1024xbf16, #tpu.memory_space<vmem>>, vector<48x1024xbf16>,
    %c0_120 = arith.constant 0 : index
    %c127_121 = arith.constant 127 : index
    %129 = vector.load %arg15[%c0_120, %c127_121] : memref<48x1280xbf16, #tpu.memory_space<vmem>>, vector<48x1024xbf16>
    %c144 = arith.constant 144 : index
    %c0_122 = arith.constant 0 : index
    %130 = vector.load %arg17[%c144, %c0_122] : memref<432x1024xbf16, #tpu.memory_space<vmem>>, vector<48x1024xbf16>
    tpu.vector_store %arg17[%c144, %c0_122], %129 {strides = array<i32>} : memref<432x1024xbf16, #tpu.memory_space<vmem>>, vector<48x1024xbf16>,
    %c0_123 = arith.constant 0 : index
    %c128_124 = arith.constant 128 : index
    %131 = vector.load %arg15[%c0_123, %c128_124] : memref<48x1280xbf16, #tpu.memory_space<vmem>>, vector<48x1024xbf16>
    %c192 = arith.constant 192 : index
    %c0_125 = arith.constant 0 : index
    %132 = vector.load %arg17[%c192, %c0_125] : memref<432x1024xbf16, #tpu.memory_space<vmem>>, vector<48x1024xbf16>
    tpu.vector_store %arg17[%c192, %c0_125], %131 {strides = array<i32>} : memref<432x1024xbf16, #tpu.memory_space<vmem>>, vector<48x1024xbf16>,
    %c0_126 = arith.constant 0 : index
    %c129_127 = arith.constant 129 : index
    %133 = vector.load %arg15[%c0_126, %c129_127] : memref<48x1280xbf16, #tpu.memory_space<vmem>>, vector<48x1024xbf16>
    %c240 = arith.constant 240 : index
    %c0_128 = arith.constant 0 : index
    %134 = vector.load %arg17[%c240, %c0_128] : memref<432x1024xbf16, #tpu.memory_space<vmem>>, vector<48x1024xbf16>
    tpu.vector_store %arg17[%c240, %c0_128], %133 {strides = array<i32>} : memref<432x1024xbf16, #tpu.memory_space<vmem>>, vector<48x1024xbf16>,
    %c0_129 = arith.constant 0 : index
    %c137_130 = arith.constant 137 : index
    %135 = vector.load %arg15[%c0_129, %c137_130] : memref<48x1280xbf16, #tpu.memory_space<vmem>>, vector<48x1024xbf16>
    %c288 = arith.constant 288 : index
    %c0_131 = arith.constant 0 : index
    %136 = vector.load %arg17[%c288, %c0_131] : memref<432x1024xbf16, #tpu.memory_space<vmem>>, vector<48x1024xbf16>
    tpu.vector_store %arg17[%c288, %c0_131], %135 {strides = array<i32>} : memref<432x1024xbf16, #tpu.memory_space<vmem>>, vector<48x1024xbf16>,
    %c0_132 = arith.constant 0 : index
    %c138_133 = arith.constant 138 : index
    %137 = vector.load %arg15[%c0_132, %c138_133] : memref<48x1280xbf16, #tpu.memory_space<vmem>>, vector<48x1024xbf16>
    %c336 = arith.constant 336 : index
    %c0_134 = arith.constant 0 : index
    %138 = vector.load %arg17[%c336, %c0_134] : memref<432x1024xbf16, #tpu.memory_space<vmem>>, vector<48x1024xbf16>
    tpu.vector_store %arg17[%c336, %c0_134], %137 {strides = array<i32>} : memref<432x1024xbf16, #tpu.memory_space<vmem>>, vector<48x1024xbf16>,
    %c0_135 = arith.constant 0 : index
    %c139_136 = arith.constant 139 : index
    %139 = vector.load %arg15[%c0_135, %c139_136] : memref<48x1280xbf16, #tpu.memory_space<vmem>>, vector<48x1024xbf16>
    %c384 = arith.constant 384 : index
    %c0_137 = arith.constant 0 : index
    %140 = vector.load %arg17[%c384, %c0_137] : memref<432x1024xbf16, #tpu.memory_space<vmem>>, vector<48x1024xbf16>
    tpu.vector_store %arg17[%c384, %c0_137], %139 {strides = array<i32>} : memref<432x1024xbf16, #tpu.memory_space<vmem>>, vector<48x1024xbf16>,
    %c0_138 = arith.constant 0 : index
    %c0_139 = arith.constant 0 : index
    %c0_140 = arith.constant 0 : index
    %141 = vector.load %arg11[%c0_138, %c0_139, %c0_140] : memref<1x16x432xbf16, #tpu.memory_space<vmem>>, vector<1x16x432xbf16>
    %142 = vector.shape_cast %141 : vector<1x16x432xbf16> to vector<16x432xbf16>
    %c0_141 = arith.constant 0 : index
    %c0_142 = arith.constant 0 : index
    %143 = vector.load %arg17[%c0_141, %c0_142] : memref<432x1024xbf16, #tpu.memory_space<vmem>>, vector<432x1024xbf16>
    %cst_143 = arith.constant dense<0.000000e+00> : vector<16x1024xf32>
    %144 = tpu.matmul %142, %143, %cst_143 {dimension_numbers = #tpu.dot_dimension_numbers<[1], [0], [0], [1], [0, 0, 1, 1], [], []>} : vector<16x432xbf16>, vector<432x1024xbf16>, vector<16x1024xf32> -> vector<16x1024xf32>
    %cst_144 = arith.constant 0.000000e+00 : f32
    %145 = vector.broadcast %cst_144 : f32 to vector<16x1024xf32>
    %146 = arith.cmpf oge, %144, %145 : vector<16x1024xf32>
    %cst_145 = arith.constant 1.000000e-01 : f32
    %147 = vector.broadcast %cst_145 : f32 to vector<16x1024xf32>
    %148 = arith.mulf %147, %144 : vector<16x1024xf32>
    %149 = arith.select %146, %144, %148 : vector<16x1024xi1>, vector<16x1024xf32>
    %150 = arith.addf %149, %6 : vector<16x1024xf32>
    %c0_146 = arith.constant 0 : index
    %c0_147 = arith.constant 0 : index
    %c0_148 = arith.constant 0 : index
    %151 = vector.load %arg13[%c0_146, %c0_147, %c0_148] : memref<1x16x1024xf32, #tpu.memory_space<vmem>>, vector<1x16x1024xf32>
    %152 = vector.shape_cast %151 : vector<1x16x1024xf32> to vector<16x1024xf32>
    %153 = vector.shape_cast %150 : vector<16x1024xf32> to vector<1x16x1024xf32>
    tpu.vector_store %arg13[%c0_146, %c0_147, %c0_148], %153 {strides = array<i32>} : memref<1x16x1024xf32, #tpu.memory_space<vmem>>, vector<1x16x1024xf32>,
    return
  }
  func.func @transform_0(%arg0: i32, %arg1: i32) -> (i32, i32, i32) {
    %c0_i32 = arith.constant 0 : i32
    %c0_i32_0 = arith.constant 0 : i32
    %c0_i32_1 = arith.constant 0 : i32
    return %arg0, %c0_i32, %c0_i32_0 : i32, i32, i32
  }
  func.func @transform_1(%arg0: i32, %arg1: i32) -> (i32, i32, i32) {
    %c0_i32 = arith.constant 0 : i32
    %c0_i32_0 = arith.constant 0 : i32
    %c0_i32_1 = arith.constant 0 : i32
    return %arg0, %c0_i32, %c0_i32_0 : i32, i32, i32
  }
  func.func @transform_2(%arg0: i32, %arg1: i32) -> (i32, i32) {
    %c0_i32 = arith.constant 0 : i32
    %c0_i32_0 = arith.constant 0 : i32
    %c0_i32_1 = arith.constant 0 : i32
    return %c0_i32, %c0_i32_0 : i32, i32
  }
  func.func @transform_3(%arg0: i32, %arg1: i32) -> (i32, i32, i32) {
    %c0_i32 = arith.constant 0 : i32
    %c0_i32_0 = arith.constant 0 : i32
    %c0_i32_1 = arith.constant 0 : i32
    return %arg1, %c0_i32, %c0_i32_0 : i32, i32, i32
  }
  func.func @transform_4(%arg0: i32, %arg1: i32) -> (i32, i32, i32) {
    %c0_i32 = arith.constant 0 : i32
    %c0_i32_0 = arith.constant 0 : i32
    %c0_i32_1 = arith.constant 0 : i32
    return %arg1, %c0_i32, %c0_i32_0 : i32, i32, i32
  }
  func.func @transform_5(%arg0: i32, %arg1: i32) -> (i32, i32, i32) {
    %c0_i32 = arith.constant 0 : i32
    %c0_i32_0 = arith.constant 0 : i32
    %c0_i32_1 = arith.constant 0 : i32
    return %arg1, %c0_i32, %c0_i32_0 : i32, i32, i32
  }
  func.func @transform_6(%arg0: i32, %arg1: i32) -> (i32, i32, i32) {
    %c0_i32 = arith.constant 0 : i32
    %c0_i32_0 = arith.constant 0 : i32
    %c0_i32_1 = arith.constant 0 : i32
    return %arg1, %c0_i32, %c0_i32_0 : i32, i32, i32
  }
  func.func @transform_7(%arg0: i32, %arg1: i32) -> (i32, i32, i32) {
    %c0_i32 = arith.constant 0 : i32
    %c0_i32_0 = arith.constant 0 : i32
    %c0_i32_1 = arith.constant 0 : i32
    return %arg1, %c0_i32, %c0_i32_0 : i32, i32, i32
  }
  func.func @transform_8(%arg0: i32, %arg1: i32) -> (i32, i32, i32) {
    %c0_i32 = arith.constant 0 : i32
    %c0_i32_0 = arith.constant 0 : i32
    %c0_i32_1 = arith.constant 0 : i32
    return %arg1, %c0_i32, %c0_i32_0 : i32, i32, i32
  }
  func.func @transform_9(%arg0: i32, %arg1: i32) -> (i32, i32, i32) {
    %c0_i32 = arith.constant 0 : i32
    %c0_i32_0 = arith.constant 0 : i32
    %c0_i32_1 = arith.constant 0 : i32
    return %arg1, %c0_i32, %c0_i32_0 : i32, i32, i32
  }
  func.func @transform_10(%arg0: i32, %arg1: i32) -> (i32, i32, i32) {
    %c0_i32 = arith.constant 0 : i32
    %c0_i32_0 = arith.constant 0 : i32
    %c0_i32_1 = arith.constant 0 : i32
    return %arg0, %c0_i32, %c0_i32_0 : i32, i32, i32
  }
  func.func @transform_11(%arg0: i32, %arg1: i32) -> (i32, i32, i32) {
    %c0_i32 = arith.constant 0 : i32
    %c0_i32_0 = arith.constant 0 : i32
    %c0_i32_1 = arith.constant 0 : i32
    return %arg0, %c0_i32, %c0_i32_0 : i32, i32, i32
  }
}

</mosaic_0001>

<bundles_post_ra>
// kernel: fwd.1
= control target key start
LH: loop header
LB: loop body
LE: loop exit
PB: predicated region body
PF: predicated region fallthrough
CT: control target
= control target key end

     0   :  { %s7707_s17 = smov 0   ;;  %s7709_s18 = smov 0   ;;  %s11236_s0 = inlined_call_operand.vmem [shape: f32[2,8,100], index: 0, kind: input, shape index: {}]   ;;  %s11237_s1 = inlined_call_operand.vmem [shape: f32[2,16,1024], index: 1, kind: input, shape index: {}]   ;;  %s11238_s2 = inlined_call_operand.vmem [shape: f32[1,1024], index: 2, kind: input, shape index: {}]   ;;  %s11239_s3 = inlined_call_operand.vmem [shape: f32[2,8,8], index: 3, kind: input, shape index: {}]   ;;  %s11240_s4 = inlined_call_operand.vmem [shape: f32[2,8,8], index: 4, kind: input, shape index: {}]   ;;  %s11241_s5 = inlined_call_operand.vmem [shape: f32[2,8,8], index: 5, kind: input, shape index: {}]   ;;  %s11242_s6 = inlined_call_operand.vmem [shape: f32[2,8,72], index: 6, kind: input, shape index: {}]   ;;  %s11243_s7 = inlined_call_operand.vmem [shape: f32[2,72,8], index: 7, kind: input, shape index: {}]   ;;  %s11244_s8 = inlined_call_operand.vmem [shape: bf16[2,32,144], index: 8, kind: input, shape index: {}]   ;;  %s11245_s9 = inlined_call_operand.vmem [shape: bf16[2,16,432], index: 9, kind: input, shape index: {}]   ;;  %s11246_s10 = inlined_call_operand.vmem [shape: f32[2,8,100], index: 10, kind: output, shape index: {0}]   ;;  %s11247_s11 = inlined_call_operand.vmem [shape: f32[2,16,1024], index: 11, kind: output, shape index: {1}]  }
   0x1   :  { %11568 = sst [smem:[#allocation114_spill]] %s11236_s0  ;;  %s7711_s19 = smov 0  }
   0x2   :  { %11569 = sst [smem:[#allocation115_spill]] %s11237_s1  ;;  %s7713_s20 = smov 0  }
   0x3   :  { %11570 = sst [smem:[#allocation116_spill]] %s11238_s2  ;;  %s7715_s21 = smov 0  }
   0x4 LB: > { %11571 = sst [smem:[#allocation7_spill]] %s7602_s17  ;;  %s31_s22 = sadd.s32 1, %s7610_s19  ;;  %s7618_s21 = sphi %s7715_s21, %s22_s21   ;;  %s7614_s20 = sphi %s7713_s20, %s12315_s20   ;;  %s7610_s19 = sphi %s7711_s19, %s12314_s19   ;;  %s7606_s18 = sphi %s7709_s18, %s12313_s18   ;;  %s7602_s17 = sphi %s7707_s17, %s12312_s17  }
   0x5   : > { %11572 = sst [smem:[#allocation8_spill]] %s7610_s19  ;;  %s34_s23 = sadd.s32 1, %s7614_s20 }
   0x6   : > { %11573 = sst [smem:[#allocation9_spill]] %s7614_s20  ;;  %p32_p0 = scmp.ge.s32.totalorder %s31_s22, 2 }
   0x7   : > { %11574 = sst [smem:[#allocation10_spill]] %s7618_s21  ;;  %p6897_p1 = scmp.ge.s32.totalorder %s7618_s21, 1 }
   0x8   : > { %p427_p2 = scmp.lt.s32.totalorder %s7618_s21, 5  ;;  %s12317_s22 = smov (%p32_p0, %s31_s22), 0 }
   0x9   : > { %11575 = sst [smem:[#allocation11_spill]] %s12317_s22  ;;  %s12319_s23 = smov (!%p32_p0, %s34_s23), %s7614_s20 }
   0xa   : > { %p428_p3 = pnand %p6897_p1, %p427_p2  ;;  %p36_p4 = scmp.ge.s32.totalorder %s12319_s23, 2 }
   0xc   : > { %s12321_s23 = smov (%p36_p4, %s12319_s23), 0  ;;  %431 = sbr.rel (%p428_p3) target bundleno = 1442 (0x5a2), region = 60 }
   0xd   : > { %11576 = sst [smem:[#allocation12_spill]] %s12321_s23 }
  0x11   : > { %p506_p5 = scmp.lt.s32.totalorder %s7606_s18, 1  ;;  %p515_p6 = scmp.lt.s32.totalorder %s7602_s17, 1 }
  0x12   : > { %s11577_s0 = sld [smem:[#allocation114_spill]] }
  0x13   : > { %s12323_s18 = smov (!%p506_p5, %s7606_s18), 1  ;;  %s11578_s1 = sld [smem:[#allocation115_spill]] }
  0x14   : > { %s516_s24 = scalar_select %p515_p6, %s7602_s17, 1 }
  0x15   : > { %s6898_s25 = sshll.u32 %s12323_s18, 3  ;;  %s7269_s26 = sshll.u32 %s12323_s18, 7 }
  0x16   : > { %s7749_s14 = sshll.u32 %s516_s24, 3  ;;  %s7396_s15 = smul.u32 72, %s516_s24 }
  0x17   : > { %s526_s30 = scalar_lea.vmem %s11241_s5, %s7749_s14  ;;  %s530_s19 = scalar_lea.vmem %s11242_s6, %s7749_s14 }
  0x18   : > { %s509_s29 = scalar_lea.vmem %s11577_s0, %s6898_s25  ;;  %s7270_s17 = sshll.u32 %s516_s24, 5 }
  0x19   : > { %s7747_s13 = scalar_lea.vmem %s11578_s1, %s7269_s26  ;;  %s7775_s18 = scalar_lea.vmem %s11244_s8, %s7270_s17 }
  0x1a   : > { %11579 = sst [smem:[#allocation13_spill]] %s7747_s13  ;;  %s7770_s13 = scalar_lea.vmem %s11243_s7, %s7396_s15 }
  0x1b   : > { %s7780_s0 = scalar_lea.vmem %s11245_s9, %s7270_s17  ;;  %s7785_s1 = scalar_lea.vmem %s11246_s10, %s6898_s25 }
  0x1c   : > { %s7790_s21 = scalar_lea.vmem %s11247_s11, %s7269_s26  ;;  %s11580_s24 = sld [smem:[#allocation7_spill]] }
  0x22   : > { %p6913_p7 = scmp.ne.s32.totalorder %s11580_s24, 0 }
  0x23   : > { %s11581_s15 = sld [smem:[#allocation13_spill]] (!%p6913_p7) }
  0x24   : > { %559 = sbr.rel (%p6913_p7) target bundleno = 71 (0x47), region = 64 }
  0x29   : > { %v560_v0 = vld [vmem:[%s509_s29] sm:$0xff]  ;;  %vm561_vm0 = vcmask 818176   ;;  %v564_v2 = vld [vmem:[%s11581_s15 + $0x8] sm:$0xff]  ;;  %v565_v3 = vld [vmem:[%s11581_s15 + $0x10] sm:$0xff]  ;;  %v7620_v6 = vmov 0  }
  0x2a   : > { %v563_v1 = vld [vmem:[%s11581_s15] sm:$0xff]  ;;  %562 = vst.msk [vmem:[%s7785_s1] sm:$0xff] %vm561_vm0, %v560_v0  ;;  %580 = vst [vmem:[%s7790_s21 + $0x8] sm:$0xff] %v564_v2  ;;  %v566_v4 = vld [vmem:[%s11581_s15 + $0x18] sm:$0xff] }
  0x2b   : > { %579 = vst [vmem:[%s7790_s21] sm:$0xff] %v563_v1  ;;  %v567_v5 = vld [vmem:[%s11581_s15 + $0x20] sm:$0xff]  ;;  %595 = vst [vmem:[#allocation2] sm:$0xff] %v7620_v6  ;;  %v568_v7 = vld [vmem:[%s11581_s15 + $0x28] sm:$0xff] }
  0x2c   : > { %596 = vst [vmem:[#allocation2 + $0x8] sm:$0xff] %v7620_v6  ;;  %597 = vst [vmem:[#allocation2 + $0x10] sm:$0xff] %v7620_v6  ;;  %v569_v8 = vld [vmem:[%s11581_s15 + $0x30] sm:$0xff]  ;;  %v570_v9 = vld [vmem:[%s11581_s15 + $0x38] sm:$0xff] }
  0x2d   : > { %598 = vst [vmem:[#allocation2 + $0x18] sm:$0xff] %v7620_v6  ;;  %599 = vst [vmem:[#allocation2 + $0x20] sm:$0xff] %v7620_v6  ;;  %v571_v10 = vld [vmem:[%s11581_s15 + $0x40] sm:$0xff]  ;;  %v572_v11 = vld [vmem:[%s11581_s15 + $0x48] sm:$0xff] }
  0x2e   : > { %600 = vst [vmem:[#allocation2 + $0x28] sm:$0xff] %v7620_v6  ;;  %601 = vst [vmem:[#allocation2 + $0x30] sm:$0xff] %v7620_v6  ;;  %v573_v12 = vld [vmem:[%s11581_s15 + $0x50] sm:$0xff]  ;;  %v574_v13 = vld [vmem:[%s11581_s15 + $0x58] sm:$0xff] }
  0x2f   : > { %602 = vst [vmem:[#allocation2 + $0x38] sm:$0xff] %v7620_v6  ;;  %603 = vst [vmem:[#allocation2 + $0x40] sm:$0xff] %v7620_v6  ;;  %v575_v14 = vld [vmem:[%s11581_s15 + $0x60] sm:$0xff]  ;;  %v576_v15 = vld [vmem:[%s11581_s15 + $0x68] sm:$0xff] }
  0x30   : > { %604 = vst [vmem:[#allocation2 + $0x48] sm:$0xff] %v7620_v6  ;;  %605 = vst [vmem:[#allocation3] sm:$0xff] %v7620_v6  ;;  %v577_v16 = vld [vmem:[%s11581_s15 + $0x70] sm:$0xff]  ;;  %v578_v17 = vld [vmem:[%s11581_s15 + $0x78] sm:$0xff] }
  0x31   : > { %606 = vst [vmem:[#allocation3 + $0x8] sm:$0xff] %v7620_v6  ;;  %607 = vst [vmem:[#allocation3 + $0x10] sm:$0xff] %v7620_v6 }
  0x32   : > { %608 = vst [vmem:[#allocation3 + $0x18] sm:$0xff] %v7620_v6  ;;  %609 = vst [vmem:[#allocation3 + $0x20] sm:$0xff] %v7620_v6 }
  0x33   : > { %610 = vst [vmem:[#allocation3 + $0x28] sm:$0xff] %v7620_v6  ;;  %611 = vst [vmem:[#allocation3 + $0x30] sm:$0xff] %v7620_v6 }
  0x34   : > { %612 = vst [vmem:[#allocation3 + $0x38] sm:$0xff] %v7620_v6  ;;  %613 = vst [vmem:[#allocation3 + $0x40] sm:$0xff] %v7620_v6 }
  0x35   : > { %614 = vst [vmem:[#allocation3 + $0x48] sm:$0xff] %v7620_v6  ;;  %615 = vst [vmem:[#allocation3 + $0x50] sm:$0xff] %v7620_v6 }
  0x36   : > { %616 = vst [vmem:[#allocation3 + $0x58] sm:$0xff] %v7620_v6  ;;  %617 = vst [vmem:[#allocation3 + $0x60] sm:$0xff] %v7620_v6 }
  0x37   : > { %618 = vst [vmem:[#allocation3 + $0x68] sm:$0xff] %v7620_v6  ;;  %619 = vst [vmem:[#allocation3 + $0x70] sm:$0xff] %v7620_v6 }
  0x38   : > { %620 = vst [vmem:[#allocation3 + $0x78] sm:$0xff] %v7620_v6  ;;  %621 = vst [vmem:[#allocation3 + $0x80] sm:$0xff] %v7620_v6 }
  0x39   : > { %622 = vst [vmem:[#allocation3 + $0x88] sm:$0xff] %v7620_v6  ;;  %623 = vst [vmem:[#allocation3 + $0x90] sm:$0xff] %v7620_v6 }
  0x3a   : > { %624 = vst [vmem:[#allocation3 + $0x98] sm:$0xff] %v7620_v6  ;;  %625 = vst [vmem:[#allocation3 + $0xa0] sm:$0xff] %v7620_v6 }
  0x3b   : > { %626 = vst [vmem:[#allocation3 + $0xa8] sm:$0xff] %v7620_v6  ;;  %627 = vst [vmem:[#allocation3 + $0xb0] sm:$0xff] %v7620_v6 }
  0x3c   : > { %628 = vst [vmem:[#allocation3 + $0xb8] sm:$0xff] %v7620_v6  ;;  %629 = vst [vmem:[#allocation3 + $0xc0] sm:$0xff] %v7620_v6 }
  0x3d   : > { %630 = vst [vmem:[#allocation3 + $0xc8] sm:$0xff] %v7620_v6  ;;  %631 = vst [vmem:[#allocation3 + $0xd0] sm:$0xff] %v7620_v6 }
  0x3e   : > { %632 = vst [vmem:[#allocation3 + $0xd8] sm:$0xff] %v7620_v6  ;;  %633 = vst [vmem:[#allocation3 + $0xe0] sm:$0xff] %v7620_v6 }
  0x3f   : > { %634 = vst [vmem:[#allocation3 + $0xe8] sm:$0xff] %v7620_v6  ;;  %581 = vst [vmem:[%s7790_s21 + $0x10] sm:$0xff] %v565_v3 }
  0x40   : > { %582 = vst [vmem:[%s7790_s21 + $0x18] sm:$0xff] %v566_v4  ;;  %583 = vst [vmem:[%s7790_s21 + $0x20] sm:$0xff] %v567_v5 }
  0x41   : > { %584 = vst [vmem:[%s7790_s21 + $0x28] sm:$0xff] %v568_v7  ;;  %585 = vst [vmem:[%s7790_s21 + $0x30] sm:$0xff] %v569_v8 }
  0x42   : > { %586 = vst [vmem:[%s7790_s21 + $0x38] sm:$0xff] %v570_v9  ;;  %587 = vst [vmem:[%s7790_s21 + $0x40] sm:$0xff] %v571_v10 }
  0x43   : > { %588 = vst [vmem:[%s7790_s21 + $0x48] sm:$0xff] %v572_v11  ;;  %589 = vst [vmem:[%s7790_s21 + $0x50] sm:$0xff] %v573_v12 }
  0x44   : > { %590 = vst [vmem:[%s7790_s21 + $0x58] sm:$0xff] %v574_v13  ;;  %591 = vst [vmem:[%s7790_s21 + $0x60] sm:$0xff] %v575_v14 }
  0x45   : > { %592 = vst [vmem:[%s7790_s21 + $0x68] sm:$0xff] %v576_v15  ;;  %593 = vst [vmem:[%s7790_s21 + $0x70] sm:$0xff] %v577_v16 }
  0x46   : > { %594 = vst [vmem:[%s7790_s21 + $0x78] sm:$0xff] %v578_v17 }
  0x47 PF: > { %v654_v18 = vlaneseq  ;;  %s11582_s26 = sld [smem:[#allocation116_spill]]  ;;  %v640_v23 = vld [vmem:[%s7790_s21 + $0x20] sm:$0xff]  ;;  %v638_v29 = vld [vmem:[%s7790_s21 + $0x10] sm:$0xff]  ;;  %v639_v30 = vld [vmem:[%s7790_s21 + $0x18] sm:$0xff]  ;;  %s7621_s29 = smov 96   ;;  %v11261_v15 = vmov 0.0  }
  0x48   : > { %v642_v20 = vld [vmem:[%s7790_s21 + $0x30] sm:$0xff]  ;;  %v641_v24 = vld [vmem:[%s7790_s21 + $0x28] sm:$0xff]  ;;  %v636_v31 = vld [vmem:[%s7790_s21] sm:$0xff]  ;;  %s7622_s27 = smov 40   ;;  %7336 = vmatprep.subr.mxu1 %v11261_v15  ;;  %7331 = vmatprep.subr.mxu0 %v11261_v15  ;;  %s7624_s23 = smov 68   ;;  %vm843_vm1 = vcmask 818176  }
  0x49   : > { %v655_v19 = vshrl.u32 %v654_v18, 7  ;;  %v643_v21 = vld [vmem:[%s7790_s21 + $0x38] sm:$0xff]  ;;  %v637_v32 = vld [vmem:[%s7790_s21 + $0x8] sm:$0xff]  ;;  %v644_v37 = vld [vmem:[%s7790_s21 + $0x40] sm:$0xff]  ;;  %s7625_s16 = smov 12   ;;  %s7626_s20 = smov 112  }
  0x4a   : > { %v645_v38 = vld [vmem:[%s7790_s21 + $0x48] sm:$0xff]  ;;  %v646_v43 = vld [vmem:[%s7790_s21 + $0x50] sm:$0xff]  ;;  %s7627_s22 = smov 84   ;;  %s7628_s28 = smov 56   ;;  %vm7631_vm2 = vmmov 0   ;;  %vm767_vm3 = vcmask 64512  }
  0x4b   : > { %v680_v25 = vsub.s32 6, %v655_v19  ;;  %v684_v26 = vsub.s32 7, %v655_v19  ;;  %v672_v27 = vsub.s32 4, %v655_v19  ;;  %v676_v28 = vsub.s32 5, %v655_v19  ;;  %v647_v44 = vld [vmem:[%s7790_s21 + $0x58] sm:$0xff]  ;;  %v648_v1 = vld [vmem:[%s7790_s21 + $0x60] sm:$0xff]  ;;  %7354 = vmatprep.mubr.msk.f32.mxu1 %vm7631_vm2, %v11261_v15  ;;  %7333 = vmatprep.mubr.msk.f32.mxu0 %vm7631_vm2, %v11261_v15  ;;  %s11591_s17 = scalar_lea.vmem %s11239_s3, %s7749_s14  ;;  %s11617_s15 = scalar_lea.vmem %s11240_s4, %s7749_s14 }
  0x4c   : > { %v664_v33 = vsub.s32 2, %v655_v19  ;;  %v668_v34 = vsub.s32 3, %v655_v19  ;;  %v656_v35 = vsub.s32 0, %v655_v19  ;;  %v660_v36 = vsub.s32 1, %v655_v19  ;;  %v649_v2 = vld [vmem:[%s7790_s21 + $0x68] sm:$0xff]  ;;  %v650_v3 = vld [vmem:[%s7790_s21 + $0x70] sm:$0xff] }
  0x4d   : > { %v652_v22 = vld [vmem:[%s11582_s26] sm:$0xff]  ;;  %v651_v4 = vld [vmem:[%s7790_s21 + $0x78] sm:$0xff]  ;;  %s7629_s12 = smov 28   ;;  %s7630_s2 = smov 118   ;;  %vm939_vm4 = vcmask 785408   ;;  %vm913_vm5 = vcmask 326656  }
  0x4e   : > { %v7839_v39 = vrot.slane %v652_v22, %v680_v25  ;;  %v7841_v40 = vrot.slane %v652_v22, %v684_v26  ;;  %v7843_v41 = vrot.slane %v652_v22, %v672_v27  ;;  %v7845_v42 = vrot.slane %v652_v22, %v676_v28  ;;  %s7632_s25 = smov 119   ;;  %s7633_s26 = smov 127  }
  0x4f   : > { %v7849_v45 = vrot.slane %v652_v22, %v664_v33  ;;  %v7851_v46 = vrot.slane %v652_v22, %v668_v34  ;;  %v7853_v47 = vrot.slane %v652_v22, %v656_v35  ;;  %v7855_v48 = vrot.slane %v652_v22, %v660_v36  ;;  %v635_v34 = vld [vmem:[%s7785_s1] sm:$0xff]  ;;  %s7640_s14 = smov 72  }
  0x50   : > { %11583 = vst [vmem:[#allocation14_spill] sm:$0xff] %v7839_v39  ;;  %11584 = vst [vmem:[#allocation15_spill] sm:$0xff] %v7841_v40  ;;  %v700_v49 = vmul.f32 %v7839_v39, %v642_v20  ;;  %v701_v50 = vmul.f32 %v7841_v40, %v643_v21  ;;  %v698_v51 = vmul.f32 %v7843_v41, %v640_v23  ;;  %v766_v35 = vld [vmem:[%s11591_s17] sm:$0xff]  ;;  %7332 = vmatpush3.msra.mxu0 %v635_v34  ;;  %vm926_vm6 = vcmask 556032   ;;  %s7643_s17 = smov 116  }
  0x51   : > { %11585 = vst [vmem:[#allocation16_spill] sm:$0xff] %v7843_v41  ;;  %11586 = vst [vmem:[#allocation17_spill] sm:$0xff] %v7845_v42  ;;  %v699_v52 = vmul.f32 %v7845_v42, %v641_v24  ;;  %v7862_v53 = vmul.f32 %v7849_v45, %v638_v29  ;;  %v7865_v54 = vmul.f32 %v7851_v46, %v639_v30  ;;  %7334 = vmatmul.mubr.msk.f32.vlgmr.msra.gmra.mxu0 %vm767_vm3, %v766_v35  ;;  %vm900_vm7 = vcmask 97280  }
  0x52   : > { %11587 = vst [vmem:[#allocation18_spill] sm:$0xff] %v7849_v45  ;;  %11588 = vst [vmem:[#allocation19_spill] sm:$0xff] %v7851_v46  ;;  %v7868_v55 = vmul.f32 %v7853_v47, %v636_v31  ;;  %v7871_v56 = vmul.f32 %v7855_v48, %v637_v32  ;;  %v7873_v57 = vpack.c.bf16 %v701_v50, %v700_v49  ;;  %7357 = vmatprep.subr.mxu0 %v11261_v15  ;;  %vm880_vm8 = vcmask 687104  }
  0x53   : > { %11589 = vst [vmem:[#allocation20_spill] sm:$0xff] %v7853_v47  ;;  %11590 = vst [vmem:[#allocation21_spill] sm:$0xff] %v7855_v48  ;;  %v7875_v58 = vpack.c.bf16 %v699_v52, %v698_v51  ;;  %v702_v59 = vmul.f32 %v7853_v47, %v644_v37  ;;  %v703_v60 = vmul.f32 %v7855_v48, %v645_v38  ;;  %7359 = vmatprep.mubr.msk.f32.mxu0 %vm7631_vm2, %v11261_v15  ;;  %vm867_vm9 = vcmask 457728  }
  0x54   : > { %v7881_v61 = vpack.c.bf16 %v7865_v54, %v7862_v53  ;;  %v7885_v62 = vpack.c.bf16 %v7871_v56, %v7868_v55  ;;  %v7888_v63 = vmul.f32 %v7849_v45, %v646_v43  ;;  %v7891_v0 = vmul.f32 %v7851_v46, %v647_v44  ;;  %761 = vst [vmem:[#allocation2 + $0x1c] sm:$0xff] %v7873_v57 }
  0x55   : > { %760 = vst [vmem:[#allocation2 + $0x14] sm:$0xff] %v7875_v58  ;;  %v7464_v5 = vpack.i.bf16 %v701_v50, %v700_v49  ;;  %v7474_v6 = vpack.i.bf16 %v699_v52, %v698_v51  ;;  %v7901_v7 = vpack.c.bf16 %v703_v60, %v702_v59  ;;  %v706_v9 = vmul.f32 %v7843_v41, %v648_v1 }
  0x56   : > { %759 = vst [vmem:[#allocation2 + $0xc] sm:$0xff] %v7881_v61  ;;  %758 = vst [vmem:[#allocation2 + $0x4] sm:$0xff] %v7885_v62  ;;  %v7905_v8 = vpack.c.bf16 %v7891_v0, %v7888_v63  ;;  %v707_v10 = vmul.f32 %v7845_v42, %v649_v2  ;;  %v708_v11 = vmul.f32 %v7839_v39, %v650_v3  ;;  %vm854_vm10 = vcmask 228352  }
  0x57   : > { %7465 = vrot.lane.b32.xlu0 %v7464_v5, %s7621_s29  ;;  %7475 = vrot.lane.b32.xlu1 %v7474_v6, %s7622_s27  ;;  %762 = vst [vmem:[#allocation2 + $0x2c] sm:$0xff] %v7901_v7  ;;  %v709_v12 = vmul.f32 %v7841_v40, %v651_v4  ;;  %v7484_v29 = vpack.i.bf16 %v7865_v54, %v7862_v53  ;;  %s7634_s29 = smov 1   ;;  %s7635_s27 = smov 9   ;;  %vm1489_vm11 = vcmask 1043456   ;;  %vm2005_vm12 = vcmask 965632  }
  0x58   : > { %763 = vst [vmem:[#allocation2 + $0x34] sm:$0xff] %v7905_v8  ;;  %v7913_v13 = vpack.c.bf16 %v707_v10, %v706_v9  ;;  %v7494_v33 = vpack.i.bf16 %v7871_v56, %v7868_v55  ;;  %vm953_vm13 = vcmask 588800   ;;  %vm2574_vm14 = vcmask 130048  }
  0x59   : > { %v7915_v14 = vpack.c.bf16 %v709_v12, %v708_v11  ;;  %vm1922_vm15 = vcmask 973824   ;;  %vm1839_vm0 = vcmask 1039360  }
  0x5a   : > { %764 = vst [vmem:[#allocation2 + $0x3c] sm:$0xff] %v7913_v13 }
  0x5b   : > { %765 = vst [vmem:[#allocation2 + $0x44] sm:$0xff] %v7915_v14 }
  0x5c   : > { %v7919_v16 = vld [vmem:[#allocation2 + $0x18] sm:$0xff] }
  0x5d   : > { %v918_v17 = vunpack.c.l.bf16 %v7919_v16  ;;  %v919_v18 = vunpack.c.h.bf16 %v7919_v16  ;;  %v7924_v19 = vld [vmem:[#allocation2 + $0x10] sm:$0xff]  ;;  %v7929_v23 = vld [vmem:[#allocation2 + $0x8] sm:$0xff]  ;;  %v841_v30 = vld [vmem:[#allocation2 + $0x4] sm:$0xf] }
  0x5e   : > { %v892_v20 = vunpack.c.l.bf16 %v7924_v19  ;;  %v893_v21 = vunpack.c.h.bf16 %v7924_v19  ;;  %v884_v22 = vld [vmem:[#allocation2 + $0x10] sm:$0xf]  ;;  %v859_v27 = vunpack.c.l.bf16 %v7929_v23  ;;  %v860_v28 = vunpack.c.h.bf16 %v7929_v23  ;;  %v1689_v36 = vld [vmem:[#allocation2] sm:$0xff]  ;;  %v1694_v37 = vld [vmem:[#allocation2 + $0x28] sm:$0xff] }
  0x5f   : > { %v7469_v24 = vpack.i.bf16 %v919_v18, %v918_v17  ;;  %v885_v26 = vunpack.c.l.bf16 %v884_v22  ;;  %v842_v31 = vunpack.c.l.bf16 %v841_v30  ;;  %v1695_v38 = vld [vmem:[#allocation2 + $0x30] sm:$0xff] }
  0x60   : > { %v7479_v25 = vpack.i.bf16 %v893_v21, %v892_v20  ;;  %v7489_v32 = vpack.i.bf16 %v860_v28, %v859_v27 }
  0x61   : > { %7470 = vrot.lane.b32.xlu0 %v7469_v24, %s7624_s23  ;;  %844 = vst.msk [vmem:[#allocation6] sm:$0xff] %vm843_vm1, %v842_v31  ;;  %v1696_v43 = vld [vmem:[#allocation2 + $0x38] sm:$0xff]  ;;  %s7636_s23 = smov 10  }
  0x62   : > { %7480 = vrot.lane.b32.xlu1 %v7479_v25, %s7625_s16  ;;  %s7637_s16 = smov 11  }
  0x65   : > { %887 = vrot.lane.b32.xlu0 %v885_v26, %s7626_s20  ;;  %s7638_s20 = smov 117  }
  0x66   : > { %7485 = vrot.lane.b32.xlu1 %v7484_v29, %s7627_s22  ;;  %s7644_s22 = smov 88  }
  0x69   : > { %7490 = vrot.lane.b32.xlu0 %v7489_v32, %s7628_s28  ;;  %s7645_s28 = smov 60  }
  0x6a   : > { %7495 = vrot.lane.b32.xlu1 %v7494_v33, %s7629_s12 }
  0x6d   : > { %1974 = vrot.lane.b32.xlu0 %v7885_v62, %s7630_s2 }
  0x6e   : > { %1976 = vrot.lane.b32.xlu1 %v7881_v61, %s7630_s2 }
  0x71   : > { %1978 = vrot.lane.b32.xlu0 %v7875_v58, %s7630_s2 }
  0x72   : > { %1984 = vrot.lane.b32.xlu1 %v7901_v7, %s7630_s2 }
  0x75   : > { %1986 = vrot.lane.b32.xlu0 %v7905_v8, %s7630_s2 }
  0x76   : > { %1988 = vrot.lane.b32.xlu1 %v7913_v13, %s7630_s2 }
  0x79   : > { %1891 = vrot.lane.b32.xlu0 %v7885_v62, %s7632_s25 }
  0x7a   : > { %1893 = vrot.lane.b32.xlu1 %v7881_v61, %s7632_s25 }
  0x7d   : > { %1895 = vrot.lane.b32.xlu0 %v7875_v58, %s7632_s25 }
  0x7e   : > { %1901 = vrot.lane.b32.xlu1 %v7901_v7, %s7632_s25 }
  0x81   : > { %1903 = vrot.lane.b32.xlu0 %v7905_v8, %s7632_s25 }
  0x82   : > { %1905 = vrot.lane.b32.xlu1 %v7913_v13, %s7632_s25 }
  0x85   : > { %1808 = vrot.lane.b32.xlu0 %v7885_v62, %s7633_s26 }
  0x86   : > { %1810 = vrot.lane.b32.xlu1 %v7881_v61, %s7633_s26 }
  0x89   : > { %1812 = vrot.lane.b32.xlu0 %v7875_v58, %s7633_s26 }
  0x8a   : > { %1818 = vrot.lane.b32.xlu1 %v7901_v7, %s7633_s26 }
  0x8d   : > { %1820 = vrot.lane.b32.xlu0 %v7905_v8, %s7633_s26 }
  0x8e   : > { %1822 = vrot.lane.b32.xlu1 %v7913_v13, %s7633_s26 }
  0x91   : > { %1709 = vrot.lane.b32.xlu0 %v1689_v36, %s7634_s29 }
  0x92   : > { %1711 = vrot.lane.b32.xlu1 %v7929_v23, %s7634_s29 }
  0x95   : > { %1713 = vrot.lane.b32.xlu0 %v7924_v19, %s7634_s29 }
  0x96   : > { %1719 = vrot.lane.b32.xlu1 %v1694_v37, %s7634_s29 }
  0x99   : > { %1721 = vrot.lane.b32.xlu0 %v1695_v38, %s7634_s29 }
  0x9a   : > { %1723 = vrot.lane.b32.xlu1 %v1696_v43, %s7634_s29 }
  0x9d   : > { %1626 = vrot.lane.b32.xlu0 %v1689_v36, %s7635_s27 }
  0x9e   : > { %1628 = vrot.lane.b32.xlu1 %v7929_v23, %s7635_s27 }
  0xa1   : > { %1630 = vrot.lane.b32.xlu0 %v7924_v19, %s7635_s27 }
  0xa2   : > { %1636 = vrot.lane.b32.xlu1 %v1694_v37, %s7635_s27 }
  0xa5   : > { %1638 = vrot.lane.b32.xlu0 %v1695_v38, %s7635_s27 }
  0xa6   : > { %1640 = vrot.lane.b32.xlu1 %v1696_v43, %s7635_s27 }
  0xa9   : > { %1543 = vrot.lane.b32.xlu0 %v1689_v36, %s7636_s23 }
  0xaa   : > { %1545 = vrot.lane.b32.xlu1 %v7929_v23, %s7636_s23 }
  0xad   : > { %1547 = vrot.lane.b32.xlu0 %v7924_v19, %s7636_s23 }
  0xae   : > { %1553 = vrot.lane.b32.xlu1 %v1694_v37, %s7636_s23 }
  0xb1   : > { %1555 = vrot.lane.b32.xlu0 %v1695_v38, %s7636_s23 }
  0xb2   : > { %1557 = vrot.lane.b32.xlu1 %v1696_v43, %s7636_s23 }
  0xb5   : > { %1459 = vrot.lane.b32.xlu0 %v1689_v36, %s7637_s16 }
  0xb6   : > { %1461 = vrot.lane.b32.xlu1 %v7929_v23, %s7637_s16 }
  0xb9   : > { %1463 = vrot.lane.b32.xlu0 %v7924_v19, %s7637_s16 }
  0xba   : > { %1469 = vrot.lane.b32.xlu1 %v1694_v37, %s7637_s16 }
  0xbd   : > { %1471 = vrot.lane.b32.xlu0 %v1695_v38, %s7637_s16 }
  0xbe   : > { %1473 = vrot.lane.b32.xlu1 %v1696_v43, %s7637_s16 }
  0xc1   : > { %2057 = vrot.lane.b32.xlu0 %v7885_v62, %s7638_s20 }
  0xc2   : > { %2059 = vrot.lane.b32.xlu1 %v7881_v61, %s7638_s20 }
  0xc5   : > { %2061 = vrot.lane.b32.xlu0 %v7875_v58, %s7638_s20 }
  0xc6   : > { %2067 = vrot.lane.b32.xlu1 %v7901_v7, %s7638_s20  ;;  %v1697_v7 = vld [vmem:[#allocation2 + $0x40] sm:$0xff] }
  0xc9   : > { %2069 = vrot.lane.b32.xlu0 %v7905_v8, %s7638_s20  ;;  %v7466_v44 = vpop.permute.xlu0 %7465  ;;  %v7476_v49 = vpop.permute.xlu1 %7475 }
  0xca   : > { %2071 = vrot.lane.b32.xlu1 %v7913_v13, %s7638_s20  ;;  %v7468_v50 = vunpack.i.h.bf16 %v7466_v44  ;;  %v7467_v51 = vunpack.i.l.bf16 %v7466_v44  ;;  %v7478_v52 = vunpack.i.h.bf16 %v7476_v49  ;;  %v7477_v55 = vunpack.i.l.bf16 %v7476_v49 }
  0xcc   : > { %v940_v56 = vsel %vm939_vm4, %v7467_v51, %v7468_v50  ;;  %v914_v58 = vsel %vm913_vm5, %v7477_v55, %v7478_v52  ;;  %v944_v52 = vld [vmem:[#allocation6] sm:$0xff]  ;;  %vm11319_vm4 = vcmask 7168   ;;  %vm1657_vm5 = vcmask 72704  }
  0xcd   : > { %1980 = vrot.lane.b32.xlu0 %v7873_v57, %s7630_s2  ;;  %942 = vst.msk [vmem:[#allocation6 + $0x40] sm:$0xff] %vm843_vm1, %v940_v56  ;;  %916 = vst.msk [vmem:[#allocation6 + $0x30] sm:$0xff] %vm843_vm1, %v914_v58  ;;  %v1958_v56 = vld [vmem:[#allocation2 + $0x24] sm:$0xf] }
  0xce   : > { %1990 = vrot.lane.b32.xlu1 %v7915_v14, %s7630_s2 }
  0xd1   : > { %1897 = vrot.lane.b32.xlu0 %v7873_v57, %s7632_s25 }
  0xd2   : > { %1907 = vrot.lane.b32.xlu1 %v7915_v14, %s7632_s25 }
  0xd3   : > { %v7471_v59 = vpop.permute.xlu0 %7470 }
  0xd4   : > { %v7473_v60 = vunpack.i.h.bf16 %v7471_v59  ;;  %v7472_v61 = vunpack.i.l.bf16 %v7471_v59  ;;  %v7481_v62 = vpop.permute.xlu1 %7480  ;;  %v952_v4 = vld [vmem:[#allocation6 + $0x40] sm:$0xff]  ;;  %v950_v25 = vld [vmem:[#allocation6 + $0x30] sm:$0xff] }
  0xd5   : > { %v7483_v1 = vunpack.i.h.bf16 %v7481_v62  ;;  %v7482_v2 = vunpack.i.l.bf16 %v7481_v62  ;;  %1814 = vrot.lane.b32.xlu0 %v7873_v57, %s7633_s26  ;;  %7337 = vmatpush3.msra.mxu1 %v952_v4 }
  0xd6   : > { %v927_v3 = vsel %vm926_vm6, %v7472_v61, %v7473_v60  ;;  %1824 = vrot.lane.b32.xlu1 %v7915_v14, %s7633_s26  ;;  %7338 = vmatprep.subr.mxu1 %v11261_v15  ;;  %v8099_v61 = vld [vmem:[%s7775_s18 + $0x4] ss:$8 sps:$4 sm:$0xff]   ;;  %vm1574_vm6 = vcmask 80896  }
  0xd7   : > { %929 = vst.msk [vmem:[#allocation6 + $0x38] sm:$0xff] %vm843_vm1, %v927_v3  ;;  %v901_v5 = vsel %vm900_vm7, %v7482_v2, %v7483_v1  ;;  %v888_v6 = vpop.permute.xlu0 %887  ;;  %vm11321_vm7 = vcmask 89088  }
  0xd8   : > { %903 = vst.msk [vmem:[#allocation6 + $0x28] sm:$0xff] %vm843_vm1, %v901_v5  ;;  %890 = vst.msk [vmem:[#allocation6 + $0x20] sm:$0xff] %vm843_vm1, %v888_v6  ;;  %v7486_v8 = vpop.permute.xlu1 %7485 }
  0xd9   : > { %v7488_v9 = vunpack.i.h.bf16 %v7486_v8  ;;  %v7487_v10 = vunpack.i.l.bf16 %v7486_v8  ;;  %1715 = vrot.lane.b32.xlu0 %v7919_v16, %s7634_s29 }
  0xda   : > { %1725 = vrot.lane.b32.xlu1 %v1697_v7, %s7634_s29 }
  0xdb   : > { %v881_v11 = vsel %vm880_vm8, %v7487_v10, %v7488_v9  ;;  %v7491_v12 = vpop.permute.xlu0 %7490  ;;  %v1875_v9 = vld [vmem:[#allocation2 + $0x24] sm:$0xf]  ;;  %vm11320_vm8 = vcmask 957440  }
  0xdc   : > { %883 = vst.msk [vmem:[#allocation6 + $0x18] sm:$0xff] %vm843_vm1, %v881_v11  ;;  %v7493_v13 = vunpack.i.h.bf16 %v7491_v12  ;;  %v7492_v17 = vunpack.i.l.bf16 %v7491_v12  ;;  %v7496_v18 = vpop.permute.xlu1 %7495  ;;  %v1880_v11 = vld [vmem:[#allocation2 + $0x4c] sm:$0xf] }
  0xdd   : > { %v7498_v19 = vunpack.i.h.bf16 %v7496_v18  ;;  %v7497_v20 = vunpack.i.l.bf16 %v7496_v18  ;;  %1632 = vrot.lane.b32.xlu0 %v7919_v16, %s7635_s27  ;;  %v1792_v18 = vld [vmem:[#allocation2 + $0x24] sm:$0xf] }
  0xde   : > { %v868_v21 = vsel %vm867_vm9, %v7492_v17, %v7493_v13  ;;  %v951_v22 = vld [vmem:[#allocation6 + $0x38] sm:$0xff]  ;;  %1642 = vrot.lane.b32.xlu1 %v1697_v7, %s7635_s27 }
  0xdf   : > { %870 = vst.msk [vmem:[#allocation6 + $0x10] sm:$0xff] %vm843_vm1, %v868_v21  ;;  %7339 = vmatpush3.msra.mxu1 %v951_v22  ;;  %v855_v23 = vsel %vm854_vm10, %v7497_v20, %v7498_v19  ;;  %v1975_v24 = vpop.permute.xlu0 %1974  ;;  %v949_v26 = vld [vmem:[#allocation6 + $0x28] sm:$0xff]  ;;  %v948_v31 = vld [vmem:[#allocation6 + $0x20] sm:$0xff]  ;;  %vm1342_vm10 = vcmask 1044256  }
  0xe0   : > { %857 = vst.msk [vmem:[#allocation6 + $0x8] sm:$0xff] %vm843_vm1, %v855_v23  ;;  %7340 = vmatprep.subr.mxu1 %v11261_v15  ;;  %v1977_v27 = vpop.permute.xlu1 %1976  ;;  %v1994_v28 = vrot.slane %v1975_v24, 4  ;;  %v1797_v22 = vld [vmem:[#allocation2 + $0x4c] sm:$0xf] }
  0xe1   : > { %7341 = vmatpush3.msra.mxu1 %v950_v25  ;;  %1549 = vrot.lane.b32.xlu0 %v7919_v16, %s7636_s23  ;;  %v1995_v29 = vrot.slane %v1977_v27, 4 }
  0xe2   : > { %7342 = vmatprep.subr.mxu1 %v11261_v15  ;;  %1559 = vrot.lane.b32.xlu1 %v1697_v7, %s7636_s23 }
  0xe3   : > { %7343 = vmatpush3.msra.mxu1 %v949_v26  ;;  %v8064_v30 = vpop.permute.xlu0 %1978  ;;  %v947_v32 = vld [vmem:[#allocation6 + $0x18] sm:$0xff]  ;;  %v2004_v37 = vsel %vm1489_vm11, %v1994_v28, %v1995_v29  ;;  %v1693_v28 = vld [vmem:[#allocation2 + $0x20] sm:$0xf] }
  0xe4   : > { %7344 = vmatprep.subr.mxu1 %v11261_v15  ;;  %v11260_v33 = vrot.slane %v8064_v30, 4  ;;  %v1985_v34 = vpop.permute.xlu1 %1984  ;;  %v8083_v51 = vsel %vm2005_vm12, %v1975_v24, %v2004_v37 }
  0xe5   : > { %7345 = vmatpush3.msra.mxu1 %v948_v31  ;;  %1465 = vrot.lane.b32.xlu0 %v7919_v16, %s7637_s16  ;;  %v1999_v35 = vrot.slane %v1985_v34, 4 }
  0xe6   : > { %7346 = vmatprep.subr.mxu1 %v11261_v15  ;;  %v946_v36 = vld [vmem:[#allocation6 + $0x10] sm:$0xff]  ;;  %1475 = vrot.lane.b32.xlu1 %v1697_v7, %s7637_s16  ;;  %v2007_v43 = vsel %vm1489_vm11, %v1995_v29, %v11260_v33 }
  0xe7   : > { %7347 = vmatpush3.msra.mxu1 %v947_v32  ;;  %v1987_v38 = vpop.permute.xlu0 %1986  ;;  %v945_v44 = vld [vmem:[#allocation6 + $0x8] sm:$0xff]  ;;  %v2008_v55 = vsel %vm2005_vm12, %v1977_v27, %v2007_v43 }
  0xe8   : > { %7348 = vmatprep.subr.mxu1 %v11261_v15  ;;  %v2000_v16 = vrot.slane %v1987_v38, 4  ;;  %v8077_v49 = vpop.permute.xlu1 %1988 }
  0xe9   : > { %7349 = vmatpush3.msra.mxu1 %v946_v36  ;;  %v11259_v50 = vrot.slane %v8077_v49, 4  ;;  %2063 = vrot.lane.b32.xlu0 %v7873_v57, %s7638_s20  ;;  %v943_v57 = vld [vmem:[%s530_s19] sm:$0xff]  ;;  %s7646_s19 = smov 32  }
  0xea   : > { %7350 = vmatprep.subr.mxu1 %v11261_v15  ;;  %2073 = vrot.lane.b32.xlu1 %v7915_v14, %s7638_s20  ;;  %v2013_v58 = vsel %vm1489_vm11, %v1999_v35, %v2000_v16  ;;  %v1963_v14 = vld [vmem:[#allocation2 + $0x4c] sm:$0xf] }
  0xeb   : > { %7351 = vmatpush3.msra.mxu1 %v945_v44  ;;  %v1892_v59 = vpop.permute.xlu0 %1891  ;;  %v2015_v60 = vsel %vm1489_vm11, %v2000_v16, %v11259_v50  ;;  %v8102_v62 = vsel %vm2005_vm12, %v1985_v34, %v2013_v58  ;;  %v1698_v34 = vld [vmem:[#allocation2 + $0x48] sm:$0xf] }
  0xec   : > { %7352 = vmatprep.subr.mxu1 %v11261_v15  ;;  %v1894_v1 = vpop.permute.xlu1 %1893  ;;  %v2016_v2 = vsel %vm2005_vm12, %v1987_v38, %v2015_v60  ;;  %v1911_v7 = vrot.slane %v1892_v59, 4 }
  0xed   : > { %7353 = vmatpush3.msra.mxu1 %v944_v52  ;;  %v7005_v5 = vcombine.low %v2008_v55, %v2016_v2  ;;  %v7006_v6 = vcombine.high %v2008_v55, %v2016_v2  ;;  %1982 = vrot.lane.b32.xlu0 %v1958_v56, %s7630_s2  ;;  %v1912_v8 = vrot.slane %v1894_v1, 4  ;;  %v1610_v56 = vld [vmem:[#allocation2 + $0x20] sm:$0xf] }
  0xee   : > { %7355 = vmatmul.mubr.msk.f32.vlgmr.msra.gmra.mxu1 %vm953_vm13, %v943_v57  ;;  %1992 = vrot.lane.b32.xlu1 %v1963_v14, %s7630_s2  ;;  %v1615_v57 = vld [vmem:[#allocation2 + $0x48] sm:$0xf] }
  0xef   : > { %v8113_v10 = vpop.permute.xlu0 %1895  ;;  %2634 = vmatprep.subr.bf16.mxu1 %v7006_v6  ;;  %7021 = vmatprep.mubr.msk.bf16.mxu1 %vm2574_vm14, %v8099_v61  ;;  %v1921_v19 = vsel %vm1489_vm11, %v1911_v7, %v1912_v8 }
  0xf0   : > { %v11258_v12 = vrot.slane %v8113_v10, 4  ;;  %v1902_v13 = vpop.permute.xlu1 %1901  ;;  %2635 = vmatpush1.bf16.msra.mxu1 %v7005_v5  ;;  %v8129_v26 = vsel %vm1922_vm15, %v1892_v59, %v1921_v19 }
  0xf1   : > { %1899 = vrot.lane.b32.xlu0 %v1875_v9, %s7632_s25  ;;  %v1916_v17 = vrot.slane %v1902_v13, 4 }
  0xf2   : > { %1909 = vrot.lane.b32.xlu1 %v1880_v11, %s7632_s25  ;;  %v1924_v21 = vsel %vm1489_vm11, %v1912_v8, %v11258_v12 }
  0xf3   : > { %v1904_v20 = vpop.permute.xlu0 %1903  ;;  %v1925_v27 = vsel %vm1922_vm15, %v1894_v1, %v1924_v21 }
  0xf4   : > { %v1917_v23 = vrot.slane %v1904_v20, 4  ;;  %v8124_v24 = vpop.permute.xlu1 %1905 }
  0xf5   : > { %v11257_v25 = vrot.slane %v8124_v24, 4  ;;  %1816 = vrot.lane.b32.xlu0 %v1792_v18, %s7633_s26 }
  0xf6   : > { %1826 = vrot.lane.b32.xlu1 %v1797_v22, %s7633_s26  ;;  %v1930_v29 = vsel %vm1489_vm11, %v1916_v17, %v1917_v23  ;;  %v2041_v22 = vld [vmem:[#allocation2 + $0x24] sm:$0xf] }
  0xf7   : > { %v1809_v31 = vpop.permute.xlu0 %1808  ;;  %v1932_v32 = vsel %vm1489_vm11, %v1917_v23, %v11257_v25  ;;  %v8138_v35 = vsel %vm1922_vm15, %v1902_v13, %v1930_v29  ;;  %v7578_v29 = vpack.c.bf16 %v7891_v0, %v7865_v54 }
  0xf8   : > { %v1811_v36 = vpop.permute.xlu1 %1810  ;;  %v1933_v37 = vsel %vm1922_vm15, %v1904_v20, %v1932_v32  ;;  %v1828_v52 = vrot.slane %v1809_v31, 4 }
  0xf9   : > { %v6997_v44 = vcombine.low %v1925_v27, %v1933_v37  ;;  %v6998_v16 = vcombine.high %v1925_v27, %v1933_v37  ;;  %1717 = vrot.lane.b32.xlu0 %v1693_v28, %s7634_s29  ;;  %v1829_v55 = vrot.slane %v1811_v36, 4 }
  0xfa   : > { %1727 = vrot.lane.b32.xlu1 %v1698_v34, %s7634_s29 }
  0xfb   : > { %v8147_v58 = vpop.permute.xlu0 %1812  ;;  %2636 = vmatprep.subr.bf16.mxu1 %v6998_v16  ;;  %v1838_v1 = vsel %vm1489_vm11, %v1828_v52, %v1829_v55 }
  0xfc   : > { %v11256_v59 = vrot.slane %v8147_v58, 4  ;;  %v1819_v60 = vpop.permute.xlu1 %1818  ;;  %2637 = vmatpush1.bf16.msra.mxu1 %v6997_v44  ;;  %v8160_v9 = vsel %vm1839_vm0, %v1809_v31, %v1838_v1  ;;  %v7579_v44 = vpack.c.bf16 %v7888_v63, %v7862_v53 }
  0xfd   : > { %1634 = vrot.lane.b32.xlu0 %v1610_v56, %s7635_s27  ;;  %v1833_v14 = vrot.slane %v1819_v60, 4 }
  0xfe   : > { %1644 = vrot.lane.b32.xlu1 %v1615_v57, %s7635_s27  ;;  %v1841_v5 = vsel %vm1489_vm11, %v1829_v55, %v11256_v59 }
  0xff   : > { %v1821_v2 = vpop.permute.xlu0 %1820  ;;  %v1842_v11 = vsel %vm1839_vm0, %v1811_v36, %v1841_v5 }
 0x100   : > { %v1834_v6 = vrot.slane %v1821_v2, 4  ;;  %v8156_v7 = vpop.permute.xlu1 %1822 }
 0x101   : > { %v11255_v8 = vrot.slane %v8156_v7, 4 }
 0x102   : > { %v1847_v13 = vsel %vm1489_vm11, %v1833_v14, %v1834_v6 }
 0x103   : > { %v1710_v17 = vpop.permute.xlu0 %1709  ;;  %v1849_v18 = vsel %vm1489_vm11, %v1834_v6, %v11255_v8  ;;  %v8168_v19 = vsel %vm1839_vm0, %v1819_v60, %v1847_v13 }
 0x104   : > { %v1712_v20 = vpop.permute.xlu1 %1711  ;;  %v1850_v21 = vsel %vm1839_vm0, %v1821_v2, %v1849_v18  ;;  %v1729_v31 = vrot.slane %v1710_v17, 4 }
 0x105   : > { %v6989_v27 = vcombine.low %v1842_v11, %v1850_v21  ;;  %v6990_v28 = vcombine.high %v1842_v11, %v1850_v21  ;;  %v1730_v32 = vrot.slane %v1712_v20, 4 }
 0x107   : > { %v8177_v34 = vpop.permute.xlu0 %1713  ;;  %2638 = vmatprep.subr.bf16.mxu1 %v6990_v28  ;;  %v1739_v52 = vsel %vm1489_vm11, %v1729_v31, %v1730_v32 }
 0x108   : > { %11592 = vst [vmem:[#allocation22_spill] sm:$0xff] %v8177_v34  ;;  %v11254_v36 = vrot.slane %v8177_v34, 4  ;;  %v1720_v37 = vpop.permute.xlu1 %1719  ;;  %2639 = vmatpush1.bf16.msra.mxu1 %v6989_v27  ;;  %v8190_v60 = vsel %vm11319_vm4, %v1710_v17, %v1739_v52  ;;  %v7513_v34 = vld [vmem:[#allocation2 + $0x20] ss:$40 sps:$4 sm:$0xff]  }
 0x109   : > { %2640 = vmatprep.subr.bf16.mxu1 %v7578_v29  ;;  %v1734_v16 = vrot.slane %v1720_v37, 4 }
 0x10a   : > { %v1742_v54 = vsel %vm1489_vm11, %v1730_v32, %v11254_v36 }
 0x10b   : > { %v1722_v55 = vpop.permute.xlu0 %1721  ;;  %v1743_v53 = vsel %vm11319_vm4, %v1712_v20, %v1742_v54 }
 0x10c   : > { %v1735_v0 = vrot.slane %v1722_v55, 4  ;;  %v8186_v56 = vpop.permute.xlu1 %1723  ;;  %2641 = vmatpush1.bf16.msra.mxu1 %v7579_v44 }
 0x10d   : > { %11593 = vst [vmem:[#allocation23_spill] sm:$0xff] %v8186_v56  ;;  %v11253_v57 = vrot.slane %v8186_v56, 4 }
 0x10e   : > { %v1748_v63 = vsel %vm1489_vm11, %v1734_v16, %v1735_v0 }
 0x10f   : > { %v1627_v14 = vpop.permute.xlu0 %1626  ;;  %v1750_v1 = vsel %vm1489_vm11, %v1735_v0, %v11253_v57  ;;  %v8198_v2 = vsel %vm11319_vm4, %v1720_v37, %v1748_v63 }
 0x110   : > { %v1629_v5 = vpop.permute.xlu1 %1628  ;;  %v1751_v6 = vsel %vm11319_vm4, %v1722_v55, %v1750_v1  ;;  %v1646_v20 = vrot.slane %v1627_v14, 4 }
 0x111   : > { %v6973_v17 = vcombine.low %v1743_v53, %v1751_v6  ;;  %v6974_v18 = vcombine.high %v1743_v53, %v1751_v6  ;;  %v1647_v21 = vrot.slane %v1629_v5, 4 }
 0x113   : > { %v8205_v27 = vpop.permute.xlu0 %1630  ;;  %2642 = vmatprep.subr.bf16.mxu1 %v6974_v18  ;;  %v1656_v32 = vsel %vm1489_vm11, %v1646_v20, %v1647_v21  ;;  %v1532_v20 = vld [vmem:[#allocation2 + $0x48] sm:$0xf] }
 0x114   : > { %v1648_v28 = vrot.slane %v8205_v27, 4  ;;  %v1637_v29 = vpop.permute.xlu1 %1636  ;;  %2643 = vmatpush1.bf16.msra.mxu1 %v6973_v17  ;;  %v8216_v54 = vsel %vm1657_vm5, %v1627_v14, %v1656_v32  ;;  %1561 = vrot.lane.b32.xlu1 %v1532_v20, %s7636_s23 }
 0x115   : > { %v1651_v31 = vrot.slane %v1637_v29, 4 }
 0x116   : > { %v1659_v44 = vsel %vm1489_vm11, %v1647_v21, %v1648_v28 }
 0x117   : > { %v1639_v37 = vpop.permute.xlu0 %1638  ;;  %v1660_v0 = vsel %vm1657_vm5, %v1629_v5, %v1659_v44 }
 0x118   : > { %v1652_v16 = vrot.slane %v1639_v37, 4  ;;  %v8212_v52 = vpop.permute.xlu1 %1640 }
 0x119   : > { %v1653_v55 = vrot.slane %v8212_v52, 4 }
 0x11a   : > { %v1665_v53 = vsel %vm1489_vm11, %v1651_v31, %v1652_v16 }
 0x11b   : > { %v1544_v63 = vpop.permute.xlu0 %1543  ;;  %v1667_v1 = vsel %vm1489_vm11, %v1652_v16, %v1653_v55  ;;  %v8224_v6 = vsel %vm1657_vm5, %v1637_v29, %v1665_v53 }
 0x11c   : > { %v1546_v17 = vpop.permute.xlu1 %1545  ;;  %v1668_v18 = vsel %vm1657_vm5, %v1639_v37, %v1667_v1  ;;  %v1563_v31 = vrot.slane %v1544_v63, 4 }
 0x11d   : > { %v6965_v5 = vcombine.low %v1660_v0, %v1668_v18  ;;  %v6966_v21 = vcombine.high %v1660_v0, %v1668_v18  ;;  %v1564_v32 = vrot.slane %v1546_v17, 4 }
 0x11f   : > { %v8231_v44 = vpop.permute.xlu0 %1547  ;;  %2644 = vmatprep.subr.bf16.mxu1 %v6966_v21  ;;  %v1573_v37 = vsel %vm1489_vm11, %v1563_v31, %v1564_v32 }
 0x120   : > { %v11268_v16 = vrot.slane %v8231_v44, 4  ;;  %v1554_v29 = vpop.permute.xlu1 %1553  ;;  %2645 = vmatpush1.bf16.msra.mxu1 %v6965_v5  ;;  %v8242_v21 = vsel %vm1574_vm6, %v1544_v63, %v1573_v37 }
 0x121   : > { %v1568_v53 = vrot.slane %v1554_v29, 4 }
 0x122   : > { %v1576_v57 = vsel %vm1489_vm11, %v1564_v32, %v11268_v16 }
 0x123   : > { %v1556_v1 = vpop.permute.xlu0 %1555  ;;  %v1577_v8 = vsel %vm1574_vm6, %v1546_v17, %v1576_v57 }
 0x124   : > { %v1569_v36 = vrot.slane %v1556_v1, 4  ;;  %v8238_v0 = vpop.permute.xlu1 %1557 }
 0x125   : > { %v11267_v18 = vrot.slane %v8238_v0, 4 }
 0x126   : > { %v1582_v5 = vsel %vm1489_vm11, %v1568_v53, %v1569_v36 }
 0x127   : > { %v1460_v59 = vpop.permute.xlu0 %1459  ;;  %v1584_v31 = vsel %vm1489_vm11, %v1569_v36, %v11267_v18  ;;  %v8250_v25 = vsel %vm1574_vm6, %v1554_v29, %v1582_v5  ;;  %v1527_v36 = vld [vmem:[#allocation2 + $0x20] sm:$0xf] }
 0x128   : > { %v1462_v32 = vpop.permute.xlu1 %1461  ;;  %v1585_v12 = vsel %vm1574_vm6, %v1556_v1, %v1584_v31  ;;  %v1479_v53 = vrot.slane %v1460_v59, 4  ;;  %1551 = vrot.lane.b32.xlu0 %v1527_v36, %s7636_s23  ;;  %v8275_v36 = vpop.f32.mrf.mxu0 }
 0x129   : > { %v6957_v57 = vcombine.low %v1577_v8, %v1585_v12  ;;  %v6958_v17 = vcombine.high %v1577_v8, %v1585_v12  ;;  %v1480_v37 = vrot.slane %v1462_v32, 4  ;;  %v1443_v8 = vld [vmem:[#allocation2 + $0x20] sm:$0xf] }
 0x12b   : > { %v8257_v33 = vpop.permute.xlu0 %1463  ;;  %2646 = vmatprep.subr.bf16.mxu1 %v6958_v17  ;;  %v1490_v31 = vsel %vm1489_vm11, %v1479_v53, %v1480_v37  ;;  %v1448_v17 = vld [vmem:[#allocation2 + $0x48] sm:$0xf] }
 0x12c   : > { %v11266_v29 = vrot.slane %v8257_v33, 4  ;;  %v1470_v5 = vpop.permute.xlu1 %1469  ;;  %2647 = vmatpush1.bf16.msra.mxu1 %v6957_v57  ;;  %1467 = vrot.lane.b32.xlu0 %v1443_v8, %s7637_s16  ;;  %v8272_v20 = vsel %vm11321_vm7, %v1460_v59, %v1490_v31  ;;  %v2046_v8 = vld [vmem:[#allocation2 + $0x4c] sm:$0xf]  ;;  %v7335_v31 = vpop.f32.mrf.mxu0 }
 0x12d   : > { %v1484_v1 = vrot.slane %v1470_v5, 4  ;;  %1477 = vrot.lane.b32.xlu1 %v1448_v17, %s7637_s16 }
 0x12e   : > { %v1493_v12 = vsel %vm1489_vm11, %v1480_v37, %v11266_v29 }
 0x12f   : > { %v1472_v50 = vpop.permute.xlu0 %1471  ;;  %v1494_v53 = vsel %vm11321_vm7, %v1462_v32, %v1493_v12 }
 0x130   : > { %v1485_v63 = vrot.slane %v1472_v50, 4  ;;  %v8266_v14 = vpop.permute.xlu1 %1473  ;;  %2065 = vrot.lane.b32.xlu0 %v2041_v22, %s7638_s20 }
 0x131   : > { %v11265_v57 = vrot.slane %v8266_v14, 4  ;;  %2075 = vrot.lane.b32.xlu1 %v2046_v8, %s7638_s20 }
 0x132   : > { %v1499_v37 = vsel %vm1489_vm11, %v1484_v1, %v1485_v63 }
 0x133   : > { %v2058_v11 = vpop.permute.xlu0 %2057  ;;  %v1501_v13 = vsel %vm1489_vm11, %v1485_v63, %v11265_v57  ;;  %v8282_v23 = vsel %vm11321_vm7, %v1470_v5, %v1499_v37 }
 0x134   : > { %v2060_v17 = vpop.permute.xlu1 %2059  ;;  %v1502_v59 = vsel %vm11321_vm7, %v1472_v50, %v1501_v13  ;;  %v2077_v63 = vrot.slane %v2058_v11, 4 }
 0x135   : > { %v6949_v12 = vcombine.low %v1494_v53, %v1502_v59  ;;  %v6950_v38 = vcombine.high %v1494_v53, %v1502_v59  ;;  %v2078_v43 = vrot.slane %v2060_v17, 4 }
 0x137   : > { %v8291_v5 = vpop.permute.xlu0 %2061  ;;  %2648 = vmatprep.subr.bf16.mxu1 %v6950_v38  ;;  %v2087_v37 = vsel %vm1489_vm11, %v2077_v63, %v2078_v43 }
 0x138   : > { %v11264_v50 = vrot.slane %v8291_v5, 4  ;;  %v2068_v13 = vpop.permute.xlu1 %2067  ;;  %2649 = vmatpush1.bf16.msra.mxu1 %v6949_v12  ;;  %v8302_v38 = vsel %vm11320_vm8, %v2058_v11, %v2087_v37 }
 0x139   : > { %v2082_v22 = vrot.slane %v2068_v13, 4 }
 0x13a   : > { %v2090_v53 = vsel %vm1489_vm11, %v2078_v43, %v11264_v50 }
 0x13b   : > { %v2070_v31 = vpop.permute.xlu0 %2069  ;;  %v2091_v12 = vsel %vm11320_vm8, %v2060_v17, %v2090_v53 }
 0x13c   : > { %v2083_v59 = vrot.slane %v2070_v31, 4  ;;  %v8298_v8 = vpop.permute.xlu1 %2071 }
 0x13d   : > { %v11263_v32 = vrot.slane %v8298_v8, 4 }
 0x13e   : > { %v2096_v63 = vsel %vm1489_vm11, %v2082_v22, %v2083_v59 }
 0x13f   : > { %v8306_v1 = vpop.permute.xlu0 %1980  ;;  %v2098_v43 = vsel %vm1489_vm11, %v2083_v59, %v11263_v32  ;;  %v8312_v3 = vsel %vm11320_vm8, %v2068_v13, %v2096_v63  ;;  %v8324_v59 = vld [vmem:[%s7775_s18] ss:$8 sps:$4 sm:$0xff]   ;;  %v8329_v63 = vld [vmem:[%s7775_s18 + $0x14] ss:$8 sps:$4 sm:$0xff]  }
 0x140   : > { %v8314_v4 = vpop.permute.xlu1 %1990  ;;  %v2099_v15 = vsel %vm11320_vm8, %v2070_v31, %v2098_v43  ;;  %v11299_v45 = vrot.slane %v8306_v1, 4 }
 0x141   : > { %v7013_v22 = vcombine.low %v2091_v12, %v2099_v15  ;;  %v7014_v37 = vcombine.high %v2091_v12, %v2099_v15  ;;  %v8341_v12 = vld [vmem:[%s7775_s18 + $0x10] ss:$8 sps:$4 sm:$0xff]  }
 0x143   : > { %v8321_v53 = vpop.permute.xlu0 %1897  ;;  %2664 = vmatprep.subr.bf16.mxu1 %v7014_v37 }
 0x144   : > { %v8326_v13 = vpop.permute.xlu1 %1907  ;;  %2665 = vmatpush2.bf16.msra.mxu1 %v7013_v22 }
 0x147   : > { %v8331_v31 = vpop.permute.xlu0 %1814  ;;  %2667 = vmatmul.mubr.bf16.vlgmr.msra.gmra.mxu1 %v8324_v59 }
 0x148   : > { %v8334_v43 = vpop.permute.xlu1 %1824  ;;  %7022 = vmatprep.mubr.msk.bf16.mxu1 %vm2574_vm14, %v8329_v63 }
 0x14b   : > { %v8338_v15 = vpop.permute.xlu0 %1715 }
 0x14c   : > { %v8343_v37 = vpop.permute.xlu1 %1725 }
 0x14f   : > { %v8345_v11 = vpop.permute.xlu0 %1632  ;;  %2677 = vmatmul.mubr.bf16.gmra.mxu1 %v8341_v12 }
 0x150   : > { %v11274_v22 = vrot.slane %v8345_v11, 4  ;;  %v8349_v17 = vpop.permute.xlu1 %1642  ;;  %7025 = vmatprep.mubr.msk.bf16.mxu1 %vm2574_vm14, %v8099_v61 }
 0x151   : > { %v11273_v32 = vrot.slane %v8349_v17, 4 }
 0x152   : > { %v1661_v50 = vsel %vm1489_vm11, %v1648_v28, %v11274_v22 }
 0x153   : > { %v8359_v57 = vpop.permute.xlu0 %1549  ;;  %v8363_v29 = vsel %vm1657_vm5, %v8205_v27, %v1661_v50  ;;  %v1669_v18 = vsel %vm1489_vm11, %v1653_v55, %v11273_v32  ;;  %v11596_v55 = vrot.slane %v8231_v44, 4 }
 0x154   : > { %11594 = vst [vmem:[#allocation24_spill] sm:$0xff] %v8363_v29  ;;  %v11280_v16 = vrot.slane %v8359_v57, 4  ;;  %v8371_v42 = vpop.permute.xlu1 %1559  ;;  %v8375_v41 = vsel %vm1657_vm5, %v8212_v52, %v1669_v18  ;;  %v11598_v18 = vrot.slane %v8238_v0, 4 }
 0x155   : > { %11595 = vst [vmem:[#allocation25_spill] sm:$0xff] %v8375_v41  ;;  %v11279_v28 = vrot.slane %v8371_v42, 4 }
 0x156   : > { %v1578_v32 = vsel %vm1489_vm11, %v11596_v55, %v11280_v16 }
 0x157   : > { %v8387_v22 = vpop.permute.xlu0 %1465  ;;  %v8391_v52 = vsel %vm1574_vm6, %v8231_v44, %v1578_v32  ;;  %v1586_v27 = vsel %vm1489_vm11, %v11598_v18, %v11279_v28  ;;  %v11600_v18 = vrot.slane %v8257_v33, 4 }
 0x158   : > { %11597 = vst [vmem:[#allocation26_spill] sm:$0xff] %v8391_v52  ;;  %v11286_v50 = vrot.slane %v8387_v22, 4  ;;  %v8399_v48 = vpop.permute.xlu1 %1475  ;;  %v8403_v47 = vsel %vm1574_vm6, %v8238_v0, %v1586_v27  ;;  %v11602_v27 = vrot.slane %v8266_v14, 4 }
 0x159   : > { %11599 = vst [vmem:[#allocation27_spill] sm:$0xff] %v8403_v47  ;;  %v11285_v55 = vrot.slane %v8399_v48, 4 }
 0x15a   : > { %v1495_v28 = vsel %vm1489_vm11, %v11600_v18, %v11286_v50 }
 0x15b   : > { %v8415_v16 = vpop.permute.xlu0 %2063  ;;  %v8419_v0 = vsel %vm11321_vm7, %v8257_v33, %v1495_v28  ;;  %v1503_v44 = vsel %vm1489_vm11, %v11602_v27, %v11285_v55  ;;  %v11604_v27 = vrot.slane %v8291_v5, 4  ;;  %v11312_v28 = vrot.slane %v8326_v13, 4 }
 0x15c   : > { %11601 = vst [vmem:[#allocation28_spill] sm:$0xff] %v8419_v0  ;;  %v11287_v32 = vrot.slane %v8415_v16, 4  ;;  %v8427_v40 = vpop.permute.xlu1 %2073  ;;  %v8431_v39 = vsel %vm11321_vm7, %v8266_v14, %v1503_v44  ;;  %v11606_v14 = vrot.slane %v8298_v8, 4 }
 0x15d   : > { %11603 = vst [vmem:[#allocation29_spill] sm:$0xff] %v8431_v39  ;;  %v11294_v18 = vrot.slane %v8427_v40, 4  ;;  %v11302_v39 = vrot.slane %v8314_v4, 4 }
 0x15e   : > { %v2092_v55 = vsel %vm1489_vm11, %v11604_v27, %v11287_v32 }
 0x15f   : > { %v8445_v50 = vsel %vm11320_vm8, %v8291_v5, %v2092_v55  ;;  %v2100_v44 = vsel %vm1489_vm11, %v11606_v14, %v11294_v18  ;;  %v1983_v32 = vpop.permute.xlu0 %1982 }
 0x160   : > { %11605 = vst [vmem:[#allocation30_spill] sm:$0xff] %v8445_v50  ;;  %v8454_v33 = vsel %vm11320_vm8, %v8298_v8, %v2100_v44  ;;  %v1993_v46 = vpop.permute.xlu1 %1992  ;;  %v1998_v5 = vrot.slane %v1983_v32, 4  ;;  %v11307_v44 = vrot.slane %v8321_v53, 4 }
 0x161   : > { %11607 = vst [vmem:[#allocation31_spill] sm:$0xff] %v8454_v33  ;;  %v2003_v55 = vrot.slane %v1993_v46, 4  ;;  %v8474_v33 = vld [vmem:[#allocation3 + $0xd4] sm:$0xff] }
 0x162   : > { %v2011_v14 = vsel %vm1489_vm11, %v11299_v45, %v1998_v5  ;;  %4573 = vrot.lane.b32.xlu0 %v8474_v33, %s7630_s2 }
 0x163   : > { %v2019_v8 = vsel %vm1489_vm11, %v11302_v39, %v2003_v55  ;;  %v1900_v27 = vpop.permute.xlu0 %1899  ;;  %v2012_v46 = vsel %vm2005_vm12, %v8306_v1, %v2011_v14  ;;  %v8478_v55 = vld [vmem:[#allocation3 + $0xcc] sm:$0xff] }
 0x164   : > { %v1910_v18 = vpop.permute.xlu1 %1909  ;;  %v2020_v32 = vsel %vm2005_vm12, %v8314_v4, %v2019_v8  ;;  %v1915_v50 = vrot.slane %v1900_v27, 4  ;;  %4571 = vrot.lane.b32.xlu1 %v8478_v55, %s7630_s2  ;;  %v8482_v39 = vld [vmem:[#allocation3 + $0xd0] sm:$0xff]  ;;  %v8490_v27 = vld [vmem:[#allocation3 + $0xc8] sm:$0xff]  ;;  %v11313_v8 = vrot.slane %v8331_v31, 4 }
 0x165   : > { %v1920_v5 = vrot.slane %v1910_v18, 4  ;;  %v7009_v45 = vcombine.low %v2012_v46, %v2020_v32  ;;  %v7010_v0 = vcombine.high %v2012_v46, %v2020_v32  ;;  %v1836_v46 = vrot.slane %v8334_v43, 4 }
 0x166   : > { %v1928_v14 = vsel %vm1489_vm11, %v11307_v44, %v1915_v50  ;;  %3295 = vrot.lane.b32.xlu0 %v8482_v39, %s7636_s23 }
 0x167   : > { %v1936_v18 = vsel %vm1489_vm11, %v11312_v28, %v1920_v5  ;;  %2740 = vmatprep.subr.bf16.mxu1 %v7010_v0  ;;  %v1817_v32 = vpop.permute.xlu0 %1816  ;;  %v1929_v52 = vsel %vm1922_vm15, %v8321_v53, %v1928_v14  ;;  %v1732_v14 = vrot.slane %v8338_v15, 4 }
 0x168   : > { %v1827_v47 = vpop.permute.xlu1 %1826  ;;  %2741 = vmatpush1.bf16.msra.mxu1 %v7009_v45  ;;  %v1937_v50 = vsel %vm1922_vm15, %v8326_v13, %v1936_v18  ;;  %v1832_v44 = vrot.slane %v1817_v32, 4  ;;  %3293 = vrot.lane.b32.xlu1 %v8490_v27, %s7636_s23 }
 0x169   : > { %v1837_v41 = vrot.slane %v1827_v47, 4  ;;  %v7001_v29 = vcombine.low %v1929_v52, %v1937_v50  ;;  %v7002_v5 = vcombine.high %v1929_v52, %v1937_v50  ;;  %v11318_v47 = vrot.slane %v8343_v37, 4 }
 0x16a   : > { %v1845_v45 = vsel %vm1489_vm11, %v11313_v8, %v1832_v44  ;;  %4327 = vrot.lane.b32.xlu0 %v8474_v33, %s7632_s25 }
 0x16b   : > { %v1853_v0 = vsel %vm1489_vm11, %v1836_v46, %v1837_v41  ;;  %2742 = vmatprep.subr.bf16.mxu1 %v7002_v5  ;;  %v1846_v52 = vsel %vm1839_vm0, %v8331_v31, %v1845_v45  ;;  %v1718_v32 = vpop.permute.xlu0 %1717  ;;  %v7511_v5 = vld [vmem:[#allocation2 + $0x1c] ss:$40 sps:$4 sm:$0xff]  }
 0x16c   : > { %2743 = vmatpush1.bf16.msra.mxu1 %v7001_v29  ;;  %v1854_v18 = vsel %vm1839_vm0, %v8334_v43, %v1853_v0  ;;  %v1728_v50 = vpop.permute.xlu1 %1727  ;;  %v1733_v8 = vrot.slane %v1718_v32, 4  ;;  %4325 = vrot.lane.b32.xlu1 %v8478_v55, %s7632_s25 }
 0x16d   : > { %v6993_v28 = vcombine.low %v1846_v52, %v1854_v18  ;;  %v6994_v44 = vcombine.high %v1846_v52, %v1854_v18  ;;  %v1738_v56 = vrot.slane %v1728_v50, 4 }
 0x16e   : > { %v1746_v41 = vsel %vm1489_vm11, %v1732_v14, %v1733_v8  ;;  %3049 = vrot.lane.b32.xlu0 %v8482_v39, %s7637_s16  ;;  %v11609_v8 = vrot.slane %v8349_v17, 4 }
 0x16f   : > { %2744 = vmatprep.subr.bf16.mxu1 %v6994_v44  ;;  %v1754_v29 = vsel %vm1489_vm11, %v11318_v47, %v1738_v56  ;;  %v1635_v45 = vpop.permute.xlu0 %1634  ;;  %v1747_v52 = vsel %vm11319_vm4, %v8338_v15, %v1746_v41  ;;  %v11608_v56 = vrot.slane %v8345_v11, 4 }
 0x170   : > { %2745 = vmatpush1.bf16.msra.mxu1 %v6993_v28  ;;  %v1645_v0 = vpop.permute.xlu1 %1644  ;;  %v1755_v18 = vsel %vm11319_vm4, %v8343_v37, %v1754_v29  ;;  %v1650_v32 = vrot.slane %v1635_v45, 4  ;;  %3047 = vrot.lane.b32.xlu1 %v8490_v27, %s7637_s16 }
 0x171   : > { %2746 = vmatprep.subr.bf16.mxu1 %v7513_v34  ;;  %v1655_v50 = vrot.slane %v1645_v0, 4  ;;  %v6978_v44 = vcombine.high %v1747_v52, %v1755_v18  ;;  %v6977_v29 = vcombine.low %v1747_v52, %v1755_v18  ;;  %v11611_v18 = vrot.slane %v8371_v42, 4 }
 0x172   : > { %v1663_v28 = vsel %vm1489_vm11, %v11608_v56, %v1650_v32  ;;  %4081 = vrot.lane.b32.xlu0 %v8474_v33, %s7633_s26 }
 0x173   : > { %v1671_v41 = vsel %vm1489_vm11, %v11609_v8, %v1655_v50  ;;  %v1664_v34 = vsel %vm1657_vm5, %v8345_v11, %v1663_v28  ;;  %v11610_v11 = vrot.slane %v8359_v57, 4 }
 0x174   : > { %2747 = vmatpush1.bf16.msra.mxu1 %v7511_v5  ;;  %v1672_v45 = vsel %vm1657_vm5, %v8349_v17, %v1671_v41  ;;  %4079 = vrot.lane.b32.xlu1 %v8478_v55, %s7633_s26 }
 0x175   : > { %2748 = vmatprep.subr.bf16.mxu1 %v6978_v44  ;;  %v6970_v0 = vcombine.high %v1664_v34, %v1672_v45  ;;  %v6969_v5 = vcombine.low %v1664_v34, %v1672_v45 }
 0x176   : > { %4819 = vrot.lane.b32.xlu0 %v8474_v33, %s7638_s20 }
 0x178   : > { %2749 = vmatpush1.bf16.msra.mxu1 %v6977_v29  ;;  %4817 = vrot.lane.b32.xlu1 %v8478_v55, %s7638_s20  ;;  %v11612_v55 = vrot.slane %v8387_v22, 4 }
 0x179   : > { %2750 = vmatprep.subr.bf16.mxu1 %v6970_v0 }
 0x17a   : > { %3785 = vrot.lane.b32.xlu0 %v8490_v27, %s7634_s29 }
 0x17c   : > { %2751 = vmatpush1.bf16.msra.mxu1 %v6969_v5  ;;  %3787 = vrot.lane.b32.xlu1 %v8482_v39, %s7634_s29 }
 0x17e   : > { %3539 = vrot.lane.b32.xlu0 %v8490_v27, %s7635_s27 }
 0x186   : > { %v1562_v47 = vpop.permute.xlu1 %1561 }
 0x187   : > { %v1572_v52 = vrot.slane %v1562_v47, 4 }
 0x189   : > { %v1588_v50 = vsel %vm1489_vm11, %v11611_v18, %v1572_v52 }
 0x18a   : > { %v1589_v33 = vsel %vm1574_vm6, %v8371_v42, %v1588_v50 }
 0x19a   : > { %v1552_v32 = vpop.permute.xlu0 %1551 }
 0x19b   : > { %v1567_v56 = vrot.slane %v1552_v32, 4 }
 0x19d   : > { %v1580_v17 = vsel %vm1489_vm11, %v11610_v11, %v1567_v56  ;;  %v8572_v56 = vld [vmem:[#allocation3 + $0xd8] sm:$0xff] }
 0x19e   : > { %v1468_v44 = vpop.permute.xlu0 %1467  ;;  %v1581_v28 = vsel %vm1574_vm6, %v8359_v57, %v1580_v17  ;;  %v11613_v57 = vrot.slane %v8399_v48, 4  ;;  %3297 = vrot.lane.b32.xlu1 %v8572_v56, %s7636_s23 }
 0x19f   : > { %v1483_v47 = vrot.slane %v1468_v44, 4  ;;  %v1478_v8 = vpop.permute.xlu1 %1477  ;;  %v6961_v29 = vcombine.low %v1581_v28, %v1589_v33  ;;  %v6962_v34 = vcombine.high %v1581_v28, %v1589_v33  ;;  %v11614_v44 = vrot.slane %v8415_v16, 4 }
 0x1a0   : > { %v1488_v41 = vrot.slane %v1478_v8, 4 }
 0x1a1   : > { %v1497_v45 = vsel %vm1489_vm11, %v11612_v55, %v1483_v47  ;;  %2752 = vmatprep.subr.bf16.mxu1 %v6962_v34 }
 0x1a2   : > { %v1505_v0 = vsel %vm1489_vm11, %v11613_v57, %v1488_v41  ;;  %v2066_v32 = vpop.permute.xlu0 %2065  ;;  %v1498_v42 = vsel %vm11321_vm7, %v8387_v22, %v1497_v45  ;;  %2753 = vmatpush1.bf16.msra.mxu1 %v6961_v29  ;;  %v11615_v22 = vrot.slane %v8427_v40, 4  ;;  %3541 = vrot.lane.b32.xlu1 %v8482_v39, %s7635_s27  ;;  %v11616_v39 = vmov 0.0   ;;  %v1030_v45 = vld [vmem:[%s11617_s15] sm:$0xff] }
 0x1a3   : > { %v2081_v5 = vrot.slane %v2066_v32, 4  ;;  %v2076_v52 = vpop.permute.xlu1 %2075  ;;  %v1506_v11 = vsel %vm11321_vm7, %v8399_v48, %v1505_v0  ;;  %v8616_v57 = vld [vmem:[%s7785_s1] sm:$0xff]  ;;  %v11618_v0 = vcombine.high %v8083_v51, %v8102_v62  ;;  %v11619_v32 = vcombine.low %v8083_v51, %v8102_v62  ;;  %v1185_v51 = vld [vmem:[%s7770_s13 + $0x10] sm:$0xff] }
 0x1a4   : > { %v2086_v17 = vrot.slane %v2076_v52, 4  ;;  %v6953_v18 = vcombine.low %v1498_v42, %v1506_v11  ;;  %v6954_v50 = vcombine.high %v1498_v42, %v1506_v11  ;;  %v1184_v42 = vld [vmem:[%s7770_s13 + $0x8] sm:$0xff]  ;;  %v11621_v52 = vcombine.low %v8129_v26, %v8138_v35 }
 0x1a5   : > { %v2094_v28 = vsel %vm1489_vm11, %v11614_v44, %v2081_v5  ;;  %v11620_v5 = vcombine.high %v8129_v26, %v8138_v35  ;;  %v11622_v62 = vcombine.high %v8160_v9, %v8168_v19  ;;  %v7507_v11 = vld [vmem:[#allocation2 + $0x8] ss:$40 sps:$4 sm:$0xff]   ;;  %v7505_v26 = vld [vmem:[#allocation2 + $0x4] ss:$40 sps:$4 sm:$0xff]   ;;  %v1186_v35 = vld [vmem:[%s7770_s13 + $0x18] sm:$0xff]  ;;  %v11626_v44 = vcombine.high %v8216_v54, %v8224_v6 }
 0x1a6   : > { %v2102_v47 = vsel %vm1489_vm11, %v11615_v22, %v2086_v17  ;;  %2754 = vmatprep.subr.bf16.mxu1 %v6954_v50  ;;  %v2095_v48 = vsel %vm11320_vm8, %v8415_v16, %v2094_v28  ;;  %v1031_v16 = vld [vmem:[%s526_s30] sm:$0xff]  ;;  %3051 = vrot.lane.b32.xlu1 %v8572_v56, %s7637_s16  ;;  %v11623_v17 = vcombine.low %v8160_v9, %v8168_v19  ;;  %v1188_v50 = vld [vmem:[%s7770_s13 + $0x28] sm:$0xff]  ;;  %v1190_v22 = vld [vmem:[%s7770_s13 + $0x38] sm:$0xff] }
 0x1a7   : > { %2755 = vmatpush1.bf16.msra.mxu1 %v6953_v18  ;;  %v2103_v27 = vsel %vm11320_vm8, %v8427_v40, %v2102_v47  ;;  %v4488_v40 = vld [vmem:[#allocation3 + $0xdc] sm:$0xff]  ;;  %v1187_v18 = vld [vmem:[%s7770_s13 + $0x20] sm:$0xff]  ;;  %v11624_v9 = vcombine.high %v8190_v60, %v8198_v2  ;;  %v11625_v19 = vcombine.low %v8190_v60, %v8198_v2  ;;  %v11628_v2 = vcombine.high %v8242_v21, %v8250_v25 }
 0x1a8   : > { %v7017_v8 = vcombine.low %v2095_v48, %v2103_v27  ;;  %v7018_v33 = vcombine.high %v2095_v48, %v2103_v27  ;;  %v1189_v60 = vld [vmem:[%s7770_s13 + $0x30] sm:$0xff]  ;;  %v11629_v28 = vcombine.low %v8242_v21, %v8250_v25  ;;  %v11632_v47 = vrot.slane %v8064_v30, 4 }
 0x1a9   : > { %v11633_v27 = vrot.slane %v8314_v4, 4  ;;  %v11635_v21 = vcombine.low %v8272_v20, %v8282_v23  ;;  %vm1367_vm8 = vcmask 359424  }
 0x1aa   : > { %2770 = vmatprep.subr.bf16.mxu1 %v7018_v33  ;;  %4575 = vrot.lane.b32.xlu1 %v4488_v40, %s7630_s2 }
 0x1ab   : > { %2771 = vmatpush2.bf16.msra.mxu1 %v7017_v8  ;;  %v11634_v8 = vrot.slane %v8077_v49, 4 }
 0x1ad   : > { %v2017_v25 = vsel %vm1489_vm11, %v11634_v8, %v11633_v27  ;;  %v11666_v8 = vld [vmem:[#allocation18_spill] sm:$0xff] }
 0x1ae   : > { %v1023_v41 = vpop.f32.mrf.mxu1  ;;  %2773 = vmatmul.mubr.bf16.vlgmr.msra.gmra.mxu1 %v8324_v59  ;;  %4329 = vrot.lane.b32.xlu1 %v4488_v40, %s7632_s25  ;;  %v2018_v4 = vsel %vm2005_vm12, %v8077_v49, %v2017_v25  ;;  %v11641_v49 = vcombine.low %v8302_v38, %v8312_v3 }
 0x1af   : > { %vm1027_vm9 = vcmp.ge.f32.partialorder %v1023_v41, 0.0  ;;  %v1028_v29 = vmul.f32 0.1, %v1023_v41  ;;  %7026 = vmatprep.mubr.msk.bf16.mxu1 %vm2574_vm14, %v8329_v63 }
 0x1b0   : > { %v7356_v34 = vpop.f32.mrf.mxu1 }
 0x1b1   : > { %v1029_v55 = vsel %vm1027_vm9, %v1023_v41, %v1028_v29  ;;  %v11636_v41 = vcombine.high %v8302_v38, %v8312_v3  ;;  %v11637_v29 = vrot.slane %v8321_v53, 4  ;;  %v11638_v34 = vrot.slane %v8113_v10, 4 }
 0x1b2   : > { %7358 = vmatpush3.msra.mxu0 %v1029_v55  ;;  %4083 = vrot.lane.b32.xlu1 %v4488_v40, %s7633_s26  ;;  %v11644_v3 = vrot.slane %v8156_v7, 4 }
 0x1b3   : > { %7360 = vmatmul.mubr.msk.f32.vlgmr.msra.gmra.mxu0 %vm767_vm3, %v1031_v16  ;;  %7362 = vmatprep.subr.mxu0 %v11616_v39  ;;  %v11640_v16 = vrot.slane %v8124_v24, 4 }
 0x1b4   : > { %7363 = vmatpush3.msra.mxu0 %v8275_v36  ;;  %7364 = vmatprep.mubr.msk.f32.mxu0 %vm7631_vm2, %v11616_v39  ;;  %v1183_v36 = vld [vmem:[%s7770_s13] sm:$0xff]  ;;  %v1851_v38 = vsel %vm1489_vm11, %v11644_v3, %v1836_v46 }
 0x1b5   : > { %7367 = vmatprep.subr.mxu0 %v11616_v39  ;;  %v7510_v46 = vld [vmem:[#allocation2 + $0x18] ss:$40 sps:$4 sm:$0xff]  }
 0x1b6   : > { %2783 = vmatmul.mubr.bf16.gmra.mxu1 %v8341_v12  ;;  %3789 = vrot.lane.b32.xlu1 %v8572_v56, %s7634_s29 }
 0x1b7   : > { %7365 = vmatmul.mubr.msk.f32.vlgmr.msra.gmra.mxu0 %vm767_vm3, %v1030_v45 }
 0x1b8   : > { %7368 = vmatpush3.msra.mxu0 %v8616_v57  ;;  %7369 = vmatprep.mubr.msk.f32.mxu0 %vm7631_vm2, %v11616_v39 }
 0x1b9   : > { %2581 = vmatprep.subr.bf16.mxu0 %v11618_v0  ;;  %v11645_v0 = vld [vmem:[#allocation22_spill] sm:$0xff] }
 0x1ba   : > { %4821 = vrot.lane.b32.xlu1 %v4488_v40, %s7638_s20  ;;  %v11643_v40 = vrot.slane %v8147_v58, 4 }
 0x1bb   : > { %7370 = vmatmul.mubr.msk.f32.vlgmr.msra.gmra.mxu0 %vm767_vm3, %v1183_v36 }
 0x1bc   : > { %2582 = vmatpush1.bf16.msra.mxu0 %v11619_v32  ;;  %7372 = vmatprep.mubr.msk.f32.mxu0 %vm7631_vm2, %v11616_v39  ;;  %v11646_v32 = vrot.slane %v11645_v0, 4 }
 0x1bd   : > { %2583 = vmatprep.subr.bf16.mxu0 %v11620_v5  ;;  %v11648_v5 = vld [vmem:[#allocation23_spill] sm:$0xff] }
 0x1be   : > { %3543 = vrot.lane.b32.xlu1 %v8572_v56, %s7635_s27  ;;  %v11627_v56 = vcombine.low %v8216_v54, %v8224_v6  ;;  %v11630_v54 = vcombine.high %v8272_v20, %v8282_v23  ;;  %v11631_v6 = vrot.slane %v8306_v1, 4  ;;  %v1191_v1 = vld [vmem:[%s7770_s13 + $0x40] sm:$0xff]  ;;  %v1926_v23 = vsel %vm1489_vm11, %v11638_v34, %v11637_v29  ;;  %s7639_s13 = smov 100  }
 0x1bf   : > { %7373 = vmatmul.mubr.msk.f32.gmra.mxu0 %vm767_vm3, %v1184_v42  ;;  %v11639_v20 = vrot.slane %v8326_v13, 4  ;;  %v1927_v53 = vsel %vm1922_vm15, %v8113_v10, %v1926_v23  ;;  %v1744_v42 = vsel %vm1489_vm11, %v11646_v32, %v1732_v14 }
 0x1c0   : > { %2584 = vmatpush1.bf16.msra.mxu0 %v11621_v52  ;;  %7375 = vmatprep.mubr.msk.f32.mxu0 %vm7631_vm2, %v11616_v39  ;;  %v2009_v48 = vsel %vm1489_vm11, %v11632_v47, %v11631_v6  ;;  %v11663_v6 = vld [vmem:[#allocation31_spill] sm:$0xff] }
 0x1c1   : > { %2585 = vmatprep.subr.bf16.mxu0 %v11622_v62  ;;  %v2010_v33 = vsel %vm2005_vm12, %v8064_v30, %v2009_v48  ;;  %v1934_v55 = vsel %vm1489_vm11, %v11640_v16, %v11639_v20  ;;  %v7508_v62 = vld [vmem:[#allocation2 + $0x14] ss:$40 sps:$4 sm:$0xff]  }
 0x1c2   : > { %v7008_v30 = vcombine.high %v2010_v33, %v2018_v4  ;;  %v1935_v13 = vsel %vm1922_vm15, %v8124_v24, %v1934_v55 }
 0x1c3   : > { %7376 = vmatmul.mubr.msk.f32.gmra.mxu0 %vm767_vm3, %v1185_v51  ;;  %v7000_v10 = vcombine.high %v1927_v53, %v1935_v13  ;;  %v6999_v43 = vcombine.low %v1927_v53, %v1935_v13 }
 0x1c4   : > { %2586 = vmatpush1.bf16.msra.mxu0 %v11623_v17  ;;  %7378 = vmatprep.mubr.msk.f32.mxu0 %vm7631_vm2, %v11616_v39  ;;  %v7556_v17 = vld [vmem:[%s7775_s18 + $0x4] ss:$8 sps:$4 sm:$0xff]   ;;  %s7641_s18 = smov 44  }
 0x1c5   : > { %2587 = vmatprep.subr.bf16.mxu0 %v7507_v11  ;;  %v1745_v11 = vsel %vm11319_vm4, %v11645_v0, %v1744_v42  ;;  %v11669_v0 = vld [vmem:[#allocation15_spill] sm:$0xff] }
 0x1c7   : > { %7379 = vmatmul.mubr.msk.f32.gmra.mxu0 %vm767_vm3, %v1186_v35  ;;  %v11651_v35 = vld [vmem:[#allocation25_spill] sm:$0xff] }
 0x1c8   : > { %2588 = vmatpush1.bf16.msra.mxu0 %v7505_v26  ;;  %7381 = vmatprep.mubr.msk.f32.mxu0 %vm7631_vm2, %v11616_v39  ;;  %v11650_v26 = vld [vmem:[#allocation24_spill] sm:$0xff] }
 0x1c9   : > { %2589 = vmatprep.subr.bf16.mxu0 %v11624_v9  ;;  %v11653_v9 = vcombine.low %v11650_v26, %v11651_v35 }
 0x1cb   : > { %7382 = vmatmul.mubr.msk.f32.gmra.mxu0 %vm767_vm3, %v1187_v18  ;;  %v11652_v18 = vcombine.high %v11650_v26, %v11651_v35 }
 0x1cc   : > { %2590 = vmatpush1.bf16.msra.mxu0 %v11625_v19  ;;  %7384 = vmatprep.mubr.msk.f32.mxu0 %vm7631_vm2, %v11616_v39  ;;  %v11654_v19 = vld [vmem:[#allocation26_spill] sm:$0xff] }
 0x1cd   : > { %2591 = vmatprep.subr.bf16.mxu0 %v11626_v44 }
 0x1cf   : > { %7385 = vmatmul.mubr.msk.f32.gmra.mxu0 %vm767_vm3, %v1188_v50  ;;  %v11655_v50 = vld [vmem:[#allocation27_spill] sm:$0xff] }
 0x1d0   : > { %2592 = vmatpush1.bf16.msra.mxu0 %v11627_v56  ;;  %7387 = vmatprep.mubr.msk.f32.mxu0 %vm7631_vm2, %v11616_v39  ;;  %v11656_v44 = vcombine.high %v11654_v19, %v11655_v50  ;;  %v11657_v56 = vcombine.low %v11654_v19, %v11655_v50 }
 0x1d1   : > { %2593 = vmatprep.subr.bf16.mxu0 %v11628_v2  ;;  %v11659_v2 = vld [vmem:[#allocation29_spill] sm:$0xff] }
 0x1d3   : > { %7388 = vmatmul.mubr.msk.f32.gmra.mxu0 %vm767_vm3, %v1189_v60  ;;  %v11658_v60 = vld [vmem:[#allocation28_spill] sm:$0xff] }
 0x1d4   : > { %2594 = vmatpush1.bf16.msra.mxu0 %v11629_v28  ;;  %7390 = vmatprep.mubr.msk.f32.mxu0 %vm7631_vm2, %v11616_v39  ;;  %v11660_v28 = vcombine.high %v11658_v60, %v11659_v2 }
 0x1d5   : > { %2595 = vmatprep.subr.bf16.mxu0 %v11630_v54  ;;  %v11662_v54 = vld [vmem:[#allocation30_spill] sm:$0xff] }
 0x1d6   : > { %v11664_v47 = vcombine.high %v11662_v54, %v11663_v6  ;;  %v11665_v48 = vcombine.low %v11662_v54, %v11663_v6 }
 0x1d7   : > { %7391 = vmatmul.mubr.msk.f32.gmra.mxu0 %vm767_vm3, %v1190_v22  ;;  %v11661_v22 = vcombine.low %v11658_v60, %v11659_v2 }
 0x1d8   : > { %2596 = vmatpush1.bf16.msra.mxu0 %v11635_v21  ;;  %7393 = vmatprep.mubr.msk.f32.mxu0 %vm7631_vm2, %v11616_v39  ;;  %v11642_v39 = vrot.slane %v8331_v31, 4  ;;  %v1852_v31 = vsel %vm1839_vm0, %v8156_v7, %v1851_v38  ;;  %v11649_v7 = vrot.slane %v11648_v5, 4 }
 0x1d9   : > { %2611 = vmatprep.subr.bf16.mxu0 %v11636_v41 }
 0x1da   : > { %v1843_v45 = vsel %vm1489_vm11, %v11643_v40, %v11642_v39  ;;  %v8827_v40 = vpop.permute.xlu0 %4573 }
 0x1db   : > { %7394 = vmatmul.mubr.msk.f32.gmra.mxu0 %vm767_vm3, %v1191_v1  ;;  %v1844_v24 = vsel %vm1839_vm0, %v8147_v58, %v1843_v45  ;;  %v11647_v58 = vrot.slane %v8343_v37, 4  ;;  %v11667_v1 = vld [vmem:[#allocation19_spill] sm:$0xff]  ;;  %vm1330_vm3 = vcmask 814080  }
 0x1dc   : > { %2612 = vmatpush2.bf16.msra.mxu0 %v11641_v49  ;;  %7019 = vmatprep.mubr.msk.bf16.mxu0 %vm2574_vm14, %v8099_v61  ;;  %v7007_v61 = vcombine.low %v2010_v33, %v2018_v4  ;;  %v6992_v36 = vcombine.high %v1844_v24, %v1852_v31  ;;  %v6991_v51 = vcombine.low %v1844_v24, %v1852_v31  ;;  %v11668_v24 = vld [vmem:[#allocation14_spill] sm:$0xff] }
 0x1dd   : > { %2687 = vmatprep.subr.bf16.mxu0 %v7008_v30  ;;  %v1752_v52 = vsel %vm1489_vm11, %v11649_v7, %v11647_v58 }
 0x1de   : > { %v1753_v15 = vsel %vm11319_vm4, %v11648_v5, %v1752_v52 }
 0x1df   : > { %2614 = vmatmul.mubr.bf16.vlgmr.msra.gmra.mxu0 %v8324_v59  ;;  %v6976_v37 = vcombine.high %v1745_v11, %v1753_v15  ;;  %v6975_v14 = vcombine.low %v1745_v11, %v1753_v15 }
 0x1e0   : > { %2688 = vmatpush1.bf16.msra.mxu0 %v7007_v61  ;;  %7020 = vmatprep.mubr.msk.bf16.mxu0 %vm2574_vm14, %v8329_v63 }
 0x1e1   : > { %2689 = vmatprep.subr.bf16.mxu0 %v7000_v10  ;;  %v8829_v10 = vpop.permute.xlu0 %3295 }
 0x1e4   : > { %2690 = vmatpush1.bf16.msra.mxu0 %v6999_v43 }
 0x1e5   : > { %2691 = vmatprep.subr.bf16.mxu0 %v6992_v36 }
 0x1e7   : > { %2624 = vmatmul.mubr.bf16.gmra.mxu0 %v8341_v12 }
 0x1e8   : > { %2692 = vmatpush1.bf16.msra.mxu0 %v6991_v51  ;;  %7023 = vmatprep.mubr.msk.bf16.mxu0 %vm2574_vm14, %v7556_v17 }
 0x1e9   : > { %2693 = vmatprep.subr.bf16.mxu0 %v7510_v46 }
 0x1ec   : > { %2694 = vmatpush1.bf16.msra.mxu0 %v7508_v62 }
 0x1ed   : > { %2695 = vmatprep.subr.bf16.mxu0 %v6976_v37  ;;  %v8839_v37 = vpop.permute.xlu0 %4327 }
 0x1ee   : > { %11670 = vst [vmem:[#allocation22_spill] sm:$0xff] %v8839_v37 }
 0x1f0   : > { %2696 = vmatpush1.bf16.msra.mxu0 %v6975_v14 }
 0x1f1   : > { %2697 = vmatprep.subr.bf16.mxu0 %v11652_v18  ;;  %v8846_v19 = vpop.permute.xlu0 %3049 }
 0x1f2   : > { %11671 = vst [vmem:[#allocation23_spill] sm:$0xff] %v8846_v19 }
 0x1f4   : > { %2698 = vmatpush1.bf16.msra.mxu0 %v11653_v9 }
 0x1f5   : > { %2699 = vmatprep.subr.bf16.mxu0 %v11656_v44  ;;  %v8848_v2 = vpop.permute.xlu0 %4081 }
 0x1f6   : > { %11672 = vst [vmem:[#allocation24_spill] sm:$0xff] %v8848_v2 }
 0x1f8   : > { %2700 = vmatpush1.bf16.msra.mxu0 %v11657_v56 }
 0x1f9   : > { %2701 = vmatprep.subr.bf16.mxu0 %v11660_v28 }
 0x1fc   : > { %2702 = vmatpush1.bf16.msra.mxu0 %v11661_v22 }
 0x1fd   : > { %2717 = vmatprep.subr.bf16.mxu0 %v11664_v47  ;;  %v8850_v47 = vpop.permute.xlu0 %4819 }
 0x1fe   : > { %11673 = vst [vmem:[#allocation25_spill] sm:$0xff] %v8850_v47 }
 0x200   : > { %2718 = vmatpush2.bf16.msra.mxu0 %v11665_v48 }
 0x203   : > { %2720 = vmatmul.mubr.bf16.vlgmr.msra.gmra.mxu0 %v8324_v59 }
 0x204   : > { %7024 = vmatprep.mubr.msk.bf16.mxu0 %vm2574_vm14, %v8329_v63  ;;  %vm1343_vm14 = vcmask 588804  }
 0x205   : > { %vm1344_vm9 = vmor %vm1343_vm14, %vm1342_vm10  ;;  %vm1370_vm10 = vcmask 1043808   ;;  %vm1371_vm14 = vcmask 130052  }
 0x206   : > { %vm1372_vm7 = vmor %vm1371_vm14, %vm1370_vm10  ;;  %vm1421_vm14 = vcmask 1043936  }
 0x207   : > { %v2668_v27 = vpop.f32.mrf.mxu1 }
 0x208   : > { %v2795_v25 = vmul.f32 %v2668_v27, %v11666_v8 }
 0x209   : > { %v2670_v21 = vpop.f32.mrf.mxu1 }
 0x20a   : > { %v2796_v33 = vmul.f32 %v2670_v21, %v11667_v1 }
 0x20b   : > { %2730 = vmatmul.mubr.bf16.gmra.mxu0 %v8341_v12  ;;  %v2672_v4 = vpop.f32.mrf.mxu1 }
 0x20c   : > { %v7290_v41 = vpack.c.bf16 %v2796_v33, %v2795_v25  ;;  %v2803_v29 = vmul.f32 %v2672_v4, %v11666_v8  ;;  %v8854_v4 = vpop.permute.xlu0 %3785 }
 0x20d   : > { %v2674_v34 = vpop.f32.mrf.mxu1  ;;  %11674 = vst [vmem:[#allocation26_spill] sm:$0xff] %v8854_v4 }
 0x20e   : > { %2922 = vst [vmem:[#allocation3 + $0xc] sm:$0xff] %v7290_v41  ;;  %v2804_v23 = vmul.f32 %v2674_v34, %v11667_v1  ;;  %4523 = vrot.lane.b32.xlu0 %v7290_v41, %s7630_s2  ;;  %4769 = vrot.lane.b32.xlu1 %v7290_v41, %s7638_s20 }
 0x20f   : > { %v2678_v59 = vpop.f32.mrf.mxu1 }
 0x210   : > { %v7294_v63 = vpack.c.bf16 %v2804_v23, %v2803_v29  ;;  %v2811_v20 = vmul.f32 %v2678_v59, %v11666_v8 }
 0x211   : > { %v2680_v16 = vpop.f32.mrf.mxu1 }
 0x212   : > { %2926 = vst [vmem:[#allocation3 + $0x34] sm:$0xff] %v7294_v63  ;;  %4277 = vrot.lane.b32.xlu0 %v7290_v41, %s7632_s25  ;;  %v2812_v12 = vmul.f32 %v2680_v16, %v11667_v1  ;;  %4779 = vrot.lane.b32.xlu1 %v7294_v63, %s7638_s20 }
 0x213   : > { %v2682_v55 = vpop.f32.mrf.mxu1 }
 0x214   : > { %v7298_v30 = vpack.c.bf16 %v2812_v12, %v2811_v20  ;;  %v2819_v49 = vmul.f32 %v2682_v55, %v11666_v8  ;;  %v8852_v8 = vpop.permute.xlu1 %4571 }
 0x215   : > { %v2684_v53 = vpop.f32.mrf.mxu1 }
 0x216   : > { %4031 = vrot.lane.b32.xlu0 %v7290_v41, %s7633_s26  ;;  %2930 = vst [vmem:[#allocation3 + $0x5c] sm:$0xff] %v7298_v30  ;;  %v2820_v13 = vmul.f32 %v2684_v53, %v11667_v1 }
 0x218   : > { %v7302_v39 = vpack.c.bf16 %v2820_v13, %v2819_v49  ;;  %v8858_v59 = vpop.permute.xlu1 %3293  ;;  %v8865_v13 = vpop.permute.xlu0 %3539 }
 0x219   : > { %11675 = vst [vmem:[#allocation27_spill] sm:$0xff] %v8865_v13 }
 0x21a   : > { %4533 = vrot.lane.b32.xlu0 %v7294_v63, %s7630_s2  ;;  %2934 = vst [vmem:[#allocation3 + $0x84] sm:$0xff] %v7302_v39 }
 0x21e   : > { %4287 = vrot.lane.b32.xlu0 %v7294_v63, %s7632_s25 }
 0x222   : > { %4041 = vrot.lane.b32.xlu0 %v7294_v63, %s7633_s26 }
 0x226   : > { %4543 = vrot.lane.b32.xlu0 %v7298_v30, %s7630_s2 }
 0x22a   : > { %4297 = vrot.lane.b32.xlu0 %v7298_v30, %s7632_s25 }
 0x22e   : > { %4051 = vrot.lane.b32.xlu0 %v7298_v30, %s7633_s26 }
 0x232   : > { %4789 = vrot.lane.b32.xlu0 %v7298_v30, %s7638_s20 }
 0x236   : > { %4553 = vrot.lane.b32.xlu0 %v7302_v39, %s7630_s2 }
 0x23a   : > { %4307 = vrot.lane.b32.xlu0 %v7302_v39, %s7632_s25 }
 0x23e   : > { %4061 = vrot.lane.b32.xlu0 %v7302_v39, %s7633_s26 }
 0x242   : > { %4799 = vrot.lane.b32.xlu0 %v7302_v39, %s7638_s20 }
 0x26e   : > { %v2774_v45 = vpop.f32.mrf.mxu1 }
 0x26f   : > { %v2799_v31 = vmul.f32 %v2774_v45, %v11668_v24 }
 0x270   : > { %v2776_v38 = vpop.f32.mrf.mxu1 }
 0x271   : > { %v2800_v32 = vmul.f32 %v2776_v38, %v11669_v0  ;;  %v8869_v38 = vpop.permute.xlu1 %4325 }
 0x272   : > { %v2778_v43 = vpop.f32.mrf.mxu1 }
 0x273   : > { %v1101_v3 = vpop.f32.mrf.mxu0  ;;  %v2807_v42 = vmul.f32 %v2778_v43, %v11668_v24  ;;  %v8835_v51 = vpack.c.bf16 %v2800_v32, %v2799_v31 }
 0x274   : > { %v2780_v58 = vpop.f32.mrf.mxu1 }
 0x275   : > { %v7361_v61 = vpop.f32.mrf.mxu0  ;;  %v2808_v7 = vmul.f32 %v2780_v58, %v11669_v0  ;;  %2924 = vst [vmem:[#allocation3 + $0x1c] sm:$0xff] %v8835_v51 }
 0x276   : > { %v2784_v21 = vpop.f32.mrf.mxu1 }
 0x277   : > { %v1174_v36 = vpop.f32.mrf.mxu0  ;;  %v8837_v11 = vpack.c.bf16 %v2808_v7, %v2807_v42  ;;  %v2815_v41 = vmul.f32 %v2784_v21, %v11668_v24  ;;  %v8876_v42 = vpop.permute.xlu1 %3047 }
 0x278   : > { %v1175_v46 = vadd.f32 %v1174_v36, %v1101_v3  ;;  %v2786_v29 = vpop.f32.mrf.mxu1  ;;  %v11677_v36 = vld [vmem:[#allocation20_spill] sm:$0xff] }
 0x279   : > { %v7366_v5 = vpop.f32.mrf.mxu0  ;;  %2928 = vst [vmem:[#allocation3 + $0x44] sm:$0xff] %v8837_v11  ;;  %v2816_v23 = vmul.f32 %v2786_v29, %v11669_v0 }
 0x27a   : > { %vm1178_vm2 = vcmp.ge.f32.partialorder %v1175_v46, 0.0  ;;  %v1179_v52 = vmul.f32 0.1, %v1175_v46  ;;  %v2788_v63 = vpop.f32.mrf.mxu1 }
 0x27b   : > { %v1285_v62 = vpop.f32.mrf.mxu0  ;;  %v8860_v16 = vpack.c.bf16 %v2816_v23, %v2815_v41  ;;  %v2823_v12 = vmul.f32 %v2788_v63, %v11668_v24  ;;  %v11688_v23 = vld [vmem:[#allocation16_spill] sm:$0xff] }
 0x27c   : > { %v1180_v15 = vsel %vm1178_vm2, %v1175_v46, %v1179_v52  ;;  %v1329_v17 = vpack.c.bf16 %v1285_v62, %v1285_v62  ;;  %v2790_v30 = vpop.f32.mrf.mxu1  ;;  %vm1356_vm2 = vcmask 1044032  }
 0x27d   : > { %v1181_v14 = vadd.f32 %v8616_v57, %v1180_v15  ;;  %v7371_v26 = vpop.f32.mrf.mxu0  ;;  %2932 = vst [vmem:[#allocation3 + $0x6c] sm:$0xff] %v8860_v16  ;;  %v2824_v53 = vmul.f32 %v2790_v30, %v11669_v0  ;;  %v11678_v0 = vld [vmem:[#allocation21_spill] sm:$0xff] }
 0x27e   : > { %1331 = vst.msk [vmem:[#allocation3 + $0xa4] sm:$0xf] %vm1330_vm3, %v1329_v17  ;;  %v11690_v30 = vld [vmem:[#allocation17_spill] sm:$0xff]  ;;  %vm1357_vm3 = vcmask 359428  }
 0x27f   : > { %1182 = vst.msk [vmem:[%s7785_s1] sm:$0xff] %vm843_vm1, %v1181_v14  ;;  %v1290_v35 = vpop.f32.mrf.mxu0  ;;  %s7642_s1 = smov 16   ;;  %v8867_v45 = vpack.c.bf16 %v2824_v53, %v2823_v12  ;;  %vm1358_vm4 = vmor %vm1357_vm3, %vm1356_vm2  ;;  %vm1404_vm3 = vcmask 719872  }
 0x280   : > { %v7281_v18 = vpack.c.bf16 %v1290_v35, %v1290_v35  ;;  %v8872_v31 = vpop.permute.xlu0 %4523  ;;  %v8885_v35 = vpop.permute.xlu1 %4079 }
 0x281   : > { %v7374_v9 = vpop.f32.mrf.mxu0  ;;  %2936 = vst [vmem:[#allocation3 + $0x94] sm:$0xff] %v8867_v45  ;;  %11676 = vst [vmem:[#allocation28_spill] sm:$0xff] %v8872_v31 }
 0x282   : > { %1336 = vrot.lane.b32.xlu0 %v7281_v18, %s7639_s13  ;;  %11680 = vst [vmem:[#allocation30_spill] sm:$0xff] %v8885_v35 }
 0x283   : > { %v1295_v50 = vpop.f32.mrf.mxu0 }
 0x284   : > { %v7282_v44 = vpack.c.bf16 %v1295_v50, %v1295_v50  ;;  %v8880_v15 = vpop.permute.xlu0 %4277 }
 0x285   : > { %v7377_v56 = vpop.f32.mrf.mxu0  ;;  %11679 = vst [vmem:[#allocation29_spill] sm:$0xff] %v8880_v15 }
 0x286   : > { %1350 = vrot.lane.b32.xlu1 %v7282_v44, %s7640_s14 }
 0x287   : > { %v1300_v60 = vpop.f32.mrf.mxu0 }
 0x288   : > { %v7283_v57 = vpack.c.bf16 %v1300_v60, %v1300_v60  ;;  %v8892_v60 = vpop.permute.xlu0 %4031 }
 0x289   : > { %v7380_v28 = vpop.f32.mrf.mxu0  ;;  %11681 = vst [vmem:[#allocation31_spill] sm:$0xff] %v8892_v60 }
 0x28a   : > { %1364 = vrot.lane.b32.xlu0 %v7283_v57, %s7641_s18 }
 0x28b   : > { %v1305_v22 = vpop.f32.mrf.mxu0 }
 0x28c   : > { %v7284_v54 = vpack.c.bf16 %v1305_v22, %v1305_v22 }
 0x28d   : > { %v7383_v6 = vpop.f32.mrf.mxu0 }
 0x28e   : > { %1378 = vrot.lane.b32.xlu0 %v7284_v54, %s7642_s1  ;;  %v8898_v6 = vpop.permute.xlu1 %4817 }
 0x28f   : > { %v1310_v48 = vpop.f32.mrf.mxu0  ;;  %11682 = vst [vmem:[#allocation18_spill] sm:$0xff] %v8898_v6 }
 0x290   : > { %v7285_v27 = vpack.c.bf16 %v1310_v48, %v1310_v48 }
 0x291   : > { %v7386_v25 = vpop.f32.mrf.mxu0 }
 0x292   : > { %1387 = vrot.lane.b32.xlu1 %v7285_v27, %s7643_s17  ;;  %v8905_v27 = vpop.permute.xlu0 %4533  ;;  %v8907_v25 = vpop.permute.xlu1 %3787 }
 0x293   : > { %v1315_v1 = vpop.f32.mrf.mxu0  ;;  %11683 = vst [vmem:[#allocation19_spill] sm:$0xff] %v8907_v25 }
 0x294   : > { %v7286_v33 = vpack.c.bf16 %v1315_v1, %v1315_v1 }
 0x295   : > { %v7389_v34 = vpop.f32.mrf.mxu0 }
 0x296   : > { %1401 = vrot.lane.b32.xlu1 %v7286_v33, %s7644_s22  ;;  %v8911_v21 = vpop.permute.xlu0 %4287  ;;  %v8915_v1 = vpop.permute.xlu1 %3297 }
 0x297   : > { %v1320_v20 = vpop.f32.mrf.mxu0  ;;  %11684 = vst [vmem:[#allocation14_spill] sm:$0xff] %v8911_v21  ;;  %11685 = vst [vmem:[#allocation15_spill] sm:$0xff] %v8915_v1 }
 0x298   : > { %v7287_v55 = vpack.c.bf16 %v1320_v20, %v1320_v20 }
 0x299   : > { %v7392_v49 = vpop.f32.mrf.mxu0 }
 0x29a   : > { %1415 = vrot.lane.b32.xlu0 %v7287_v55, %s7645_s28  ;;  %v8919_v33 = vpop.permute.xlu0 %4041  ;;  %v8921_v41 = vpop.permute.xlu1 %3541 }
 0x29b   : > { %v1325_v39 = vpop.f32.mrf.mxu0  ;;  %11686 = vst [vmem:[#allocation20_spill] sm:$0xff] %v8919_v33  ;;  %11687 = vst [vmem:[#allocation21_spill] sm:$0xff] %v8921_v41 }
 0x29c   : > { %v7288_v3 = vpack.c.bf16 %v1325_v39, %v1325_v39 }
 0x29d   : > { %v7395_v61 = vpop.f32.mrf.mxu0 }
 0x29e   : > { %1429 = vrot.lane.b32.xlu1 %v7288_v3, %s7646_s19  ;;  %v8926_v20 = vpop.permute.xlu0 %4543  ;;  %v8928_v55 = vpop.permute.xlu1 %3051 }
 0x29f   : > { %v2615_v24 = vpop.f32.mrf.mxu0  ;;  %11689 = vst [vmem:[#allocation16_spill] sm:$0xff] %v8928_v55 }
 0x2a0   : > { %v2793_v46 = vmul.f32 %v2615_v24, %v11677_v36 }
 0x2a1   : > { %v2617_v43 = vpop.f32.mrf.mxu0 }
 0x2a2   : > { %v2794_v32 = vmul.f32 %v2617_v43, %v11678_v0 }
 0x2a3   : > { %v2619_v58 = vpop.f32.mrf.mxu0 }
 0x2a4   : > { %v7289_v5 = vpack.c.bf16 %v2794_v32, %v2793_v46  ;;  %v2801_v52 = vmul.f32 %v2619_v58, %v11677_v36 }
 0x2a5   : > { %v2621_v7 = vpop.f32.mrf.mxu0 }
 0x2a6   : > { %2921 = vst [vmem:[#allocation3 + $0x4] sm:$0xff] %v7289_v5  ;;  %v2802_v62 = vmul.f32 %v2621_v7, %v11678_v0 }
 0x2a7   : > { %v2625_v17 = vpop.f32.mrf.mxu0 }
 0x2a8   : > { %v8882_v14 = vpack.c.bf16 %v2802_v62, %v2801_v52  ;;  %v2809_v26 = vmul.f32 %v2625_v17, %v11677_v36 }
 0x2a9   : > { %v2627_v18 = vpop.f32.mrf.mxu0 }
 0x2aa   : > { %2925 = vst [vmem:[#allocation3 + $0x2c] sm:$0xff] %v8882_v14  ;;  %v2810_v9 = vmul.f32 %v2627_v18, %v11678_v0 }
 0x2ab   : > { %v2629_v50 = vpop.f32.mrf.mxu0 }
 0x2ac   : > { %v8889_v44 = vpack.c.bf16 %v2810_v9, %v2809_v26  ;;  %v2817_v56 = vmul.f32 %v2629_v50, %v11677_v36  ;;  %v8940_v36 = vpop.permute.xlu0 %4297 }
 0x2ad   : > { %v2631_v57 = vpop.f32.mrf.mxu0  ;;  %v3430_v28 = vld [vmem:[#allocation3 + $0x8] sm:$0xff]  ;;  %v3429_v22 = vld [vmem:[#allocation3] sm:$0xff]  ;;  %11691 = vst [vmem:[#allocation17_spill] sm:$0xff] %v8940_v36 }
 0x2ae   : > { %2929 = vst [vmem:[#allocation3 + $0x54] sm:$0xff] %v8889_v44  ;;  %v2818_v54 = vmul.f32 %v2631_v57, %v11678_v0  ;;  %3491 = vrot.lane.b32.xlu0 %v3430_v28, %s7635_s27  ;;  %3489 = vrot.lane.b32.xlu1 %v3429_v22, %s7635_s27  ;;  %v8942_v0 = vpop.permute.xlu1 %4575 }
 0x2af   : > { %11692 = vst [vmem:[#allocation32_spill] sm:$0xff] %v8942_v0 }
 0x2b0   : > { %v8900_v48 = vpack.c.bf16 %v2818_v54, %v2817_v56  ;;  %v8958_v18 = vpop.permute.xlu0 %4051 }
 0x2b1   : > { %v3435_v29 = vld [vmem:[#allocation3 + $0x30] sm:$0xff]  ;;  %v3434_v24 = vld [vmem:[#allocation3 + $0x28] sm:$0xff] }
 0x2b2   : > { %2933 = vst [vmem:[#allocation3 + $0x7c] sm:$0xff] %v8900_v48  ;;  %4521 = vrot.lane.b32.xlu1 %v7289_v5, %s7630_s2  ;;  %3245 = vrot.lane.b32.xlu0 %v3430_v28, %s7636_s23  ;;  %v8956_v26 = vpop.permute.xlu1 %4329 }
 0x2b3   : > { %11693 = vst [vmem:[#allocation33_spill] sm:$0xff] %v8956_v26 }
 0x2b5   : > { %v8966_v57 = vld [vmem:[#allocation3 + $0x58] sm:$0xff] }
 0x2b6   : > { %3243 = vrot.lane.b32.xlu1 %v3429_v22, %s7636_s23  ;;  %2999 = vrot.lane.b32.xlu0 %v3430_v28, %s7637_s16 }
 0x2ba   : > { %4275 = vrot.lane.b32.xlu1 %v7289_v5, %s7632_s25  ;;  %4767 = vrot.lane.b32.xlu0 %v7289_v5, %s7638_s20 }
 0x2be   : > { %3735 = vrot.lane.b32.xlu0 %v3429_v22, %s7634_s29  ;;  %2997 = vrot.lane.b32.xlu1 %v3429_v22, %s7637_s16  ;;  %v8975_v22 = vpop.permute.xlu0 %4789 }
 0x2bf   : > { %11695 = vst [vmem:[#allocation35_spill] sm:$0xff] %v8975_v22 }
 0x2c2   : > { %4029 = vrot.lane.b32.xlu1 %v7289_v5, %s7633_s26  ;;  %3501 = vrot.lane.b32.xlu0 %v3435_v29, %s7635_s27 }
 0x2c3   : > { %v2721_v34 = vpop.f32.mrf.mxu0 }
 0x2c4   : > { %v2797_v63 = vmul.f32 %v2721_v34, %v11688_v23  ;;  %v8982_v34 = vpop.permute.xlu0 %4553 }
 0x2c5   : > { %v2723_v12 = vpop.f32.mrf.mxu0 }
 0x2c6   : > { %v2798_v49 = vmul.f32 %v2723_v12, %v11690_v30  ;;  %3737 = vrot.lane.b32.xlu1 %v3430_v28, %s7634_s29  ;;  %3255 = vrot.lane.b32.xlu0 %v3435_v29, %s7636_s23  ;;  %v8969_v28 = vpop.permute.xlu1 %4083 }
 0x2c7   : > { %v2725_v53 = vpop.f32.mrf.mxu0  ;;  %11694 = vst [vmem:[#allocation34_spill] sm:$0xff] %v8969_v28 }
 0x2c8   : > { %v8933_v39 = vpack.c.bf16 %v2798_v49, %v2797_v63  ;;  %v2805_v3 = vmul.f32 %v2725_v53, %v11688_v23  ;;  %v8992_v12 = vpop.permute.xlu0 %4307 }
 0x2c9   : > { %v2727_v61 = vpop.f32.mrf.mxu0  ;;  %11698 = vst [vmem:[#allocation38_spill] sm:$0xff] %v8992_v12 }
 0x2ca   : > { %2923 = vst [vmem:[#allocation3 + $0x14] sm:$0xff] %v8933_v39  ;;  %v2806_v43 = vmul.f32 %v2727_v61, %v11690_v30  ;;  %3499 = vrot.lane.b32.xlu1 %v3434_v24, %s7635_s27  ;;  %3009 = vrot.lane.b32.xlu0 %v3435_v29, %s7637_s16  ;;  %v8980_v54 = vpop.permute.xlu1 %3789 }
 0x2cb   : > { %v2731_v46 = vpop.f32.mrf.mxu0  ;;  %11696 = vst [vmem:[#allocation36_spill] sm:$0xff] %v8980_v54 }
 0x2cc   : > { %v8944_v32 = vpack.c.bf16 %v2806_v43, %v2805_v3  ;;  %v2813_v58 = vmul.f32 %v2731_v46, %v11688_v23  ;;  %v9001_v49 = vpop.permute.xlu0 %4061  ;;  %v9014_v3 = vld [vmem:[#allocation3 + $0x78] sm:$0xff] }
 0x2cd   : > { %v2733_v5 = vpop.f32.mrf.mxu0 }
 0x2ce   : > { %2927 = vst [vmem:[#allocation3 + $0x3c] sm:$0xff] %v8944_v32  ;;  %v2814_v7 = vmul.f32 %v2733_v5, %v11690_v30  ;;  %4531 = vrot.lane.b32.xlu1 %v8882_v14, %s7630_s2  ;;  %4777 = vrot.lane.b32.xlu0 %v8882_v14, %s7638_s20  ;;  %v8988_v63 = vpop.permute.xlu1 %4821 }
 0x2cf   : > { %v2735_v52 = vpop.f32.mrf.mxu0  ;;  %11697 = vst [vmem:[#allocation37_spill] sm:$0xff] %v8988_v63 }
 0x2d0   : > { %v8953_v62 = vpack.c.bf16 %v2814_v7, %v2813_v58  ;;  %v2821_v17 = vmul.f32 %v2735_v52, %v11688_v23  ;;  %v3685_v23 = vld [vmem:[#allocation3 + $0x50] sm:$0xff]  ;;  %v9012_v53 = vpop.permute.xlu0 %4799 }
 0x2d1   : > { %v2737_v9 = vpop.f32.mrf.mxu0  ;;  %11701 = vst [vmem:[#allocation41_spill] sm:$0xff] %v9012_v53  ;;  %v3431_v46 = vld [vmem:[#allocation3 + $0x10] sm:$0xff]  ;;  %v9123_v28 = vld [vmem:[#allocation3 + $0x18] sm:$0xff] }
 0x2d2   : > { %2931 = vst [vmem:[#allocation3 + $0x64] sm:$0xff] %v8953_v62  ;;  %v2822_v50 = vmul.f32 %v2737_v9, %v11690_v30  ;;  %3253 = vrot.lane.b32.xlu1 %v3434_v24, %s7636_s23  ;;  %3745 = vrot.lane.b32.xlu0 %v3434_v24, %s7634_s29  ;;  %v8994_v30 = vld [vmem:[#allocation3 + $0x80] sm:$0xff] }
 0x2d4   : > { %v8964_v56 = vpack.c.bf16 %v2822_v50, %v2821_v17 }
 0x2d5   : > { %v9262_v60 = vld [vmem:[#allocation3 + $0x40] sm:$0xff] }
 0x2d6   : > { %2935 = vst [vmem:[#allocation3 + $0x8c] sm:$0xff] %v8964_v56  ;;  %4285 = vrot.lane.b32.xlu1 %v8882_v14, %s7632_s25  ;;  %3511 = vrot.lane.b32.xlu0 %v8966_v57, %s7635_s27 }
 0x2da   : > { %3007 = vrot.lane.b32.xlu1 %v3434_v24, %s7637_s16  ;;  %3265 = vrot.lane.b32.xlu0 %v8966_v57, %s7636_s23 }
 0x2dd   : > { %v3446_v41 = vld [vmem:[#allocation3 + $0x88] sm:$0xff] }
 0x2de   : > { %4039 = vrot.lane.b32.xlu1 %v8882_v14, %s7633_s26  ;;  %3019 = vrot.lane.b32.xlu0 %v8966_v57, %s7637_s16  ;;  %v8999_v14 = vpop.permute.xlu1 %3543 }
 0x2df   : > { %11699 = vst [vmem:[#allocation39_spill] sm:$0xff] %v8999_v14 }
 0x2e2   : > { %3747 = vrot.lane.b32.xlu1 %v3435_v29, %s7634_s29  ;;  %3755 = vrot.lane.b32.xlu0 %v3685_v23, %s7634_s29  ;;  %v9007_v29 = vpop.permute.xlu1 %4769 }
 0x2e3   : > { %11700 = vst [vmem:[#allocation40_spill] sm:$0xff] %v9007_v29 }
 0x2e6   : > { %3509 = vrot.lane.b32.xlu1 %v3685_v23, %s7635_s27  ;;  %3521 = vrot.lane.b32.xlu0 %v8994_v30, %s7635_s27  ;;  %v9020_v61 = vpop.permute.xlu1 %4779 }
 0x2e7   : > { %11702 = vst [vmem:[#allocation42_spill] sm:$0xff] %v9020_v61 }
 0x2ea   : > { %4541 = vrot.lane.b32.xlu1 %v8889_v44, %s7630_s2  ;;  %3275 = vrot.lane.b32.xlu0 %v8994_v30, %s7636_s23 }
 0x2ee   : > { %3263 = vrot.lane.b32.xlu1 %v3685_v23, %s7636_s23  ;;  %3029 = vrot.lane.b32.xlu0 %v8994_v30, %s7637_s16 }
 0x2f2   : > { %4295 = vrot.lane.b32.xlu1 %v8889_v44, %s7632_s25  ;;  %3765 = vrot.lane.b32.xlu0 %v9014_v3, %s7634_s29 }
 0x2f4   : > { %v1337_v24 = vpop.permute.xlu0 %1336 }
 0x2f5   : > { %v1338_v43 = vrot.slane %v1337_v24, 4 }
 0x2f6   : > { %3017 = vrot.lane.b32.xlu1 %v3685_v23, %s7637_s16  ;;  %3493 = vrot.lane.b32.xlu0 %v3431_v46, %s7635_s27 }
 0x2f7   : > { %v1340_v58 = vsel %vm843_vm1, %v1338_v43, %v1337_v24  ;;  %vm1381_vm1 = vcmask 945280  }
 0x2f8   : > { %1345 = vst.msk [vmem:[#allocation3 + $0xa4] sm:$0xff] %vm1344_vm9, %v1340_v58  ;;  %v1351_v5 = vpop.permute.xlu1 %1350  ;;  %vm1390_vm9 = vcmask 949248  }
 0x2f9   : > { %v1352_v7 = vrot.slane %v1351_v5, 4 }
 0x2fa   : > { %4049 = vrot.lane.b32.xlu1 %v8889_v44, %s7633_s26  ;;  %3247 = vrot.lane.b32.xlu0 %v3431_v46, %s7636_s23 }
 0x2fb   : > { %v1354_v52 = vsel %vm953_vm13, %v1352_v7, %v1351_v5  ;;  %vm1393_vm13 = vcmask 1044384  }
 0x2fc   : > { %1359 = vst.msk [vmem:[#allocation3 + $0xa8] sm:$0xff] %vm1358_vm4, %v1354_v52  ;;  %v1365_v17 = vpop.permute.xlu0 %1364  ;;  %vm1394_vm4 = vcmask 719876  }
 0x2fd   : > { %v1366_v9 = vrot.slane %v1365_v17, 4  ;;  %vm1395_vm2 = vmor %vm1394_vm4, %vm1393_vm13  ;;  %vm1418_vm13 = vcmask 490496  }
 0x2fe   : > { %4787 = vrot.lane.b32.xlu1 %v8889_v44, %s7638_s20  ;;  %3001 = vrot.lane.b32.xlu0 %v3431_v46, %s7637_s16 }
 0x2ff   : > { %v1368_v50 = vsel %vm1367_vm8, %v1366_v9, %v1365_v17  ;;  %vm1408_vm8 = vcmask 490500  }
 0x300   : > { %1373 = vst.msk [vmem:[#allocation3 + $0xac] sm:$0xff] %vm1372_vm7, %v1368_v50  ;;  %v1379_v23 = vpop.permute.xlu0 %1378  ;;  %vm1407_vm7 = vcmask 1044160  }
 0x301   : > { %1382 = vst.msk [vmem:[#allocation3 + $0xb0] sm:$0xf] %vm1381_vm1, %v1379_v23  ;;  %vm1409_vm10 = vmor %vm1408_vm8, %vm1407_vm7  ;;  %vm1422_vm1 = vcmask 261124   ;;  %vm1432_vm7 = vcmask 261120  }
 0x302   : > { %3757 = vrot.lane.b32.xlu1 %v8966_v57, %s7634_s29  ;;  %4525 = vrot.lane.b32.xlu0 %v8933_v39, %s7630_s2  ;;  %vm1423_vm4 = vmor %vm1422_vm1, %vm1421_vm14 }
 0x303   : > { %v9205_v35 = vld [vmem:[#allocation3 + $0xa4] sm:$0xff] }
 0x304   : > { %v1388_v24 = vpop.permute.xlu1 %1387 }
 0x305   : > { %v1389_v43 = vrot.slane %v1388_v24, 4 }
 0x306   : > { %3519 = vrot.lane.b32.xlu1 %v9014_v3, %s7635_s27  ;;  %4033 = vrot.lane.b32.xlu0 %v8933_v39, %s7633_s26 }
 0x307   : > { %v1391_v44 = vsel %vm1390_vm9, %v1389_v43, %v1388_v24  ;;  %vm1435_vm9 = vcmask 1043712   ;;  %v3441_v24 = vld [vmem:[#allocation3 + $0x60] sm:$0xff]  ;;  %v9162_v26 = vld [vmem:[#allocation3 + $0xa8] sm:$0xff] }
 0x308   : > { %1396 = vst.msk [vmem:[#allocation3 + $0xb0] sm:$0xff] %vm1395_vm2, %v1391_v44  ;;  %v1402_v57 = vpop.permute.xlu1 %1401  ;;  %vm1436_vm2 = vcmask 31748   ;;  %v3436_v44 = vld [vmem:[#allocation3 + $0x38] sm:$0xff] }
 0x309   : > { %v1403_v58 = vrot.slane %v1402_v57, 4  ;;  %vm1437_vm8 = vmor %vm1436_vm2, %vm1435_vm9  ;;  %vm11838_vm2 = vcmask 957440  }
 0x30a   : > { %4551 = vrot.lane.b32.xlu1 %v8900_v48, %s7630_s2  ;;  %4279 = vrot.lane.b32.xlu0 %v8933_v39, %s7632_s25 }
 0x30b   : > { %v1405_v5 = vsel %vm1404_vm3, %v1403_v58, %v1402_v57  ;;  %vm6272_vm3 = vcmask 392192  }
 0x30c   : > { %1410 = vst.msk [vmem:[#allocation3 + $0xb4] sm:$0xff] %vm1409_vm10, %v1405_v5  ;;  %v1416_v7 = vpop.permute.xlu0 %1415  ;;  %vm11779_vm10 = vcmask 89088  }
 0x30d   : > { %v1417_v52 = vrot.slane %v1416_v7, 4  ;;  %vm11787_vm14 = vmmov %vm11779_vm10 }
 0x30e   : > { %3273 = vrot.lane.b32.xlu1 %v9014_v3, %s7636_s23  ;;  %3739 = vrot.lane.b32.xlu0 %v3431_v46, %s7634_s29  ;;  %vm11798_vm1 = vmmov %vm11779_vm10 }
 0x30f   : > { %v1419_v17 = vsel %vm1418_vm13, %v1417_v52, %v1416_v7  ;;  %v4482_v61 = vld [vmem:[#allocation3 + $0xac] sm:$0xff]  ;;  %vm11804_vm13 = vmmov %vm11798_vm1 }
 0x310   : > { %1424 = vst.msk [vmem:[#allocation3 + $0xb8] sm:$0xff] %vm1423_vm4, %v1419_v17  ;;  %v1430_v9 = vpop.permute.xlu1 %1429  ;;  %vm11810_vm4 = vmmov %vm11798_vm1 }
 0x311   : > { %v1431_v50 = vrot.slane %v1430_v9, 4  ;;  %vm11815_vm9 = vmmov %vm11798_vm1 }
 0x312   : > { %4305 = vrot.lane.b32.xlu1 %v8900_v48, %s7632_s25  ;;  %4771 = vrot.lane.b32.xlu0 %v8933_v39, %s7638_s20 }
 0x313   : > { %v1433_v23 = vsel %vm1432_vm7, %v1431_v50, %v1430_v9  ;;  %v9100_v9 = vld [vmem:[#allocation3 + $0x68] sm:$0xff]  ;;  %vm11844_vm7 = vmmov %vm11838_vm2 }
 0x314   : > { %1438 = vst.msk [vmem:[#allocation3 + $0xbc] sm:$0xff] %vm1437_vm8, %v1433_v23  ;;  %vm11845_vm8 = vmmov %vm11838_vm2 }
 0x316   : > { %3027 = vrot.lane.b32.xlu1 %v9014_v3, %s7637_s16  ;;  %3513 = vrot.lane.b32.xlu0 %v3441_v24, %s7635_s27 }
 0x31a   : > { %4059 = vrot.lane.b32.xlu1 %v8900_v48, %s7633_s26  ;;  %3267 = vrot.lane.b32.xlu0 %v3441_v24, %s7636_s23 }
 0x31e   : > { %4797 = vrot.lane.b32.xlu1 %v8900_v48, %s7638_s20  ;;  %3021 = vrot.lane.b32.xlu0 %v3441_v24, %s7637_s16 }
 0x320   : > { %v9060_v46 = vpop.permute.xlu0 %3491  ;;  %v9062_v39 = vpop.permute.xlu1 %3489 }
 0x321   : > { %11703 = vst [vmem:[#allocation43_spill] sm:$0xff] %v9060_v46  ;;  %v11729_v12 = vrot.slane %v9060_v46, 4 }
 0x322   : > { %3767 = vrot.lane.b32.xlu1 %v8994_v30, %s7634_s29  ;;  %4545 = vrot.lane.b32.xlu0 %v8953_v62, %s7630_s2 }
 0x324   : > { %v9068_v3 = vpop.permute.xlu1 %4521  ;;  %v9070_v43 = vpop.permute.xlu0 %3245 }
 0x325   : > { %11704 = vst [vmem:[#allocation44_spill] sm:$0xff] %v9070_v43 }
 0x326   : > { %3503 = vrot.lane.b32.xlu1 %v3436_v44, %s7635_s27  ;;  %4299 = vrot.lane.b32.xlu0 %v8953_v62, %s7632_s25 }
 0x328   : > { %v9075_v48 = vpop.permute.xlu1 %3243  ;;  %v9077_v57 = vpop.permute.xlu0 %2999 }
 0x32a   : > { %3257 = vrot.lane.b32.xlu1 %v3436_v44, %s7636_s23  ;;  %4053 = vrot.lane.b32.xlu0 %v8953_v62, %s7633_s26 }
 0x32c   : > { %v9082_v30 = vpop.permute.xlu1 %4275  ;;  %v9084_v58 = vpop.permute.xlu0 %4767 }
 0x32d   : > { %11705 = vst [vmem:[#allocation45_spill] sm:$0xff] %v9082_v30  ;;  %11706 = vst [vmem:[#allocation46_spill] sm:$0xff] %v9084_v58 }
 0x32e   : > { %3011 = vrot.lane.b32.xlu1 %v3436_v44, %s7637_s16  ;;  %3759 = vrot.lane.b32.xlu0 %v3441_v24, %s7634_s29  ;;  %v3695_v24 = vld [vmem:[#allocation3 + $0xa0] sm:$0xff] }
 0x330   : > { %v9088_v5 = vpop.permute.xlu0 %3735  ;;  %v9090_v7 = vpop.permute.xlu1 %2997 }
 0x331   : > { %11707 = vst [vmem:[#allocation47_spill] sm:$0xff] %v9088_v5 }
 0x332   : > { %4535 = vrot.lane.b32.xlu1 %v8944_v32, %s7630_s2  ;;  %4791 = vrot.lane.b32.xlu0 %v8953_v62, %s7638_s20 }
 0x334   : > { %v9096_v52 = vpop.permute.xlu1 %4029  ;;  %v9098_v17 = vpop.permute.xlu0 %3501 }
 0x335   : > { %11708 = vst [vmem:[#allocation48_spill] sm:$0xff] %v9096_v52  ;;  %11709 = vst [vmem:[#allocation49_spill] sm:$0xff] %v9098_v17 }
 0x336   : > { %4043 = vrot.lane.b32.xlu1 %v8944_v32, %s7633_s26  ;;  %3515 = vrot.lane.b32.xlu0 %v9100_v9, %s7635_s27 }
 0x338   : > { %v9106_v50 = vpop.permute.xlu1 %3737  ;;  %v9108_v23 = vpop.permute.xlu0 %3255 }
 0x339   : > { %11710 = vst [vmem:[#allocation50_spill] sm:$0xff] %v9106_v50  ;;  %11711 = vst [vmem:[#allocation51_spill] sm:$0xff] %v9108_v23 }
 0x33a   : > { %4289 = vrot.lane.b32.xlu1 %v8944_v32, %s7632_s25  ;;  %3775 = vrot.lane.b32.xlu0 %v3695_v24, %s7634_s29 }
 0x33c   : > { %v9113_v62 = vpop.permute.xlu1 %3499  ;;  %v9115_v14 = vpop.permute.xlu0 %3009 }
 0x33d   : > { %v3554_v15 = vrot.slane %v9113_v62, 4 }
 0x33e   : > { %3749 = vrot.lane.b32.xlu1 %v3436_v44, %s7634_s29  ;;  %3529 = vrot.lane.b32.xlu0 %v3695_v24, %s7635_s27 }
 0x340   : > { %v9119_v54 = vpop.permute.xlu1 %4531  ;;  %v9121_v63 = vpop.permute.xlu0 %4777 }
 0x341   : > { %11712 = vst [vmem:[#allocation52_spill] sm:$0xff] %v9121_v63 }
 0x342   : > { %4781 = vrot.lane.b32.xlu1 %v8944_v32, %s7638_s20  ;;  %3495 = vrot.lane.b32.xlu0 %v9123_v28, %s7635_s27 }
 0x344   : > { %v9129_v5 = vpop.permute.xlu1 %3253  ;;  %v9131_v50 = vpop.permute.xlu0 %3745 }
 0x345   : > { %11713 = vst [vmem:[#allocation53_spill] sm:$0xff] %v9131_v50 }
 0x346   : > { %4547 = vrot.lane.b32.xlu0 %v8860_v16, %s7630_s2  ;;  %3523 = vrot.lane.b32.xlu1 %v3446_v41, %s7635_s27 }
 0x348   : > { %v9136_v44 = vpop.permute.xlu1 %4285  ;;  %v9138_v13 = vpop.permute.xlu0 %3511 }
 0x349   : > { %11714 = vst [vmem:[#allocation54_spill] sm:$0xff] %v9136_v44  ;;  %v11366_v44 = vrot.slane %v9098_v17, 4  ;;  %v11367_v36 = vrot.slane %v9138_v13, 4 }
 0x34a   : > { %4527 = vrot.lane.b32.xlu0 %v8835_v51, %s7630_s2  ;;  %3277 = vrot.lane.b32.xlu1 %v3446_v41, %s7636_s23 }
 0x34c   : > { %v9143_v32 = vpop.permute.xlu1 %3007  ;;  %v9145_v55 = vpop.permute.xlu0 %3265 }
 0x34d   : > { %11715 = vst [vmem:[#allocation55_spill] sm:$0xff] %v9145_v55 }
 0x34e   : > { %3269 = vrot.lane.b32.xlu0 %v9100_v9, %s7636_s23  ;;  %3031 = vrot.lane.b32.xlu1 %v3446_v41, %s7637_s16 }
 0x350   : > { %v9150_v50 = vpop.permute.xlu1 %4039  ;;  %v9152_v25 = vpop.permute.xlu0 %3019 }
 0x351   : > { %11716 = vst [vmem:[#allocation56_spill] sm:$0xff] %v9150_v50 }
 0x352   : > { %3249 = vrot.lane.b32.xlu0 %v9123_v28, %s7636_s23  ;;  %4555 = vrot.lane.b32.xlu1 %v8964_v56, %s7630_s2 }
 0x354   : > { %v9158_v4 = vpop.permute.xlu1 %3747  ;;  %v9160_v29 = vpop.permute.xlu0 %3755 }
 0x355   : > { %11717 = vst [vmem:[#allocation57_spill] sm:$0xff] %v9158_v4  ;;  %11718 = vst [vmem:[#allocation58_spill] sm:$0xff] %v9160_v29 }
 0x356   : > { %3285 = vrot.lane.b32.xlu0 %v9162_v26, %s7636_s23  ;;  %4309 = vrot.lane.b32.xlu1 %v8964_v56, %s7632_s25 }
 0x358   : > { %v3510_v1 = vpop.permute.xlu1 %3509  ;;  %v9168_v58 = vpop.permute.xlu0 %3521 }
 0x359   : > { %v3559_v30 = vrot.slane %v3510_v1, 4  ;;  %v11375_v52 = vrot.slane %v9168_v58, 4 }
 0x35a   : > { %3039 = vrot.lane.b32.xlu0 %v9162_v26, %s7637_s16  ;;  %4063 = vrot.lane.b32.xlu1 %v8964_v56, %s7633_s26 }
 0x35c   : > { %v9174_v4 = vpop.permute.xlu1 %4541  ;;  %v9176_v29 = vpop.permute.xlu0 %3275 }
 0x35e   : > { %4563 = vrot.lane.b32.xlu0 %v4482_v61, %s7630_s2  ;;  %3769 = vrot.lane.b32.xlu1 %v3446_v41, %s7634_s29 }
 0x360   : > { %v9180_v0 = vpop.permute.xlu1 %3263  ;;  %v9182_v63 = vpop.permute.xlu0 %3029 }
 0x362   : > { %4301 = vrot.lane.b32.xlu0 %v8860_v16, %s7632_s25  ;;  %4801 = vrot.lane.b32.xlu1 %v8964_v56, %s7638_s20 }
 0x364   : > { %v9188_v22 = vpop.permute.xlu1 %4295  ;;  %v9190_v53 = vpop.permute.xlu0 %3765 }
 0x365   : > { %11719 = vst [vmem:[#allocation59_spill] sm:$0xff] %v9188_v22  ;;  %11720 = vst [vmem:[#allocation60_spill] sm:$0xff] %v9190_v53  ;;  %v3595_v22 = vsel %vm1489_vm11, %v3559_v30, %v11367_v36 }
 0x366   : > { %4281 = vrot.lane.b32.xlu0 %v8835_v51, %s7632_s25  ;;  %3283 = vrot.lane.b32.xlu1 %v3695_v24, %s7636_s23 }
 0x368   : > { %v9195_v41 = vpop.permute.xlu1 %3017  ;;  %v9197_v6 = vpop.permute.xlu0 %3493 }
 0x369   : > { %11721 = vst [vmem:[#allocation61_spill] sm:$0xff] %v9197_v6  ;;  %v9215_v6 = vld [vmem:[#allocation3 + $0x90] sm:$0xff] }
 0x36a   : > { %4317 = vrot.lane.b32.xlu0 %v4482_v61, %s7632_s25  ;;  %3037 = vrot.lane.b32.xlu1 %v3695_v24, %s7637_s16  ;;  %v9221_v24 = vld [vmem:[#allocation3 + $0xe4] sm:$0xff] }
 0x36c   : > { %v9201_v47 = vpop.permute.xlu1 %4049  ;;  %v9203_v56 = vpop.permute.xlu0 %3247 }
 0x36d   : > { %11722 = vst [vmem:[#allocation62_spill] sm:$0xff] %v9201_v47  ;;  %11723 = vst [vmem:[#allocation63_spill] sm:$0xff] %v9203_v56 }
 0x36e   : > { %3023 = vrot.lane.b32.xlu0 %v9100_v9, %s7637_s16  ;;  %4561 = vrot.lane.b32.xlu1 %v9205_v35, %s7630_s2 }
 0x370   : > { %v9211_v53 = vpop.permute.xlu1 %4787  ;;  %v9213_v2 = vpop.permute.xlu0 %3001 }
 0x371   : > { %11724 = vst [vmem:[#allocation64_spill] sm:$0xff] %v9211_v53  ;;  %11725 = vst [vmem:[#allocation65_spill] sm:$0xff] %v9213_v2  ;;  %v3549_v53 = vrot.slane %v9062_v39, 4 }
 0x372   : > { %3003 = vrot.lane.b32.xlu0 %v9123_v28, %s7637_s16  ;;  %3525 = vrot.lane.b32.xlu1 %v9215_v6, %s7635_s27 }
 0x374   : > { %v9223_v56 = vpop.permute.xlu1 %3757  ;;  %v9225_v47 = vpop.permute.xlu0 %4525 }
 0x375   : > { %11726 = vst [vmem:[#allocation66_spill] sm:$0xff] %v9223_v56  ;;  %11727 = vst [vmem:[#allocation67_spill] sm:$0xff] %v9225_v47  ;;  %v3587_v47 = vsel %vm1489_vm11, %v3554_v15, %v11366_v44  ;;  %v3596_v44 = vsel %vm1657_vm5, %v3510_v1, %v3595_v22 }
 0x376   : > { %4071 = vrot.lane.b32.xlu0 %v4482_v61, %s7633_s26  ;;  %4577 = vrot.lane.b32.xlu1 %v9221_v24, %s7630_s2  ;;  %v3588_v30 = vsel %vm1657_vm5, %v9113_v62, %v3587_v47 }
 0x378   : > { %v3520_v21 = vpop.permute.xlu1 %3519  ;;  %v9235_v56 = vpop.permute.xlu0 %4033 }
 0x379   : > { %11728 = vst [vmem:[#allocation68_spill] sm:$0xff] %v9235_v56  ;;  %v3564_v2 = vrot.slane %v3520_v21, 4  ;;  %v3579_v56 = vsel %vm1489_vm11, %v3549_v53, %v11729_v12 }
 0x37a   : > { %4055 = vrot.lane.b32.xlu0 %v8860_v16, %s7633_s26  ;;  %4315 = vrot.lane.b32.xlu1 %v9205_v35, %s7632_s25  ;;  %v3580_v12 = vsel %vm1657_vm5, %v9062_v39, %v3579_v56  ;;  %v7524_v56 = vld [vmem:[%s7780_s0 + $0xc] ss:$16 sps:$4 sm:$0xff]  }
 0x37b   : > { %v3603_v15 = vsel %vm1489_vm11, %v3564_v2, %v11375_v52  ;;  %v7096_v2 = vcombine.high %v3580_v12, %v3588_v30  ;;  %v7095_v1 = vcombine.low %v3580_v12, %v3588_v30  ;;  %7263 = vmatprep.mubr.msk.bf16.mxu1 %vm6272_vm3, %v7524_v56  ;;  %v4483_v56 = vld [vmem:[#allocation3 + $0xb4] sm:$0xff] }
 0x37c   : > { %v3604_v36 = vsel %vm1657_vm5, %v3520_v21, %v3603_v15  ;;  %v9258_v17 = vpop.permute.xlu1 %4551  ;;  %v9260_v50 = vpop.permute.xlu0 %4279 }
 0x37d   : > { %11730 = vst [vmem:[#allocation69_spill] sm:$0xff] %v9260_v50  ;;  %v7103_v33 = vcombine.low %v3596_v44, %v3604_v36  ;;  %v7104_v46 = vcombine.high %v3596_v44, %v3604_v36 }
 0x37e   : > { %4809 = vrot.lane.b32.xlu0 %v4482_v61, %s7638_s20  ;;  %3505 = vrot.lane.b32.xlu1 %v9262_v60, %s7635_s27 }
 0x37f   : > { %6276 = vmatprep.subr.bf16.mxu0 %v7104_v46 }
 0x380   : > { %6277 = vmatpush1.bf16.msra.mxu0 %v7103_v33  ;;  %v9269_v47 = vpop.permute.xlu1 %3273  ;;  %v9271_v21 = vpop.permute.xlu0 %3739  ;;  %v9285_v33 = vld [vmem:[#allocation3 + $0xe0] sm:$0xff] }
 0x381   : > { %11731 = vst [vmem:[#allocation70_spill] sm:$0xff] %v9271_v21  ;;  %6278 = vmatprep.subr.bf16.mxu0 %v7096_v2  ;;  %v3443_v21 = vld [vmem:[#allocation3 + $0x70] sm:$0xf] }
 0x382   : > { %4035 = vrot.lane.b32.xlu0 %v8835_v51, %s7633_s26  ;;  %4557 = vrot.lane.b32.xlu1 %v8867_v45, %s7630_s2 }
 0x384   : > { %6279 = vmatpush1.bf16.msra.mxu0 %v7095_v1  ;;  %v9277_v36 = vpop.permute.xlu1 %4305  ;;  %v9279_v22 = vpop.permute.xlu0 %4771 }
 0x385   : > { %11732 = vst [vmem:[#allocation71_spill] sm:$0xff] %v9279_v22 }
 0x386   : > { %4793 = vrot.lane.b32.xlu0 %v8860_v16, %s7638_s20  ;;  %4069 = vrot.lane.b32.xlu1 %v9205_v35, %s7633_s26  ;;  %v3205_v16 = vld [vmem:[#allocation3 + $0xb0] sm:$0xff] }
 0x388   : > { %v9287_v53 = vpop.permute.xlu1 %3027  ;;  %v9289_v61 = vpop.permute.xlu0 %3513 }
 0x38a   : > { %4773 = vrot.lane.b32.xlu0 %v8835_v51, %s7638_s20  ;;  %3299 = vrot.lane.b32.xlu1 %v9285_v33, %s7636_s23 }
 0x38c   : > { %v9295_v46 = vpop.permute.xlu1 %4059  ;;  %v9297_v39 = vpop.permute.xlu0 %3267 }
 0x38d   : > { %11733 = vst [vmem:[#allocation72_spill] sm:$0xff] %v9297_v39 }
 0x38e   : > { %3287 = vrot.lane.b32.xlu0 %v3205_v16, %s7636_s23  ;;  %4807 = vrot.lane.b32.xlu1 %v9205_v35, %s7638_s20 }
 0x390   : > { %v9302_v62 = vpop.permute.xlu1 %4797  ;;  %v9304_v44 = vpop.permute.xlu0 %3021 }
 0x391   : > { %11734 = vst [vmem:[#allocation73_spill] sm:$0xff] %v9304_v44  ;;  %v11396_v44 = vrot.slane %v9289_v61, 4 }
 0x392   : > { %3041 = vrot.lane.b32.xlu0 %v3205_v16, %s7637_s16  ;;  %4537 = vrot.lane.b32.xlu1 %v8837_v11, %s7630_s2 }
 0x394   : > { %v9311_v51 = vpop.permute.xlu1 %3767  ;;  %v9313_v15 = vpop.permute.xlu0 %4545 }
 0x395   : > { %11735 = vst [vmem:[#allocation74_spill] sm:$0xff] %v9311_v51  ;;  %11736 = vst [vmem:[#allocation75_spill] sm:$0xff] %v9313_v15  ;;  %v9347_v15 = vld [vmem:[%s7780_s0 + $0x4] ss:$16 sps:$4 sm:$0xff]   ;;  %v11775_v51 = vrot.slane %v8839_v37, 4  ;;  %v3057_v37 = vrot.slane %v9090_v7, 4 }
 0x396   : > { %3779 = vrot.lane.b32.xlu0 %v3205_v16, %s7634_s29  ;;  %3279 = vrot.lane.b32.xlu1 %v9215_v6, %s7636_s23  ;;  %11745 = vst [vmem:[#allocation84_spill] sm:$0xff] %v9347_v15 }
 0x397   : > { %6308 = vmatprep.mubr.bf16.mxu0 %v9347_v15 }
 0x398   : > { %v9318_v30 = vpop.permute.xlu1 %3503  ;;  %v9320_v12 = vpop.permute.xlu0 %4299 }
 0x399   : > { %11737 = vst [vmem:[#allocation76_spill] sm:$0xff] %v9318_v30  ;;  %11738 = vst [vmem:[#allocation77_spill] sm:$0xff] %v9320_v12  ;;  %v3433_v12 = vld [vmem:[#allocation3 + $0x20] sm:$0xf]  ;;  %v11776_v30 = vrot.slane %v8846_v19, 4 }
 0x39a   : > { %3533 = vrot.lane.b32.xlu0 %v3205_v16, %s7635_s27  ;;  %4331 = vrot.lane.b32.xlu1 %v9221_v24, %s7632_s25  ;;  %v3438_v19 = vld [vmem:[#allocation3 + $0x48] sm:$0xf] }
 0x39c   : > { %v9325_v2 = vpop.permute.xlu1 %3257  ;;  %v9327_v1 = vpop.permute.xlu0 %4053 }
 0x39d   : > { %11739 = vst [vmem:[#allocation78_spill] sm:$0xff] %v9325_v2  ;;  %11740 = vst [vmem:[#allocation79_spill] sm:$0xff] %v9327_v1 }
 0x39e   : > { %4565 = vrot.lane.b32.xlu0 %v4483_v56, %s7630_s2  ;;  %3777 = vrot.lane.b32.xlu1 %v9162_v26, %s7634_s29 }
 0x3a0   : > { %v9332_v52 = vpop.permute.xlu1 %3011  ;;  %v9334_v22 = vpop.permute.xlu0 %3759 }
 0x3a1   : > { %11741 = vst [vmem:[#allocation80_spill] sm:$0xff] %v9332_v52  ;;  %11742 = vst [vmem:[#allocation81_spill] sm:$0xff] %v9334_v22 }
 0x3a2   : > { %3517 = vrot.lane.b32.xlu0 %v3443_v21, %s7635_s27  ;;  %3259 = vrot.lane.b32.xlu1 %v9262_v60, %s7636_s23 }
 0x3a4   : > { %v9339_v16 = vpop.permute.xlu1 %4535  ;;  %v9341_v50 = vpop.permute.xlu0 %4791 }
 0x3a5   : > { %11743 = vst [vmem:[#allocation82_spill] sm:$0xff] %v9339_v16  ;;  %11744 = vst [vmem:[#allocation83_spill] sm:$0xff] %v9341_v50 }
 0x3a6   : > { %3497 = vrot.lane.b32.xlu0 %v3433_v12, %s7635_s27  ;;  %3531 = vrot.lane.b32.xlu1 %v9162_v26, %s7635_s27 }
 0x3a8   : > { %v9349_v52 = vpop.permute.xlu1 %4043  ;;  %v9351_v22 = vpop.permute.xlu0 %3515 }
 0x3a9   : > { %11746 = vst [vmem:[#allocation85_spill] sm:$0xff] %v9349_v52  ;;  %11747 = vst [vmem:[#allocation86_spill] sm:$0xff] %v9351_v22  ;;  %v3197_v52 = vld [vmem:[#allocation3 + $0x70] sm:$0xf] }
 0x3aa   : > { %4319 = vrot.lane.b32.xlu0 %v4483_v56, %s7632_s25  ;;  %4311 = vrot.lane.b32.xlu1 %v8867_v45, %s7632_s25 }
 0x3ac   : > { %v9357_v21 = vpop.permute.xlu1 %4289  ;;  %v9359_v50 = vpop.permute.xlu0 %3775 }
 0x3ad   : > { %11748 = vst [vmem:[#allocation87_spill] sm:$0xff] %v9357_v21  ;;  %11749 = vst [vmem:[#allocation88_spill] sm:$0xff] %v9359_v50  ;;  %v4715_v50 = vld [vmem:[#allocation3 + $0x44] sm:$0xff] }
 0x3ae   : > { %3761 = vrot.lane.b32.xlu0 %v9100_v9, %s7634_s29  ;;  %3053 = vrot.lane.b32.xlu1 %v9285_v33, %s7637_s16 }
 0x3b0   : > { %v9365_v26 = vpop.permute.xlu1 %3749  ;;  %v9367_v12 = vpop.permute.xlu0 %3529 }
 0x3b1   : > { %11750 = vst [vmem:[#allocation89_spill] sm:$0xff] %v9365_v26  ;;  %11751 = vst [vmem:[#allocation90_spill] sm:$0xff] %v9367_v12  ;;  %v11755_v12 = vrot.slane %v9138_v13, 4 }
 0x3b2   : > { %3271 = vrot.lane.b32.xlu0 %v3197_v52, %s7636_s23  ;;  %4291 = vrot.lane.b32.xlu1 %v8837_v11, %s7632_s25 }
 0x3b4   : > { %v9372_v16 = vpop.permute.xlu1 %4781  ;;  %v9374_v21 = vpop.permute.xlu0 %3495 }
 0x3b5   : > { %11752 = vst [vmem:[#allocation91_spill] sm:$0xff] %v9372_v16  ;;  %11753 = vst [vmem:[#allocation92_spill] sm:$0xff] %v9374_v21  ;;  %v3597_v16 = vsel %vm1489_vm11, %v11755_v12, %v11396_v44  ;;  %v11756_v21 = vrot.slane %v9168_v58, 4  ;;  %v3082_v44 = vrot.slane %v8876_v42, 4 }
 0x3b6   : > { %4073 = vrot.lane.b32.xlu0 %v4483_v56, %s7633_s26  ;;  %3033 = vrot.lane.b32.xlu1 %v9215_v6, %s7637_s16  ;;  %v9405_v39 = vsel %vm1657_vm5, %v9138_v13, %v3597_v16  ;;  %v3187_v13 = vld [vmem:[#allocation3 + $0x20] sm:$0xf] }
 0x3b7   : > { %11759 = vst [vmem:[#allocation96_spill] sm:$0xff] %v9405_v39  ;;  %v3328_v39 = vrot.slane %v8858_v59, 4 }
 0x3b8   : > { %v9380_v9 = vpop.permute.xlu0 %4547  ;;  %v9382_v26 = vpop.permute.xlu1 %3523 }
 0x3b9   : > { %11754 = vst [vmem:[#allocation93_spill] sm:$0xff] %v9380_v9  ;;  %v11397_v52 = vrot.slane %v9382_v26, 4 }
 0x3ba   : > { %3741 = vrot.lane.b32.xlu0 %v9123_v28, %s7634_s29  ;;  %4085 = vrot.lane.b32.xlu1 %v9221_v24, %s7633_s26 }
 0x3bb   : > { %v3605_v9 = vsel %vm1489_vm11, %v11756_v21, %v11397_v52 }
 0x3bc   : > { %v9399_v2 = vpop.permute.xlu0 %4527  ;;  %v9401_v15 = vpop.permute.xlu1 %3277  ;;  %v9409_v28 = vsel %vm1657_vm5, %v9168_v58, %v3605_v9  ;;  %v4485_v58 = vld [vmem:[#allocation3 + $0xc4] sm:$0xf] }
 0x3bd   : > { %11757 = vst [vmem:[#allocation94_spill] sm:$0xff] %v9399_v2  ;;  %11758 = vst [vmem:[#allocation95_spill] sm:$0xff] %v9401_v15  ;;  %v9483_v2 = vld [vmem:[#allocation3 + $0xb8] sm:$0xff] }
 0x3be   : > { %11760 = vst [vmem:[#allocation97_spill] sm:$0xff] %v9409_v28  ;;  %4811 = vrot.lane.b32.xlu0 %v4483_v56, %s7638_s20  ;;  %3013 = vrot.lane.b32.xlu1 %v9262_v60, %s7637_s16 }
 0x3c0   : > { %v9418_v21 = vpop.permute.xlu0 %3269  ;;  %v9420_v52 = vpop.permute.xlu1 %3031 }
 0x3c1   : > { %11761 = vst [vmem:[#allocation98_spill] sm:$0xff] %v9418_v21  ;;  %11762 = vst [vmem:[#allocation99_spill] sm:$0xff] %v9420_v52 }
 0x3c2   : > { %3251 = vrot.lane.b32.xlu0 %v3187_v13, %s7636_s23  ;;  %4065 = vrot.lane.b32.xlu1 %v8867_v45, %s7633_s26  ;;  %v9437_v13 = vld [vmem:[#allocation3 + $0xbc] sm:$0xff] }
 0x3c4   : > { %v9425_v16 = vpop.permute.xlu0 %3249  ;;  %v9427_v9 = vpop.permute.xlu1 %4555 }
 0x3c5   : > { %11763 = vst [vmem:[#allocation100_spill] sm:$0xff] %v9425_v16  ;;  %11764 = vst [vmem:[#allocation101_spill] sm:$0xff] %v9427_v9  ;;  %v11409_v16 = vrot.slane %v8958_v18, 4  ;;  %v11767_v9 = vrot.slane %v9327_v1, 4 }
 0x3c6   : > { %4569 = vrot.lane.b32.xlu0 %v4485_v58, %s7630_s2  ;;  %4045 = vrot.lane.b32.xlu1 %v8837_v11, %s7633_s26  ;;  %v4360_v11 = vrot.slane %v8869_v38, 4 }
 0x3c7   : > { %v4137_v52 = vsel %vm1489_vm11, %v11409_v16, %v11767_v9  ;;  %v11769_v16 = vrot.slane %v9001_v49, 4 }
 0x3c8   : > { %v9432_v56 = vpop.permute.xlu0 %3285  ;;  %v9434_v12 = vpop.permute.xlu1 %4309 }
 0x3c9   : > { %11765 = vst [vmem:[#allocation102_spill] sm:$0xff] %v9434_v12  ;;  %v2951_v12 = vld [vmem:[#allocation3 + $0x70] sm:$0xf] }
 0x3ca   : > { %4567 = vrot.lane.b32.xlu0 %v9437_v13, %s7630_s2  ;;  %4823 = vrot.lane.b32.xlu1 %v9221_v24, %s7638_s20  ;;  %v4606_v24 = vrot.slane %v8852_v8, 4 }
 0x3cc   : > { %v9444_v58 = vpop.permute.xlu0 %3039  ;;  %v9446_v21 = vpop.permute.xlu1 %4063 }
 0x3cd   : > { %11766 = vst [vmem:[#allocation103_spill] sm:$0xff] %v9446_v21  ;;  %v11768_v9 = vrot.slane %v9446_v21, 4  ;;  %v4405_v21 = vsel %vm1489_vm11, %v4360_v11, %v11775_v51 }
 0x3ce   : > { %3025 = vrot.lane.b32.xlu0 %v2951_v12, %s7637_s16  ;;  %4803 = vrot.lane.b32.xlu1 %v8867_v45, %s7638_s20  ;;  %v9477_v12 = vsel %vm1839_vm0, %v8958_v18, %v4137_v52  ;;  %v11774_v52 = vrot.slane %v8829_v10, 4 }
 0x3cf   : > { %v4145_v28 = vsel %vm1489_vm11, %v11769_v16, %v11768_v9  ;;  %11771 = vst [vmem:[#allocation105_spill] sm:$0xff] %v9477_v12  ;;  %v11773_v9 = vrot.slane %v8827_v40, 4  ;;  %v3127_v16 = vsel %vm1489_vm11, %v3082_v44, %v11776_v30  ;;  %v3448_v12 = vld [vmem:[#allocation3 + $0x98] sm:$0xf]  ;;  %v9519_v44 = vsel %vm1922_vm15, %v8869_v38, %v4405_v21  ;;  %v4475_v21 = vld [vmem:[#allocation3 + $0x74] sm:$0xf] }
 0x3d0   : > { %v9471_v1 = vpop.permute.xlu0 %4563  ;;  %v9473_v15 = vpop.permute.xlu1 %3769  ;;  %v9481_v45 = vsel %vm1839_vm0, %v9001_v49, %v4145_v28  ;;  %v3373_v28 = vsel %vm1489_vm11, %v3328_v39, %v11774_v52  ;;  %v11423_v39 = vrot.slane %v8872_v31, 4  ;;  %v3318_v52 = vrot.slane %v9269_v47, 4 }
 0x3d1   : > { %11770 = vst [vmem:[#allocation104_spill] sm:$0xff] %v9473_v15  ;;  %11772 = vst [vmem:[#allocation106_spill] sm:$0xff] %v9481_v45  ;;  %v4651_v15 = vsel %vm1489_vm11, %v4606_v24, %v11773_v9  ;;  %v4581_v45 = vrot.slane %v9068_v3, 4  ;;  %v3374_v51 = vsel %vm1574_vm6, %v8858_v59, %v3373_v28  ;;  %v9523_v30 = vsel %vm11779_vm10, %v8876_v42, %v3127_v16 }
 0x3d2   : > { %3289 = vrot.lane.b32.xlu0 %v9483_v2, %s7636_s23  ;;  %4783 = vrot.lane.b32.xlu1 %v4715_v50, %s7638_s20  ;;  %v9511_v50 = vsel %vm2005_vm12, %v8852_v8, %v4651_v15  ;;  %v3303_v15 = vrot.slane %v9075_v48, 4  ;;  %v11432_v59 = vrot.slane %v9176_v29, 4  ;;  %v3313_v38 = vrot.slane %v9180_v0, 4  ;;  %vm11850_vm10 = vmmov %vm11838_vm2 }
 0x3d3   : > { %v4611_v8 = vsel %vm1489_vm11, %v4581_v45, %v11423_v39  ;;  %v4586_v16 = vrot.slane %v9119_v54, 4  ;;  %v3308_v28 = vrot.slane %v9129_v5, 4  ;;  %v11435_v45 = vrot.slane %v9145_v55, 4 }
 0x3d4   : > { %v9505_v24 = vpop.permute.xlu0 %4301  ;;  %v9507_v9 = vpop.permute.xlu1 %4801  ;;  %v3357_v39 = vsel %vm1489_vm11, %v3318_v52, %v11432_v59  ;;  %v9548_v42 = vsel %vm2005_vm12, %v9068_v3, %v4611_v8  ;;  %v11781_v52 = vrot.slane %v9070_v43, 4  ;;  %v11782_v3 = vrot.slane %v9432_v56, 4 }
 0x3d5   : > { %11777 = vst [vmem:[#allocation107_spill] sm:$0xff] %v9505_v24  ;;  %11778 = vst [vmem:[#allocation108_spill] sm:$0xff] %v9507_v9  ;;  %v3349_v11 = vsel %vm1489_vm11, %v3313_v38, %v11435_v45  ;;  %v3358_v43 = vsel %vm1574_vm6, %v9269_v47, %v3357_v39  ;;  %v11783_v38 = vrot.slane %v8905_v27, 4 }
 0x3d6   : > { %4321 = vrot.lane.b32.xlu0 %v9437_v13, %s7632_s25  ;;  %3527 = vrot.lane.b32.xlu1 %v3448_v12, %s7635_s27  ;;  %v3333_v59 = vsel %vm1489_vm11, %v3303_v15, %v11781_v52 }
 0x3d7   : > { %v4619_v45 = vsel %vm1489_vm11, %v4586_v16, %v11783_v38  ;;  %v11786_v16 = vrot.slane %v8926_v20, 4 }
 0x3d8   : > { %v9538_v12 = vpop.permute.xlu0 %4281  ;;  %v3284_v24 = vpop.permute.xlu1 %3283 }
 0x3d9   : > { %11780 = vst [vmem:[#allocation109_spill] sm:$0xff] %v9538_v12  ;;  %v3323_v31 = vrot.slane %v3284_v24, 4  ;;  %v11440_v12 = vrot.slane %v9108_v23, 4  ;;  %v11441_v23 = vrot.slane %v8982_v34, 4 }
 0x3da   : > { %4549 = vrot.lane.b32.xlu0 %v4475_v21, %s7630_s2  ;;  %3507 = vrot.lane.b32.xlu1 %v3438_v19, %s7635_s27  ;;  %v4596_v19 = vrot.slane %v9258_v17, 4 }
 0x3db   : > { %v3365_v8 = vsel %vm1489_vm11, %v3323_v31, %v11782_v3  ;;  %v3341_v21 = vsel %vm1489_vm11, %v3308_v28, %v11440_v12  ;;  %v3334_v28 = vsel %vm1574_vm6, %v9075_v48, %v3333_v59  ;;  %v11784_v12 = vrot.slane %v9077_v57, 4 }
 0x3dc   : > { %v3366_v15 = vsel %vm1574_vm6, %v3284_v24, %v3365_v8  ;;  %v9571_v52 = vpop.permute.xlu0 %4317  ;;  %v3038_v9 = vpop.permute.xlu1 %3037  ;;  %v3350_v24 = vsel %vm1574_vm6, %v9180_v0, %v3349_v11  ;;  %v3342_v39 = vsel %vm1574_vm6, %v9129_v5, %v3341_v21  ;;  %v11442_v48 = vrot.slane %v9444_v58, 4 }
 0x3dd   : > { %v7087_v55 = vcombine.low %v3366_v15, %v3374_v51  ;;  %v3077_v31 = vrot.slane %v3038_v9, 4  ;;  %v7088_v3 = vcombine.high %v3366_v15, %v3374_v51  ;;  %v9582_v47 = vsel %vm1489_vm11, %v3057_v37, %v11784_v12  ;;  %v3212_v37 = vld [vmem:[#allocation3 + $0xe8] sm:$0xf] }
 0x3de   : > { %3043 = vrot.lane.b32.xlu0 %v9483_v2, %s7637_s16  ;;  %3791 = vrot.lane.b32.xlu1 %v9285_v33, %s7634_s29  ;;  %v4591_v51 = vrot.slane %v9174_v4, 4  ;;  %v7080_v59 = vcombine.high %v3350_v24, %v3358_v43  ;;  %v9597_v0 = vsel %vm2005_vm12, %v9119_v54, %v4619_v45  ;;  %v4635_v11 = vsel %vm1489_vm11, %v4596_v19, %v11441_v23 }
 0x3df   : > { %6280 = vmatprep.subr.bf16.mxu0 %v7088_v3  ;;  %v3072_v12 = vrot.slane %v9287_v53, 4  ;;  %v11443_v15 = vrot.slane %v9471_v1, 4  ;;  %v3119_v38 = vsel %vm1489_vm11, %v3077_v31, %v11442_v48  ;;  %v3062_v45 = vrot.slane %v9143_v32, 4 }
 0x3e0   : > { %v9603_v5 = vpop.permute.xlu0 %3023  ;;  %6281 = vmatpush1.bf16.msra.mxu0 %v7087_v55  ;;  %v4562_v8 = vpop.permute.xlu1 %4561  ;;  %v11444_v19 = vrot.slane %v9182_v63, 4  ;;  %v7079_v3 = vcombine.low %v3350_v24, %v3358_v43  ;;  %v7072_v55 = vcombine.high %v3334_v28, %v3342_v39  ;;  %v4627_v21 = vsel %vm1489_vm11, %v4591_v51, %v11786_v16 }
 0x3e1   : > { %11785 = vst [vmem:[#allocation110_spill] sm:$0xff] %v9603_v5  ;;  %v4601_v54 = vrot.slane %v4562_v8, 4  ;;  %6282 = vmatprep.subr.bf16.mxu0 %v7080_v59  ;;  %v3067_v31 = vrot.slane %v9195_v41, 4  ;;  %v4636_v43 = vsel %vm2005_vm12, %v9258_v17, %v4635_v11  ;;  %v11790_v11 = vrot.slane %v9351_v22, 4 }
 0x3e2   : > { %4075 = vrot.lane.b32.xlu0 %v9437_v13, %s7633_s26  ;;  %3301 = vrot.lane.b32.xlu1 %v3212_v37, %s7636_s23  ;;  %v3111_v24 = vsel %vm1489_vm11, %v3072_v12, %v11444_v19  ;;  %v3120_v37 = vsel %vm11787_vm14, %v3038_v9, %v3119_v38  ;;  %v11791_v12 = vrot.slane %v9289_v61, 4  ;;  %vm11856_vm14 = vmmov %vm11838_vm2 }
 0x3e3   : > { %v4643_v59 = vsel %vm1489_vm11, %v4601_v54, %v11443_v15  ;;  %v2941_v15 = vld [vmem:[#allocation3 + $0x20] sm:$0xf]  ;;  %v4628_v54 = vsel %vm2005_vm12, %v9174_v4, %v4627_v21  ;;  %v11797_v4 = vld [vmem:[#allocation20_spill] sm:$0xff]  ;;  %v11807_v21 = vld [vmem:[#allocation14_spill] sm:$0xff] }
 0x3e4   : > { %v4644_v48 = vsel %vm2005_vm12, %v4562_v8, %v4643_v59  ;;  %v9630_v23 = vpop.permute.xlu0 %3003  ;;  %6283 = vmatpush1.bf16.msra.mxu0 %v7079_v3  ;;  %v9632_v51 = vpop.permute.xlu1 %3525  ;;  %v3599_v9 = vsel %vm1489_vm11, %v11791_v12, %v11790_v11  ;;  %v11792_v8 = vld [vmem:[#allocation31_spill] sm:$0xff]  ;;  %v7071_v59 = vcombine.low %v3334_v28, %v3342_v39  ;;  %v11793_v3 = vrot.slane %v9115_v14, 4 }
 0x3e5   : > { %11788 = vst [vmem:[#allocation111_spill] sm:$0xff] %v9630_v23  ;;  %11789 = vst [vmem:[#allocation112_spill] sm:$0xff] %v9632_v51  ;;  %v7231_v16 = vcombine.low %v4644_v48, %v9511_v50  ;;  %6284 = vmatprep.subr.bf16.mxu0 %v7072_v55  ;;  %v7232_v17 = vcombine.high %v4644_v48, %v9511_v50  ;;  %v11794_v50 = vrot.slane %v9152_v25, 4  ;;  %v11795_v39 = vrot.slane %v9632_v51, 4 }
 0x3e6   : > { %v3095_v19 = vsel %vm1489_vm11, %v3062_v45, %v11793_v3  ;;  %3005 = vrot.lane.b32.xlu0 %v2941_v15, %s7637_s16  ;;  %3771 = vrot.lane.b32.xlu1 %v9215_v6, %s7634_s29  ;;  %v7064_v55 = vcombine.high %v3120_v37, %v9523_v30  ;;  %v7224_v28 = vcombine.high %v4628_v54, %v4636_v43  ;;  %v11796_v45 = vrot.slane %v9382_v26, 4  ;;  %v11802_v3 = vld [vmem:[#allocation56_spill] sm:$0xff] }
 0x3e7   : > { %v3103_v48 = vsel %vm1489_vm11, %v3067_v31, %v11794_v50  ;;  %6319 = vmatprep.subr.bf16.mxu1 %v7232_v17  ;;  %v3112_v15 = vsel %vm11798_vm1, %v9287_v53, %v3111_v24  ;;  %v9669_v17 = vsel %vm1657_vm5, %v9289_v61, %v3599_v9  ;;  %v4094_v50 = vrot.slane %v11802_v3, 4  ;;  %v3202_v53 = vld [vmem:[#allocation3 + $0x98] sm:$0xf]  ;;  %v4465_v61 = vld [vmem:[#allocation3 + $0x24] sm:$0xf]  ;;  %vm11867_vm1 = vmmov %vm11838_vm2 }
 0x3e8   : > { %v3607_v11 = vsel %vm1489_vm11, %v11796_v45, %v11795_v39  ;;  %v9663_v6 = vpop.permute.xlu0 %4071  ;;  %6285 = vmatpush1.bf16.msra.mxu0 %v7071_v59  ;;  %6320 = vmatpush1.bf16.msra.mxu1 %v7231_v16  ;;  %v9665_v31 = vpop.permute.xlu1 %4577  ;;  %11800 = vst [vmem:[#allocation20_spill] sm:$0xff] %v9669_v17  ;;  %v4350_v39 = vrot.slane %v9277_v36, 4  ;;  %v11803_v59 = vld [vmem:[#allocation38_spill] sm:$0xff]  ;;  %v3104_v9 = vsel %vm11804_vm13, %v9195_v41, %v3103_v48  ;;  %v11808_v41 = vld [vmem:[#allocation17_spill] sm:$0xff]  ;;  %vm11889_vm13 = vcmask 7168  }
 0x3e9   : > { %11799 = vst [vmem:[#allocation31_spill] sm:$0xff] %v9665_v31  ;;  %v9673_v12 = vsel %vm1657_vm5, %v9382_v26, %v3607_v11  ;;  %6286 = vmatprep.subr.bf16.mxu0 %v7064_v55  ;;  %6321 = vmatprep.subr.bf16.mxu1 %v7224_v28  ;;  %v7223_v26 = vcombine.low %v4628_v54, %v4636_v43  ;;  %v11805_v55 = vld [vmem:[#allocation48_spill] sm:$0xff]  ;;  %v11806_v11 = vld [vmem:[#allocation59_spill] sm:$0xff]  ;;  %v11809_v54 = vld [vmem:[#allocation54_spill] sm:$0xff]  ;;  %v11813_v23 = vrot.slane %v11803_v59, 4  ;;  %v11457_v43 = vrot.slane %v9571_v52, 4 }
 0x3ea   : > { %11801 = vst [vmem:[#allocation113_spill] sm:$0xff] %v9673_v12  ;;  %v7063_v45 = vcombine.low %v3120_v37, %v9523_v30  ;;  %4813 = vrot.lane.b32.xlu0 %v9437_v13, %s7638_s20  ;;  %3281 = vrot.lane.b32.xlu1 %v3202_v53, %s7636_s23  ;;  %v4089_v28 = vrot.slane %v11805_v55, 4  ;;  %v4345_v24 = vrot.slane %v11806_v11, 4  ;;  %v7056_v38 = vcombine.high %v3104_v9, %v3112_v15  ;;  %v11814_v12 = vld [vmem:[#allocation45_spill] sm:$0xff]  ;;  %v11883_v31 = vld [vmem:[#allocation66_spill] sm:$0xff] }
 0x3eb   : > { %v7216_v16 = vcombine.high %v9548_v42, %v9597_v0  ;;  %v4340_v30 = vrot.slane %v11809_v54, 4  ;;  %v3096_v13 = vsel %vm11810_vm4, %v9143_v32, %v3095_v19  ;;  %v11812_v53 = vrot.slane %v11797_v4, 4  ;;  %vm11907_vm4 = vmmov %vm11889_vm13 }
 0x3ec   : > { %v9697_v37 = vpop.permute.xlu0 %4055  ;;  %6287 = vmatpush1.bf16.msra.mxu0 %v7063_v45  ;;  %6322 = vmatpush1.bf16.msra.mxu1 %v7223_v26  ;;  %v4316_v48 = vpop.permute.xlu1 %4315  ;;  %v4389_v51 = vsel %vm1489_vm11, %v4350_v39, %v11813_v23  ;;  %v4335_v32 = vrot.slane %v11814_v12, 4  ;;  %v3088_v19 = vsel %vm11815_vm9, %v9090_v7, %v9582_v47  ;;  %v7215_v26 = vcombine.low %v9548_v42, %v9597_v0  ;;  %v3973_v42 = vld [vmem:[#allocation3 + $0x24] sm:$0xf]  ;;  %vm11910_vm9 = vmmov %vm11907_vm4 }
 0x3ed   : > { %11811 = vst [vmem:[#allocation56_spill] sm:$0xff] %v9697_v37  ;;  %v4127_v22 = vsel %vm1489_vm11, %v4094_v50, %v11812_v53  ;;  %v4355_v5 = vrot.slane %v4316_v48, 4  ;;  %6288 = vmatprep.subr.bf16.mxu0 %v7056_v38  ;;  %6323 = vmatprep.subr.bf16.mxu1 %v7216_v16  ;;  %v7055_v45 = vcombine.low %v3104_v9, %v3112_v15  ;;  %v11816_v23 = vrot.slane %v11792_v8, 4  ;;  %v2946_v37 = vld [vmem:[#allocation3 + $0x48] sm:$0xf] }
 0x3ee   : > { %4529 = vrot.lane.b32.xlu0 %v4465_v61, %s7630_s2  ;;  %3751 = vrot.lane.b32.xlu1 %v9262_v60, %s7634_s29  ;;  %v11817_v50 = vrot.slane %v11808_v41, 4  ;;  %v7048_v47 = vcombine.high %v3088_v19, %v3096_v13  ;;  %v4128_v0 = vsel %vm1839_vm0, %v11802_v3, %v4127_v22  ;;  %v4390_v60 = vsel %vm1922_vm15, %v9277_v36, %v4389_v51  ;;  %v3192_v22 = vld [vmem:[#allocation3 + $0x48] sm:$0xf] }
 0x3ef   : > { %v4119_v38 = vsel %vm1489_vm11, %v4089_v28, %v11816_v23  ;;  %v4397_v7 = vsel %vm1489_vm11, %v4355_v5, %v11457_v43  ;;  %v11821_v5 = vrot.slane %v11807_v21, 4  ;;  %v7047_v3 = vcombine.low %v3088_v19, %v3096_v13  ;;  %v4239_v23 = vld [vmem:[#allocation3 + $0xc4] sm:$0xf]  ;;  %v3941_v13 = vld [vmem:[#allocation3 + $0xcc] sm:$0xff] }
 0x3f0   : > { %v4381_v39 = vsel %vm1489_vm11, %v4345_v24, %v11817_v50  ;;  %v4398_v15 = vsel %vm1922_vm15, %v4316_v48, %v4397_v7  ;;  %v9729_v16 = vpop.permute.xlu0 %4809  ;;  %6289 = vmatpush1.bf16.msra.mxu0 %v7055_v45  ;;  %6324 = vmatpush1.bf16.msra.mxu1 %v7215_v26  ;;  %v9731_v61 = vpop.permute.xlu1 %3505  ;;  %v11820_v24 = vld [vmem:[#allocation29_spill] sm:$0xff]  ;;  %v4120_v51 = vsel %vm1839_vm0, %v11805_v55, %v4119_v38  ;;  %v11824_v19 = vld [vmem:[#allocation24_spill] sm:$0xff]  ;;  %v11825_v50 = vld [vmem:[#allocation30_spill] sm:$0xff] }
 0x3f1   : > { %11818 = vst [vmem:[#allocation38_spill] sm:$0xff] %v9729_v16  ;;  %11819 = vst [vmem:[#allocation48_spill] sm:$0xff] %v9731_v61  ;;  %v11453_v9 = vrot.slane %v11820_v24, 4  ;;  %v4373_v28 = vsel %vm1489_vm11, %v4340_v30, %v11821_v5  ;;  %v7207_v53 = vcombine.low %v4398_v15, %v9519_v44  ;;  %6290 = vmatprep.subr.bf16.mxu0 %v7048_v47  ;;  %v11456_v38 = vrot.slane %v11824_v19, 4  ;;  %v11898_v24 = vld [vmem:[#allocation96_spill] sm:$0xff] }
 0x3f2   : > { %v7208_v36 = vcombine.high %v4398_v15, %v9519_v44  ;;  %v4382_v48 = vsel %vm1922_vm15, %v11806_v11, %v4381_v39  ;;  %4037 = vrot.lane.b32.xlu0 %v3973_v42, %s7633_s26  ;;  %3261 = vrot.lane.b32.xlu1 %v3192_v22, %s7636_s23  ;;  %v7168_v26 = vcombine.high %v4120_v51, %v4128_v0  ;;  %v4114_v39 = vrot.slane %v11825_v50, 4  ;;  %v11826_v42 = vld [vmem:[#allocation62_spill] sm:$0xff] }
 0x3f3   : > { %v4365_v30 = vsel %vm1489_vm11, %v4335_v32, %v11453_v9  ;;  %v7200_v45 = vcombine.high %v4382_v48, %v4390_v60  ;;  %v4374_v44 = vsel %vm1922_vm15, %v11809_v54, %v4373_v28  ;;  %v4104_v32 = vrot.slane %v9295_v46, 4 }
 0x3f4   : > { %6325 = vmatprep.subr.bf16.mxu1 %v7208_v36  ;;  %v9750_v55 = vpop.permute.xlu0 %4035  ;;  %6291 = vmatpush1.bf16.msra.mxu0 %v7047_v3  ;;  %v9752_v11 = vpop.permute.xlu1 %4557  ;;  %v4366_v7 = vsel %vm1922_vm15, %v11814_v12, %v4365_v30  ;;  %v7167_v47 = vcombine.low %v4120_v51, %v4128_v0  ;;  %v7199_v54 = vcombine.low %v4382_v48, %v4390_v60  ;;  %v4099_v15 = vrot.slane %v11826_v42, 4  ;;  %v11829_v30 = vld [vmem:[#allocation25_spill] sm:$0xff] }
 0x3f5   : > { %11822 = vst [vmem:[#allocation59_spill] sm:$0xff] %v9750_v55  ;;  %6326 = vmatpush1.bf16.msra.mxu1 %v7207_v53  ;;  %11823 = vst [vmem:[#allocation17_spill] sm:$0xff] %v9752_v11  ;;  %6292 = vmatprep.subr.bf16.mxu0 %v7168_v26  ;;  %v7160_v5 = vcombine.high %v9205_v35, %v3941_v13  ;;  %v7192_v28 = vcombine.high %v4366_v7, %v4374_v44  ;;  %v2966_v53 = vld [vmem:[#allocation3 + $0xe8] sm:$0xf]  ;;  %v11828_v0 = vrot.slane %v9001_v49, 4  ;;  %v11861_v55 = vld [vmem:[#allocation27_spill] sm:$0xff] }
 0x3f6   : > { %6327 = vmatprep.subr.bf16.mxu1 %v7200_v45  ;;  %4323 = vrot.lane.b32.xlu0 %v4239_v23, %s7632_s25  ;;  %v4159_v12 = vsel %vm1489_vm11, %v4114_v39, %v11456_v38  ;;  %v7191_v3 = vcombine.low %v4366_v7, %v4374_v44  ;;  %v7159_v48 = vcombine.low %v9205_v35, %v3941_v13  ;;  %v11454_v26 = vrot.slane %v11829_v30, 4  ;;  %v11830_v45 = vld [vmem:[#allocation18_spill] sm:$0xff]  ;;  %v4490_v7 = vld [vmem:[#allocation3 + $0xec] sm:$0xf]  ;;  %v11881_v11 = vld [vmem:[#allocation53_spill] sm:$0xff] }
 0x3f7   : > { %3545 = vrot.lane.b32.xlu1 %v9285_v33, %s7635_s27  ;;  %v4143_v60 = vsel %vm1489_vm11, %v4104_v32, %v11828_v0  ;;  %v11455_v33 = vrot.slane %v9663_v6, 4  ;;  %v4852_v23 = vrot.slane %v11830_v45, 4  ;;  %v11831_v49 = vrot.slane %v8958_v18, 4  ;;  %v7518_v44 = vld [vmem:[#allocation3 + $0x58] ss:$40 sps:$4 sm:$0xff]  }
 0x3f8   : > { %v9764_v22 = vpop.permute.xlu0 %4793  ;;  %6293 = vmatpush2.bf16.msra.mxu0 %v7167_v47  ;;  %v4070_v36 = vpop.permute.xlu1 %4069  ;;  %v4160_v35 = vsel %vm1839_vm0, %v11825_v50, %v4159_v12  ;;  %v4144_v13 = vsel %vm1839_vm0, %v9295_v46, %v4143_v60  ;;  %v7516_v12 = vld [vmem:[#allocation3 + $0x54] ss:$40 sps:$4 sm:$0xff]   ;;  %v11835_v60 = vld [vmem:[#allocation64_spill] sm:$0xff] }
 0x3f9   : > { %11827 = vst [vmem:[#allocation54_spill] sm:$0xff] %v9764_v22  ;;  %6328 = vmatpush1.bf16.msra.mxu1 %v7199_v54  ;;  %v4109_v51 = vrot.slane %v4070_v36, 4  ;;  %6294 = vmatprep.subr.bf16.mxu0 %v7160_v5  ;;  %v4135_v39 = vsel %vm1489_vm11, %v4099_v15, %v11831_v49  ;;  %v4842_v15 = vrot.slane %v9302_v62, 4  ;;  %v4897_v46 = vsel %vm1489_vm11, %v4852_v23, %v11454_v26  ;;  %v4229_v49 = vld [vmem:[#allocation3 + $0x74] sm:$0xf]  ;;  %v11839_v26 = vld [vmem:[#allocation32_spill] sm:$0xff] }
 0x3fa   : > { %6329 = vmatprep.subr.bf16.mxu1 %v7192_v28  ;;  %3781 = vrot.lane.b32.xlu0 %v9483_v2, %s7634_s29  ;;  %v4136_v50 = vsel %vm1839_vm0, %v11826_v42, %v4135_v39  ;;  %v4898_v9 = vsel %vm11838_vm2, %v11830_v45, %v4897_v46  ;;  %v11840_v38 = vld [vmem:[#allocation42_spill] sm:$0xff]  ;;  %vm11914_vm2 = vmmov %vm11907_vm4 }
 0x3fb   : > { %3055 = vrot.lane.b32.xlu1 %v2966_v53, %s7637_s16  ;;  %v4151_v32 = vsel %vm1489_vm11, %v4109_v51, %v11455_v33  ;;  %v3207_v53 = vld [vmem:[#allocation3 + $0xc0] sm:$0xf]  ;;  %v4837_v51 = vrot.slane %v11835_v60, 4  ;;  %v4480_v46 = vld [vmem:[#allocation3 + $0x9c] sm:$0xf] }
 0x3fc   : > { %v4152_v47 = vsel %vm1839_vm0, %v4070_v36, %v4151_v32  ;;  %v9790_v54 = vpop.permute.xlu0 %4773  ;;  %6295 = vmatpush2.bf16.msra.mxu0 %v7159_v48  ;;  %v9792_v18 = vpop.permute.xlu1 %3299  ;;  %v11834_v36 = vld [vmem:[#allocation41_spill] sm:$0xff]  ;;  %v7176_v48 = vcombine.high %v4136_v50, %v4144_v13  ;;  %v11836_v32 = vld [vmem:[#allocation35_spill] sm:$0xff] }
 0x3fd   : > { %11832 = vst [vmem:[#allocation45_spill] sm:$0xff] %v9790_v54  ;;  %6330 = vmatpush1.bf16.msra.mxu1 %v7191_v3  ;;  %11833 = vst [vmem:[#allocation24_spill] sm:$0xff] %v9792_v18  ;;  %v7183_v5 = vcombine.low %v4152_v47, %v4160_v35  ;;  %v7184_v28 = vcombine.high %v4152_v47, %v4160_v35  ;;  %6296 = vmatprep.subr.bf16.mxu0 %v7518_v44  ;;  %v11458_v0 = vrot.slane %v11834_v36, 4  ;;  %v7521_v3 = vld [vmem:[#allocation3 + $0x8] ss:$40 sps:$4 sm:$0xff]  }
 0x3fe   : > { %3291 = vrot.lane.b32.xlu0 %v3207_v53, %s7636_s23  ;;  %v11460_v44 = vrot.slane %v11836_v32, 4  ;;  %v11461_v47 = vrot.slane %v9729_v16, 4  ;;  %v11899_v16 = vld [vmem:[#allocation97_spill] sm:$0xff] }
 0x3ff   : > { %4579 = vrot.lane.b32.xlu1 %v4490_v7, %s7630_s2  ;;  %6331 = vmatprep.subr.bf16.mxu1 %v7184_v28  ;;  %v11837_v7 = vld [vmem:[#allocation52_spill] sm:$0xff]  ;;  %v4881_v23 = vsel %vm1489_vm11, %v4842_v15, %v11458_v0  ;;  %v2956_v28 = vld [vmem:[#allocation3 + $0x98] sm:$0xf]  ;;  %v11900_v21 = vcombine.high %v11898_v24, %v11899_v16 }
 0x400   : > { %v9805_v42 = vpop.permute.xlu0 %3287  ;;  %6297 = vmatpush2.bf16.msra.mxu0 %v7516_v12  ;;  %v4808_v39 = vpop.permute.xlu1 %4807  ;;  %v4832_v35 = vrot.slane %v11837_v7, 4  ;;  %v7175_v12 = vcombine.low %v4136_v50, %v4144_v13  ;;  %v11841_v15 = vld [vmem:[#allocation46_spill] sm:$0xff]  ;;  %v11843_v50 = vld [vmem:[#allocation33_spill] sm:$0xff] }
 0x401   : > { %6332 = vmatpush1.bf16.msra.mxu1 %v7183_v5  ;;  %v4847_v53 = vrot.slane %v4808_v39, 4  ;;  %6298 = vmatprep.subr.bf16.mxu0 %v7521_v3  ;;  %v7519_v5 = vld [vmem:[#allocation3 + $0x4] ss:$40 sps:$4 sm:$0xff]   ;;  %v4827_v0 = vrot.slane %v11841_v15, 4  ;;  %v4873_v3 = vsel %vm1489_vm11, %v4837_v51, %v11460_v44 }
 0x402   : > { %6333 = vmatprep.subr.bf16.mxu1 %v7176_v48  ;;  %4303 = vrot.lane.b32.xlu0 %v4229_v49, %s7632_s25  ;;  %v11842_v48 = vld [vmem:[#allocation15_spill] sm:$0xff]  ;;  %v4882_v49 = vsel %vm11844_vm7, %v9302_v62, %v4881_v23  ;;  %v11848_v51 = vld [vmem:[#allocation40_spill] sm:$0xff]  ;;  %v4874_v33 = vsel %vm11850_vm10, %v11835_v60, %v4873_v3  ;;  %v11851_v62 = vld [vmem:[#allocation26_spill] sm:$0xff]  ;;  %vm11936_vm10 = vcmask 89088  }
 0x403   : > { %3035 = vrot.lane.b32.xlu1 %v2956_v28, %s7637_s16  ;;  %v4889_v45 = vsel %vm1489_vm11, %v4847_v53, %v11461_v47  ;;  %v11463_v44 = vrot.slane %v11848_v51, 4  ;;  %v11849_v53 = vrot.slane %v11840_v38, 4  ;;  %v11854_v60 = vld [vmem:[#allocation19_spill] sm:$0xff]  ;;  %v11869_v3 = vld [vmem:[#allocation61_spill] sm:$0xff]  ;;  %v3800_v51 = vrot.slane %v11881_v11, 4  ;;  %vm11919_vm7 = vmmov %vm11914_vm2 }
 0x404   : > { %v4890_v28 = vsel %vm11845_vm8, %v4808_v39, %v4889_v45  ;;  %v9830_v43 = vpop.permute.xlu0 %3041  ;;  %6299 = vmatpush2.bf16.msra.mxu0 %v7519_v5  ;;  %v9832_v54 = vpop.permute.xlu1 %4537  ;;  %v3820_v39 = vrot.slane %v11851_v62, 4  ;;  %v11855_v45 = vld [vmem:[#allocation16_spill] sm:$0xff]  ;;  %vm11923_vm8 = vmmov %vm11914_vm2 }
 0x405   : > { %11846 = vst [vmem:[#allocation30_spill] sm:$0xff] %v9830_v43  ;;  %6334 = vmatpush1.bf16.msra.mxu1 %v7175_v12  ;;  %11847 = vst [vmem:[#allocation62_spill] sm:$0xff] %v9832_v54  ;;  %v4865_v47 = vsel %vm1489_vm11, %v4832_v35, %v11849_v53  ;;  %v7255_v13 = vcombine.low %v4890_v28, %v4898_v9  ;;  %v7256_v22 = vcombine.high %v4890_v28, %v4898_v9 }
 0x406   : > { %3535 = vrot.lane.b32.xlu0 %v9483_v2, %s7635_s27  ;;  %v4857_v23 = vsel %vm1489_vm11, %v4827_v0, %v11463_v44  ;;  %v7248_v12 = vcombine.high %v4874_v33, %v4882_v49  ;;  %v11852_v35 = vrot.slane %v11839_v26, 4  ;;  %v11853_v9 = vrot.slane %v8827_v40, 4  ;;  %v2961_v2 = vld [vmem:[#allocation3 + $0xc0] sm:$0xf] }
 0x407   : > { %4559 = vrot.lane.b32.xlu1 %v4480_v46, %s7630_s2  ;;  %6345 = vmatprep.subr.bf16.mxu1 %v7256_v22  ;;  %v4866_v46 = vsel %vm11856_vm14, %v11837_v7, %v4865_v47  ;;  %v11859_v22 = vrot.slane %v11842_v48, 4  ;;  %v11860_v0 = vrot.slane %v8829_v10, 4  ;;  %v11863_v7 = vrot.slane %v11843_v50, 4  ;;  %v11864_v47 = vld [vmem:[#allocation22_spill] sm:$0xff]  ;;  %vm11941_vm14 = vmmov %vm11936_vm10 }
 0x408   : > { %v4653_v5 = vsel %vm1489_vm11, %v11853_v9, %v11852_v35  ;;  %v9856_v28 = vpop.permute.xlu0 %3779  ;;  %v9858_v53 = vpop.permute.xlu1 %3279  ;;  %v3574_v35 = vrot.slane %v11861_v55, 4  ;;  %v11862_v9 = vld [vmem:[#allocation76_spill] sm:$0xff]  ;;  %v11865_v17 = vrot.slane %v11864_v47, 4  ;;  %v4858_v48 = vsel %vm11867_vm1, %v11841_v15, %v4857_v23  ;;  %vm11947_vm1 = vmmov %vm11936_vm10 }
 0x409   : > { %11857 = vst [vmem:[#allocation25_spill] sm:$0xff] %v9856_v28  ;;  %6346 = vmatpush2.bf16.msra.mxu1 %v7255_v13  ;;  %11858 = vst [vmem:[#allocation18_spill] sm:$0xff] %v9858_v53  ;;  %v3375_v44 = vsel %vm1489_vm11, %v11860_v0, %v11859_v22  ;;  %v11866_v53 = vld [vmem:[#allocation21_spill] sm:$0xff]  ;;  %v7247_v54 = vcombine.low %v4874_v33, %v4882_v49  ;;  %v11868_v22 = vld [vmem:[#allocation50_spill] sm:$0xff]  ;;  %v7240_v26 = vcombine.high %v4858_v48, %v4866_v46 }
 0x40a   : > { %6347 = vmatprep.subr.bf16.mxu1 %v7248_v12  ;;  %v4407_v13 = vsel %vm1489_vm11, %v11865_v17, %v11863_v7  ;;  %3045 = vrot.lane.b32.xlu0 %v2961_v2, %s7637_s16  ;;  %v9879_v12 = vsel %vm2005_vm12, %v8827_v40, %v4653_v5  ;;  %v4219_v17 = vld [vmem:[#allocation3 + $0x24] sm:$0xf]  ;;  %v4470_v7 = vld [vmem:[#allocation3 + $0x4c] sm:$0xf]  ;;  %v9885_v18 = vsel %vm1574_vm6, %v8829_v10, %v3375_v44  ;;  %v11870_v33 = vld [vmem:[#allocation57_spill] sm:$0xff]  ;;  %v11873_v40 = vrot.slane %v11854_v60, 4 }
 0x40b   : > { %3015 = vrot.lane.b32.xlu1 %v2946_v37, %s7637_s16  ;;  %v11874_v5 = vrot.slane %v11855_v45, 4  ;;  %v11875_v2 = vld [vmem:[#allocation23_spill] sm:$0xff]  ;;  %v9904_v10 = vsel %vm1922_vm15, %v11864_v47, %v4407_v13  ;;  %v7239_v15 = vcombine.low %v4858_v48, %v4866_v46  ;;  %v11878_v61 = vrot.slane %v11862_v9, 4  ;;  %v11884_v47 = vld [vmem:[#allocation74_spill] sm:$0xff]  ;;  %v3978_v46 = vld [vmem:[#allocation3 + $0x4c] sm:$0xf] }
 0x40c   : > { %v9888_v49 = vpop.permute.xlu0 %3533  ;;  %v9890_v37 = vpop.permute.xlu1 %4331  ;;  %v3865_v23 = vsel %vm1489_vm11, %v3820_v39, %v11873_v40  ;;  %v11876_v0 = vrot.slane %v11875_v2, 4  ;;  %v11877_v44 = vld [vmem:[#allocation47_spill] sm:$0xff]  ;;  %v11879_v39 = vld [vmem:[#allocation49_spill] sm:$0xff]  ;;  %v9920_v48 = vld [vmem:[%s7780_s0 + $0x8] ss:$16 sps:$4 sm:$0xff]   ;;  %v11890_v38 = vrot.slane %v11868_v22, 4 }
 0x40d   : > { %11871 = vst [vmem:[#allocation64_spill] sm:$0xff] %v9888_v49  ;;  %6348 = vmatpush2.bf16.msra.mxu1 %v7247_v54  ;;  %11872 = vst [vmem:[#allocation52_spill] sm:$0xff] %v9890_v37  ;;  %v3795_v54 = vrot.slane %v11877_v44, 4  ;;  %v11880_v40 = vrot.slane %v11879_v39, 4  ;;  %v11886_v37 = vrot.slane %v11869_v3, 4  ;;  %v11887_v9 = vld [vmem:[#allocation43_spill] sm:$0xff]  ;;  %v3866_v32 = vsel %vm11889_vm13, %v11851_v62, %v3865_v23 }
 0x40e   : > { %v9900_v50 = vsel %vm1489_vm11, %v11876_v0, %v11874_v5  ;;  %6349 = vmatprep.subr.bf16.mxu1 %v7240_v26  ;;  %v11882_v0 = vld [vmem:[#allocation58_spill] sm:$0xff]  ;;  %4283 = vrot.lane.b32.xlu0 %v4219_v17, %s7632_s25  ;;  %11885 = vst [vmem:[#allocation46_spill] sm:$0xff] %v9920_v48  ;;  %v3993_v26 = vld [vmem:[#allocation3 + $0xc4] sm:$0xf]  ;;  %v11891_v17 = vrot.slane %v11866_v53, 4  ;;  %v11892_v49 = vld [vmem:[#allocation60_spill] sm:$0xff] }
 0x40f   : > { %v3589_v45 = vsel %vm1489_vm11, %v11880_v40, %v11878_v61  ;;  %v3805_v5 = vrot.slane %v11882_v0, 4  ;;  %4539 = vrot.lane.b32.xlu1 %v4470_v7, %s7630_s2  ;;  %v11888_v61 = vrot.slane %v11887_v9, 4  ;;  %v9932_v13 = vsel %vm1489_vm11, %v3795_v54, %v11890_v38  ;;  %v11893_v3 = vld [vmem:[#allocation88_spill] sm:$0xff]  ;;  %v11895_v54 = vld [vmem:[#allocation95_spill] sm:$0xff]  ;;  %vm11959_vm13 = vmmov %vm11947_vm1 }
 0x410   : > { %v9937_v7 = vsel %vm1489_vm11, %v3574_v35, %v11891_v17  ;;  %v3810_v36 = vrot.slane %v11892_v49, 4  ;;  %v3815_v60 = vrot.slane %v11893_v3, 4  ;;  %v9941_v28 = vpop.permute.xlu0 %4565  ;;  %v3590_v62 = vsel %vm1657_vm5, %v11879_v39, %v3589_v45 }
 0x411   : > { %v3581_v40 = vsel %vm1489_vm11, %v11888_v61, %v11886_v37  ;;  %6350 = vmatpush2.bf16.msra.mxu1 %v7239_v15  ;;  %v9943_v37 = vpop.permute.xlu1 %3777  ;;  %v11894_v38 = vrot.slane %v11870_v33, 4  ;;  %v11896_v35 = vrot.slane %v9805_v42, 4  ;;  %v11897_v17 = vrot.slane %v9432_v56, 4  ;;  %v11909_v61 = vld [vmem:[#allocation78_spill] sm:$0xff] }
 0x412   : > { %v11494_v22 = vrot.slane %v9941_v28, 4  ;;  %v11495_v15 = vrot.slane %v9943_v37, 4  ;;  %6362 = vmatprep.subr.bf16.mxu1 %v11900_v21  ;;  %4077 = vrot.lane.b32.xlu0 %v3993_v26, %s7633_s26  ;;  %v11901_v45 = vrot.slane %v11883_v31, 4  ;;  %v11904_v21 = vrot.slane %v9471_v1, 4 }
 0x413   : > { %v3833_v23 = vsel %vm1489_vm11, %v3800_v51, %v11894_v38  ;;  %v3367_v53 = vsel %vm1489_vm11, %v11897_v17, %v11896_v35  ;;  %4047 = vrot.lane.b32.xlu1 %v3978_v46, %s7633_s26  ;;  %v3582_v51 = vsel %vm1657_vm5, %v11887_v9, %v3581_v40  ;;  %v11902_v38 = vrot.slane %v11884_v47, 4  ;;  %v11903_v17 = vld [vmem:[#allocation72_spill] sm:$0xff] }
 0x414   : > { %v3841_v39 = vsel %vm1489_vm11, %v3805_v5, %v11901_v45  ;;  %v4645_v26 = vsel %vm1489_vm11, %v11904_v21, %v11494_v22  ;;  %v3857_v9 = vsel %vm1489_vm11, %v3815_v60, %v11495_v15  ;;  %6352 = vmatmul.mubr.bf16.vlgmr.msra.gmra.mxu1 %v9920_v48  ;;  %v7098_v46 = vcombine.high %v3582_v51, %v3590_v62  ;;  %v3983_v5 = vld [vmem:[#allocation3 + $0x74] sm:$0xf]  ;;  %v4244_v40 = vld [vmem:[#allocation3 + $0xec] sm:$0xf]  ;;  %v9981_v45 = vpop.permute.xlu0 %3517 }
 0x415   : > { %v3849_v35 = vsel %vm1489_vm11, %v3810_v36, %v11902_v38  ;;  %11905 = vst [vmem:[#allocation26_spill] sm:$0xff] %v9981_v45  ;;  %v11906_v36 = vcombine.low %v11898_v24, %v11899_v16  ;;  %v9986_v38 = vpop.permute.xlu1 %3259  ;;  %v3858_v21 = vsel %vm11907_vm4, %v11893_v3, %v3857_v9  ;;  %v3368_v22 = vsel %vm1574_vm6, %v9432_v56, %v3367_v53  ;;  %v11908_v15 = vld [vmem:[#allocation84_spill] sm:$0xff]  ;;  %v11913_v56 = vld [vmem:[#allocation63_spill] sm:$0xff]  ;;  %vm11965_vm4 = vmmov %vm11947_vm1 }
 0x416   : > { %v9994_v60 = vsel %vm2005_vm12, %v9471_v1, %v4645_v26  ;;  %6394 = vmatprep.mubr.bf16.mxu1 %v11908_v15  ;;  %v11497_v45 = vrot.slane %v11909_v61, 4  ;;  %v7097_v48 = vcombine.low %v3582_v51, %v3590_v62  ;;  %v3850_v16 = vsel %vm11910_vm9, %v11892_v49, %v3849_v35  ;;  %4057 = vrot.lane.b32.xlu0 %v3983_v5, %s7633_s26  ;;  %v11916_v26 = vld [vmem:[#allocation55_spill] sm:$0xff]  ;;  %vm11967_vm9 = vmmov %vm11947_vm1 }
 0x417   : > { %6363 = vmatpush1.bf16.msra.mxu1 %v11906_v36  ;;  %v11911_v24 = vrot.slane %v11895_v54, 4  ;;  %v11912_v3 = vrot.slane %v9176_v29, 4  ;;  %4333 = vrot.lane.b32.xlu1 %v4244_v40, %s7632_s25  ;;  %v7135_v1 = vcombine.low %v3858_v21, %v3866_v32  ;;  %v7136_v15 = vcombine.high %v3858_v21, %v3866_v32 }
 0x418   : > { %6364 = vmatprep.subr.bf16.mxu1 %v7098_v46  ;;  %v3842_v49 = vsel %vm11914_vm2, %v11882_v0, %v3841_v39  ;;  %v7090_v51 = vcombine.high %v3368_v22, %v9885_v18  ;;  %v11915_v35 = vrot.slane %v11903_v17, 4  ;;  %v11917_v46 = vrot.slane %v11916_v26, 4  ;;  %v10020_v40 = vpop.permute.xlu0 %3497 }
 0x419   : > { %v3359_v9 = vsel %vm1489_vm11, %v11912_v3, %v11911_v24  ;;  %6300 = vmatprep.subr.bf16.mxu0 %v7136_v15  ;;  %11918 = vst [vmem:[#allocation27_spill] sm:$0xff] %v10020_v40  ;;  %v10022_v32 = vpop.permute.xlu1 %3531  ;;  %v7128_v21 = vcombine.high %v3842_v49, %v3850_v16  ;;  %v4234_v24 = vld [vmem:[#allocation3 + $0x9c] sm:$0xf]  ;;  %v3834_v0 = vsel %vm11919_vm7, %v11881_v11, %v3833_v23  ;;  %v11930_v40 = vld [vmem:[#allocation101_spill] sm:$0xff]  ;;  %vm11997_vm2 = vcmask 957440  }
 0x41a   : > { %v3351_v36 = vsel %vm1489_vm11, %v11917_v46, %v11915_v35  ;;  %v3360_v39 = vsel %vm1574_vm6, %v9176_v29, %v3359_v9  ;;  %v11920_v3 = vld [vmem:[#allocation90_spill] sm:$0xff]  ;;  %v11501_v35 = vrot.slane %v9830_v43, 4  ;;  %6301 = vmatpush2.bf16.msra.mxu0 %v7135_v1  ;;  %v11498_v15 = vrot.slane %v10022_v32, 4  ;;  %v3689_v46 = vld [vmem:[#allocation3 + $0x70] sm:$0xf]  ;;  %vm11998_vm7 = vmmov %vm11997_vm2 }
 0x41b   : > { %6365 = vmatpush1.bf16.msra.mxu1 %v7097_v48  ;;  %v3569_v62 = vrot.slane %v11920_v3, 4  ;;  %v11921_v48 = vld [vmem:[#allocation51_spill] sm:$0xff]  ;;  %6302 = vmatprep.subr.bf16.mxu0 %v7128_v21  ;;  %v7089_v11 = vcombine.low %v3368_v22, %v9885_v18  ;;  %v3826_v29 = vsel %vm11923_vm8, %v11877_v44, %v9932_v13  ;;  %v3352_v23 = vsel %vm1574_vm6, %v11916_v26, %v3351_v36  ;;  %v11925_v22 = vld [vmem:[#allocation44_spill] sm:$0xff] }
 0x41c   : > { %6366 = vmatprep.subr.bf16.mxu1 %v7090_v51  ;;  %v11922_v5 = vrot.slane %v11921_v48, 4  ;;  %3763 = vrot.lane.b32.xlu0 %v3689_v46, %s7634_s29  ;;  %v7127_v1 = vcombine.low %v3842_v49, %v3850_v16  ;;  %v7082_v51 = vcombine.high %v3352_v23, %v3360_v39  ;;  %v11924_v18 = vrot.slane %v11913_v56, 4  ;;  %v10053_v13 = vpop.permute.xlu0 %4319 }
 0x41d   : > { %v3611_v9 = vsel %vm1489_vm11, %v3569_v62, %v11498_v15  ;;  %4313 = vrot.lane.b32.xlu1 %v4234_v24, %s7632_s25  ;;  %v11926_v21 = vrot.slane %v11925_v22, 4  ;;  %v10055_v26 = vpop.permute.xlu1 %4311  ;;  %v7120_v36 = vcombine.high %v3826_v29, %v3834_v0  ;;  %v4224_v62 = vld [vmem:[#allocation3 + $0x4c] sm:$0xf]  ;;  %v3620_v16 = vsel %vm1657_vm5, %v11861_v55, %v9937_v7  ;;  %v11928_v24 = vld [vmem:[#allocation99_spill] sm:$0xff]  ;;  %v11931_v15 = vld [vmem:[#allocation65_spill] sm:$0xff] }
 0x41e   : > { %v3343_v53 = vsel %vm1489_vm11, %v11922_v5, %v11497_v45  ;;  %v4731_v5 = vld [vmem:[#allocation3 + $0xc4] sm:$0xf]  ;;  %v11927_v45 = vld [vmem:[#allocation34_spill] sm:$0xff]  ;;  %6303 = vmatpush2.bf16.msra.mxu0 %v7127_v1  ;;  %v3612_v44 = vsel %vm1657_vm5, %v11920_v3, %v3611_v9  ;;  %v11503_v55 = vrot.slane %v11930_v40, 4  ;;  %v7119_v7 = vcombine.low %v3826_v29, %v3834_v0 }
 0x41f   : > { %v3335_v46 = vsel %vm1489_vm11, %v11926_v21, %v11924_v18  ;;  %6367 = vmatpush1.bf16.msra.mxu1 %v7089_v11  ;;  %v3344_v49 = vsel %vm1574_vm6, %v11921_v48, %v3343_v53  ;;  %v11929_v18 = vrot.slane %v9444_v58, 4  ;;  %v11502_v11 = vrot.slane %v10053_v13, 4  ;;  %6304 = vmatprep.subr.bf16.mxu0 %v7120_v36  ;;  %v11934_v29 = vld [vmem:[#allocation75_spill] sm:$0xff]  ;;  %v11937_v36 = vld [vmem:[#allocation80_spill] sm:$0xff] }
 0x420   : > { %6368 = vmatprep.subr.bf16.mxu1 %v7082_v51  ;;  %v7081_v53 = vcombine.low %v3352_v23, %v3360_v39  ;;  %4815 = vrot.lane.b32.xlu0 %v4731_v5, %s7638_s20  ;;  %v3336_v48 = vsel %vm1574_vm6, %v11925_v22, %v3335_v46  ;;  %v11933_v1 = vrot.slane %v9571_v52, 4  ;;  %v10084_v23 = vpop.permute.xlu0 %3761  ;;  %v7112_v51 = vcombine.high %v3612_v44, %v3620_v16  ;;  %v3998_v5 = vld [vmem:[#allocation3 + $0xec] sm:$0xf] }
 0x421   : > { %v3121_v21 = vsel %vm1489_vm11, %v11929_v18, %v11501_v35  ;;  %v11932_v18 = vld [vmem:[#allocation73_spill] sm:$0xff]  ;;  %4293 = vrot.lane.b32.xlu1 %v4224_v62, %s7632_s25  ;;  %v7074_v0 = vcombine.high %v3336_v48, %v3344_v49  ;;  %11935 = vst [vmem:[#allocation22_spill] sm:$0xff] %v10084_v23  ;;  %v10086_v9 = vpop.permute.xlu1 %3053  ;;  %v3679_v62 = vld [vmem:[#allocation3 + $0x20] sm:$0xf]  ;;  %v11956_v23 = vrot.slane %v9115_v14, 4 }
 0x422   : > { %v11504_v35 = vrot.slane %v11932_v18, 4  ;;  %v4399_v3 = vsel %vm1489_vm11, %v11933_v1, %v11502_v11  ;;  %v3122_v22 = vsel %vm11936_vm10, %v9444_v58, %v3121_v21  ;;  %6305 = vmatpush2.bf16.msra.mxu0 %v7119_v7  ;;  %v11938_v11 = vrot.slane %v11928_v24, 4  ;;  %v3699_v21 = vld [vmem:[#allocation3 + $0xc0] sm:$0xf]  ;;  %vm12012_vm10 = vmmov %vm11923_vm8 }
 0x423   : > { %6369 = vmatpush1.bf16.msra.mxu1 %v7081_v53  ;;  %v10092_v46 = vsel %vm1922_vm15, %v9571_v52, %v4399_v3  ;;  %v11939_v53 = vrot.slane %v9182_v63, 4  ;;  %v11940_v52 = vld [vmem:[#allocation82_spill] sm:$0xff]  ;;  %6306 = vmatprep.subr.bf16.mxu0 %v7112_v51  ;;  %v7073_v3 = vcombine.low %v3336_v48, %v3344_v49  ;;  %v3130_v7 = vsel %vm11941_vm14, %v11875_v2, %v9900_v50  ;;  %v10126_v2 = vld [vmem:[%s7780_s0] ss:$16 sps:$4 sm:$0xff]   ;;  %vm12021_vm14 = vmmov %vm11923_vm8 }
 0x424   : > { %6370 = vmatprep.subr.bf16.mxu1 %v7074_v0  ;;  %3743 = vrot.lane.b32.xlu0 %v3679_v62, %s7634_s29  ;;  %v7111_v1 = vcombine.low %v3612_v44, %v3620_v16  ;;  %v7066_v58 = vcombine.high %v3122_v22, %v3130_v7  ;;  %v11944_v49 = vrot.slane %v9152_v25, 4  ;;  %v10121_v51 = vpop.permute.xlu0 %3271  ;;  %v3704_v62 = vld [vmem:[#allocation3 + $0xe8] sm:$0xf]  ;;  %v11948_v16 = vrot.slane %v11934_v29, 4 }
 0x425   : > { %v3113_v43 = vsel %vm1489_vm11, %v11939_v53, %v11938_v11  ;;  %v11942_v11 = vrot.slane %v8982_v34, 4  ;;  %v11943_v53 = vld [vmem:[#allocation67_spill] sm:$0xff]  ;;  %4087 = vrot.lane.b32.xlu1 %v3998_v5, %s7633_s26  ;;  %11945 = vst [vmem:[#allocation57_spill] sm:$0xff] %v10121_v51  ;;  %v10123_v50 = vpop.permute.xlu1 %4291  ;;  %v11949_v5 = vrot.slane %v8926_v20, 4  ;;  %v11954_v51 = vrot.slane %v9077_v57, 4 }
 0x426   : > { %v3105_v48 = vsel %vm1489_vm11, %v11944_v49, %v11504_v35  ;;  %11946 = vst [vmem:[#allocation23_spill] sm:$0xff] %v10123_v50  ;;  %v3114_v44 = vsel %vm11947_vm1, %v9182_v63, %v3113_v43  ;;  %v11951_v49 = vrot.slane %v11824_v19, 4  ;;  %v11952_v35 = vld [vmem:[#allocation85_spill] sm:$0xff]  ;;  %6307 = vmatpush2.bf16.msra.mxu0 %v7111_v1  ;;  %v11953_v43 = vrot.slane %v11931_v15, 4  ;;  %vm12029_vm1 = vmmov %vm11923_vm8 }
 0x427   : > { %v4637_v0 = vsel %vm1489_vm11, %v11942_v11, %v11503_v55  ;;  %6371 = vmatpush1.bf16.msra.mxu1 %v7073_v3  ;;  %v4629_v11 = vsel %vm1489_vm11, %v11949_v5, %v11948_v16  ;;  %v11950_v55 = vrot.slane %v11927_v45, 4  ;;  %v11955_v5 = vrot.slane %v11937_v36, 4 }
 0x428   : > { %6372 = vmatprep.subr.bf16.mxu1 %v7066_v58  ;;  %v4638_v63 = vsel %vm2005_vm12, %v8982_v34, %v4637_v0  ;;  %v3089_v16 = vsel %vm1489_vm11, %v11954_v51, %v11953_v43  ;;  %v7065_v1 = vcombine.low %v3122_v22, %v3130_v7  ;;  %v11958_v58 = vcombine.high %v9994_v60, %v9879_v12  ;;  %v4721_v7 = vld [vmem:[#allocation3 + $0x74] sm:$0xf] }
 0x429   : > { %v4161_v3 = vsel %vm1489_vm11, %v11951_v49, %v11950_v55  ;;  %v3097_v55 = vsel %vm1489_vm11, %v11956_v23, %v11955_v5  ;;  %v11957_v49 = vld [vmem:[#allocation68_spill] sm:$0xff]  ;;  %3783 = vrot.lane.b32.xlu0 %v3699_v21, %s7634_s29  ;;  %v3106_v34 = vsel %vm11959_vm13, %v9152_v25, %v3105_v48  ;;  %v11960_v0 = vrot.slane %v11940_v52, 4  ;;  %3793 = vrot.lane.b32.xlu1 %v3704_v62, %s7634_s29  ;;  %v10174_v25 = vpop.permute.xlu0 %4073  ;;  %v10176_v48 = vpop.permute.xlu1 %3033  ;;  %v3988_v62 = vld [vmem:[#allocation3 + $0x9c] sm:$0xf]  ;;  %vm12041_vm13 = vmmov %vm12029_vm1 }
 0x42a   : > { %6405 = vmatprep.subr.bf16.mxu0 %v11958_v58  ;;  %v11961_v51 = vrot.slane %v8905_v27, 4  ;;  %v7058_v23 = vcombine.high %v3106_v34, %v3114_v44  ;;  %v4630_v22 = vsel %vm2005_vm12, %v8926_v20, %v4629_v11  ;;  %v11962_v5 = vrot.slane %v11943_v53, 4  ;;  %v11963_v58 = vld [vmem:[#allocation28_spill] sm:$0xff]  ;;  %6309 = vmatmul.mubr.bf16.vlgmr.msra.gmra.mxu0 %v10126_v2 }
 0x42b   : > { %v11964_v21 = vrot.slane %v11963_v58, 4  ;;  %6373 = vmatpush1.bf16.msra.mxu1 %v7065_v1  ;;  %v10182_v20 = vsel %vm1839_vm0, %v11824_v19, %v4161_v3  ;;  %v3090_v1 = vsel %vm11967_vm9, %v9077_v57, %v3089_v16  ;;  %v11970_v3 = vld [vmem:[#allocation102_spill] sm:$0xff]  ;;  %v7057_v36 = vcombine.low %v3106_v34, %v3114_v44  ;;  %vm12050_vm9 = vmmov %vm12029_vm1 }
 0x42c   : > { %v4621_v43 = vsel %vm1489_vm11, %v11961_v51, %v11960_v0  ;;  %v7226_v0 = vcombine.high %v4630_v22, %v4638_v63  ;;  %v3098_v51 = vsel %vm11965_vm4, %v9115_v14, %v3097_v55  ;;  %6374 = vmatprep.subr.bf16.mxu1 %v7058_v23  ;;  %v11968_v14 = vrot.slane %v11952_v35, 4  ;;  %v10213_v34 = vld [vmem:[%s7780_s0 + $0xc] ss:$16 sps:$4 sm:$0xff]   ;;  %vm12048_vm4 = vmmov %vm11997_vm2 }
 0x42d   : > { %v4613_v39 = vsel %vm1489_vm11, %v11964_v21, %v11962_v5  ;;  %v11966_v5 = vcombine.low %v9994_v60, %v9879_v12  ;;  %v4622_v21 = vsel %vm2005_vm12, %v8905_v27, %v4621_v43  ;;  %v11969_v55 = vrot.slane %v11797_v4, 4  ;;  %4795 = vrot.lane.b32.xlu0 %v4721_v7, %s7638_s20  ;;  %4067 = vrot.lane.b32.xlu1 %v3988_v62, %s7633_s26 }
 0x42e   : > { %v11507_v11 = vrot.slane %v11970_v3, 4  ;;  %v4614_v12 = vsel %vm2005_vm12, %v11963_v58, %v4613_v39  ;;  %v11971_v57 = vrot.slane %v11957_v49, 4  ;;  %v11972_v60 = vrot.slane %v11792_v8, 4  ;;  %7264 = vmatprep.mubr.msk.bf16.mxu0 %vm6272_vm3, %v10213_v34  ;;  %v11975_v39 = vld [vmem:[#allocation77_spill] sm:$0xff]  ;;  %v10218_v58 = vpop.permute.xlu0 %3741 }
 0x42f   : > { %6406 = vmatpush1.bf16.msra.mxu0 %v11966_v5  ;;  %v4129_v19 = vsel %vm1489_vm11, %v11969_v55, %v11968_v14  ;;  %v11973_v16 = vrot.slane %v10174_v25, 4  ;;  %v11974_v43 = vrot.slane %v9663_v6, 4  ;;  %v7225_v5 = vcombine.low %v4630_v22, %v4638_v63  ;;  %11976 = vst [vmem:[#allocation47_spill] sm:$0xff] %v10218_v58  ;;  %6375 = vmatpush1.bf16.msra.mxu1 %v7057_v36  ;;  %v11978_v22 = vld [vmem:[#allocation37_spill] sm:$0xff] }
 0x430   : > { %6407 = vmatprep.subr.bf16.mxu0 %v7226_v0  ;;  %v4121_v27 = vsel %vm1489_vm11, %v11972_v60, %v11971_v57  ;;  %v7050_v44 = vcombine.high %v3090_v1, %v3098_v51  ;;  %v10220_v0 = vpop.permute.xlu1 %4085  ;;  %v7218_v14 = vcombine.high %v4614_v12, %v4622_v21  ;;  %v4130_v55 = vsel %vm1839_vm0, %v11797_v4, %v4129_v19  ;;  %v3453_v57 = vld [vmem:[#allocation3 + $0xc0] sm:$0xf]  ;;  %v3694_v4 = vld [vmem:[#allocation3 + $0x98] sm:$0xf]  ;;  %v4711_v60 = vld [vmem:[#allocation3 + $0x24] sm:$0xf] }
 0x431   : > { %v4153_v23 = vsel %vm1489_vm11, %v11974_v43, %v11973_v16  ;;  %11977 = vst [vmem:[#allocation49_spill] sm:$0xff] %v10220_v0  ;;  %v11508_v62 = vrot.slane %v11978_v22, 4  ;;  %v11979_v16 = vld [vmem:[#allocation87_spill] sm:$0xff]  ;;  %v7049_v7 = vcombine.low %v3090_v1, %v3098_v51  ;;  %3537 = vrot.lane.b32.xlu0 %v3453_v57, %s7635_s27  ;;  %v11980_v19 = vrot.slane %v11803_v59, 4  ;;  %3773 = vrot.lane.b32.xlu1 %v3694_v4, %s7634_s29  ;;  %v11981_v36 = vld [vmem:[#allocation69_spill] sm:$0xff] }
 0x432   : > { %v10226_v63 = vsel %vm1839_vm0, %v9663_v6, %v4153_v23  ;;  %6376 = vmatprep.subr.bf16.mxu1 %v7050_v44  ;;  %v4122_v6 = vsel %vm1839_vm0, %v11792_v8, %v4121_v27  ;;  %v10244_v1 = vpop.permute.xlu0 %4811  ;;  %v4736_v57 = vld [vmem:[#allocation3 + $0xec] sm:$0xf]  ;;  %v11983_v8 = vrot.slane %v11975_v39, 4  ;;  %v11984_v27 = vrot.slane %v11808_v41, 4 }
 0x433   : > { %6408 = vmatpush1.bf16.msra.mxu0 %v7225_v5  ;;  %v4391_v23 = vsel %vm1489_vm11, %v11980_v19, %v11507_v11  ;;  %v7217_v5 = vcombine.low %v4614_v12, %v4622_v21  ;;  %v7170_v44 = vcombine.high %v4122_v6, %v4130_v55  ;;  %11982 = vst [vmem:[#allocation53_spill] sm:$0xff] %v10244_v1  ;;  %v11510_v21 = vrot.slane %v10244_v1, 4  ;;  %v12034_v1 = vld [vmem:[#allocation64_spill] sm:$0xff] }
 0x434   : > { %6409 = vmatprep.subr.bf16.mxu0 %v7218_v14  ;;  %6377 = vmatpush1.bf16.msra.mxu1 %v7049_v7  ;;  %v10246_v14 = vpop.permute.xlu1 %3013  ;;  %v4383_v43 = vsel %vm1489_vm11, %v11984_v27, %v11983_v8  ;;  %v4392_v12 = vsel %vm1922_vm15, %v11803_v59, %v4391_v23  ;;  %v11985_v7 = vrot.slane %v11829_v30, 4  ;;  %v7169_v19 = vcombine.low %v4122_v6, %v4130_v55  ;;  %v11990_v59 = vld [vmem:[#allocation38_spill] sm:$0xff] }
 0x435   : > { %6378 = vmatprep.subr.bf16.mxu1 %v7170_v44  ;;  %v11986_v11 = vcombine.high %v10092_v46, %v9904_v10  ;;  %4775 = vrot.lane.b32.xlu0 %v4711_v60, %s7638_s20  ;;  %v11987_v8 = vrot.slane %v11979_v16, 4  ;;  %v11991_v23 = vrot.slane %v11990_v59, 4  ;;  %v7530_v55 = vld [vmem:[#allocation3 + $0xb0] ss:$40 sps:$4 sm:$0xff]  }
 0x436   : > { %v4899_v4 = vsel %vm1489_vm11, %v11985_v7, %v11508_v62  ;;  %4825 = vrot.lane.b32.xlu1 %v4736_v57, %s7638_s20  ;;  %v10278_v6 = vpop.permute.xlu0 %3251 }
 0x437   : > { %6410 = vmatpush1.bf16.msra.mxu0 %v7217_v5  ;;  %v11988_v5 = vld [vmem:[#allocation14_spill] sm:$0xff]  ;;  %v4891_v51 = vsel %vm1489_vm11, %v11991_v23, %v11510_v21  ;;  %11992 = vst [vmem:[#allocation58_spill] sm:$0xff] %v10278_v6  ;;  %v10293_v57 = vsel %vm11998_vm7, %v11829_v30, %v4899_v4  ;;  %v12001_v4 = vld [vmem:[#allocation25_spill] sm:$0xff]  ;;  %vm12065_vm7 = vmmov %vm11997_vm2 }
 0x438   : > { %6411 = vmatprep.subr.bf16.mxu0 %v11986_v11  ;;  %v11989_v44 = vrot.slane %v11988_v5, 4  ;;  %v4384_v11 = vsel %vm1922_vm15, %v11808_v41, %v4383_v43  ;;  %6379 = vmatpush2.bf16.msra.mxu1 %v7169_v19  ;;  %v10280_v60 = vpop.permute.xlu1 %4065  ;;  %v10289_v23 = vsel %vm11997_vm2, %v11990_v59, %v4891_v51  ;;  %v11999_v41 = vcombine.low %v10092_v46, %v9904_v10  ;;  %v7528_v51 = vld [vmem:[#allocation3 + $0xac] ss:$40 sps:$4 sm:$0xff]   ;;  %v3684_v59 = vld [vmem:[#allocation3 + $0x48] sm:$0xf] }
 0x439   : > { %11993 = vst [vmem:[#allocation66_spill] sm:$0xff] %v10280_v60  ;;  %v7202_v7 = vcombine.high %v4384_v11, %v4392_v12  ;;  %6380 = vmatprep.subr.bf16.mxu1 %v7530_v55  ;;  %v11514_v21 = vrot.slane %v12001_v4, 4  ;;  %v7201_v6 = vcombine.low %v4384_v11, %v4392_v12  ;;  %v7533_v10 = vld [vmem:[#allocation3 + $0x60] ss:$40 sps:$4 sm:$0xff]   ;;  %v7531_v11 = vld [vmem:[#allocation3 + $0x5c] ss:$40 sps:$4 sm:$0xff]  }
 0x43a   : > { %v4375_v27 = vsel %vm1489_vm11, %v11989_v44, %v11987_v8  ;;  %v11994_v8 = vrot.slane %v11981_v36, 4  ;;  %v11995_v44 = vld [vmem:[#allocation29_spill] sm:$0xff]  ;;  %3753 = vrot.lane.b32.xlu1 %v3684_v59, %s7634_s29  ;;  %v12002_v19 = vld [vmem:[#allocation104_spill] sm:$0xff] }
 0x43b   : > { %v11996_v62 = vrot.slane %v11995_v44, 4  ;;  %6412 = vmatpush1.bf16.msra.mxu0 %v11999_v41  ;;  %v4376_v43 = vsel %vm1922_vm15, %v11988_v5, %v4375_v27  ;;  %v4570_v5 = vpop.permute.xlu0 %4569  ;;  %v4726_v41 = vld [vmem:[#allocation3 + $0x9c] sm:$0xf]  ;;  %v12004_v59 = vld [vmem:[#allocation81_spill] sm:$0xff] }
 0x43c   : > { %6413 = vmatprep.subr.bf16.mxu0 %v7202_v7  ;;  %6381 = vmatpush2.bf16.msra.mxu1 %v7528_v51  ;;  %v10309_v27 = vpop.permute.xlu1 %4045  ;;  %v4605_v35 = vrot.slane %v4570_v5, 4  ;;  %v7536_v4 = vld [vmem:[#allocation3 + $0x10] ss:$40 sps:$4 sm:$0xff]  }
 0x43d   : > { %v4367_v58 = vsel %vm1489_vm11, %v11996_v62, %v11994_v8  ;;  %v12000_v8 = vld [vmem:[#allocation36_spill] sm:$0xff]  ;;  %v12003_v62 = vrot.slane %v9943_v37, 4  ;;  %6382 = vmatprep.subr.bf16.mxu1 %v7533_v10 }
 0x43e   : > { %v11516_v30 = vrot.slane %v12000_v8, 4  ;;  %v4368_v46 = vsel %vm1922_vm15, %v11995_v44, %v4367_v58  ;;  %v12005_v44 = vld [vmem:[#allocation19_spill] sm:$0xff]  ;;  %4805 = vrot.lane.b32.xlu1 %v4726_v41, %s7638_s20  ;;  %v12011_v41 = vld [vmem:[#allocation108_spill] sm:$0xff] }
 0x43f   : > { %v7194_v55 = vcombine.high %v4368_v46, %v4376_v43  ;;  %v3859_v12 = vsel %vm1489_vm11, %v12003_v62, %v11514_v21  ;;  %6414 = vmatpush1.bf16.msra.mxu0 %v7201_v6  ;;  %v12006_v51 = vrot.slane %v12005_v44, 4  ;;  %v7193_v7 = vcombine.low %v4368_v46, %v4376_v43  ;;  %v10326_v6 = vpop.permute.xlu0 %4567  ;;  %v12008_v21 = vld [vmem:[#allocation89_spill] sm:$0xff] }
 0x440   : > { %v3860_v62 = vsel %vm11923_vm8, %v9943_v37, %v3859_v12  ;;  %6383 = vmatpush2.bf16.msra.mxu1 %v7531_v11  ;;  %v10328_v10 = vpop.permute.xlu1 %4823  ;;  %v4604_v8 = vrot.slane %v10326_v6, 4  ;;  %v12009_v43 = vrot.slane %v12002_v19, 4  ;;  %v12010_v46 = vrot.slane %v11884_v47, 4  ;;  %v7534_v11 = vld [vmem:[#allocation3 + $0xc] ss:$40 sps:$4 sm:$0xff]   ;;  %v12017_v37 = vld [vmem:[#allocation83_spill] sm:$0xff]  ;;  %vm12067_vm8 = vmmov %vm11997_vm2 }
 0x441   : > { %6415 = vmatprep.subr.bf16.mxu0 %v7194_v55  ;;  %v3867_v22 = vsel %vm1489_vm11, %v12006_v51, %v11516_v30  ;;  %12007 = vst [vmem:[#allocation74_spill] sm:$0xff] %v10328_v10  ;;  %v3458_v55 = vld [vmem:[#allocation3 + $0xe8] sm:$0xf]  ;;  %6384 = vmatprep.subr.bf16.mxu1 %v7536_v4  ;;  %v12013_v51 = vcombine.high %v10226_v63, %v10182_v20  ;;  %v12014_v30 = vld [vmem:[#allocation70_spill] sm:$0xff]  ;;  %v12015_v19 = vrot.slane %v12004_v59, 4 }
 0x442   : > { %v3851_v5 = vsel %vm1489_vm11, %v12010_v46, %v12009_v43  ;;  %v3868_v12 = vsel %vm12012_vm10, %v12005_v44, %v3867_v22  ;;  %v4649_v4 = vsel %vm1489_vm11, %v4604_v8, %v4605_v35  ;;  %3547 = vrot.lane.b32.xlu1 %v3458_v55, %s7635_s27  ;;  %v12016_v43 = vrot.slane %v11883_v31, 4  ;;  %v4716_v35 = vld [vmem:[#allocation3 + $0x4c] sm:$0xf] }
 0x443   : > { %6416 = vmatpush1.bf16.msra.mxu0 %v7193_v7  ;;  %v7138_v7 = vcombine.high %v3860_v62, %v3868_v12  ;;  %v10354_v44 = vsel %vm2005_vm12, %v10326_v6, %v4649_v4  ;;  %v3852_v55 = vsel %vm12021_vm14, %v11884_v47, %v3851_v5  ;;  %v12022_v59 = vcombine.low %v10226_v63, %v10182_v20  ;;  %v12025_v4 = vld [vmem:[#allocation91_spill] sm:$0xff]  ;;  %v12031_v63 = vld [vmem:[#allocation41_spill] sm:$0xff] }
 0x444   : > { %6417 = vmatprep.subr.bf16.mxu0 %v12013_v51  ;;  %v3843_v46 = vsel %vm1489_vm11, %v12016_v43, %v12015_v19  ;;  %12018 = vst [vmem:[#allocation43_spill] sm:$0xff] %v10354_v44  ;;  %v10356_v51 = vpop.permute.xlu0 %3025  ;;  %6385 = vmatpush2.bf16.msra.mxu1 %v7534_v11  ;;  %v10358_v58 = vpop.permute.xlu1 %4803  ;;  %v12023_v19 = vrot.slane %v12008_v21, 4  ;;  %v12024_v43 = vrot.slane %v11870_v33, 4  ;;  %v7137_v11 = vcombine.low %v3860_v62, %v3868_v12  ;;  %v12026_v44 = vld [vmem:[#allocation105_spill] sm:$0xff] }
 0x445   : > { %12019 = vst [vmem:[#allocation60_spill] sm:$0xff] %v10356_v51  ;;  %12020 = vst [vmem:[#allocation88_spill] sm:$0xff] %v10358_v58  ;;  %6386 = vmatprep.subr.bf16.mxu1 %v7138_v7  ;;  %v12027_v51 = vld [vmem:[#allocation106_spill] sm:$0xff]  ;;  %v3844_v47 = vsel %vm12029_vm1, %v11883_v31, %v3843_v46  ;;  %v12030_v20 = vrot.slane %v12011_v41, 4  ;;  %v12033_v7 = vld [vmem:[#allocation39_spill] sm:$0xff]  ;;  %v12035_v12 = vrot.slane %v12014_v30, 4  ;;  %v12049_v46 = vcombine.high %v10289_v23, %v10293_v57 }
 0x446   : > { %v3835_v6 = vsel %vm1489_vm11, %v12024_v43, %v12023_v19  ;;  %v12028_v49 = vcombine.high %v12026_v44, %v12027_v51  ;;  %4785 = vrot.lane.b32.xlu1 %v4716_v35, %s7638_s20  ;;  %v7130_v62 = vcombine.high %v3844_v47, %v3852_v55  ;;  %v12036_v43 = vld [vmem:[#allocation50_spill] sm:$0xff]  ;;  %v12038_v31 = vld [vmem:[#allocation71_spill] sm:$0xff]  ;;  %v12045_v30 = vrot.slane %v12034_v1, 4 }
 0x447   : > { %6418 = vmatpush1.bf16.msra.mxu0 %v12022_v59  ;;  %v12032_v59 = vrot.slane %v12031_v63, 4  ;;  %v12043_v35 = vld [vmem:[#allocation35_spill] sm:$0xff]  ;;  %v12052_v1 = vld [vmem:[#allocation42_spill] sm:$0xff]  ;;  %vm12135_vm10 = vcmask 89088  }
 0x448   : > { %6419 = vmatprep.subr.bf16.mxu0 %v12028_v49  ;;  %v12037_v49 = vrot.slane %v12036_v43, 4  ;;  %v10390_v41 = vpop.permute.xlu0 %3289  ;;  %6387 = vmatpush2.bf16.msra.mxu1 %v7137_v11  ;;  %v10392_v58 = vpop.permute.xlu1 %4783  ;;  %v12044_v21 = vrot.slane %v12043_v35, 4  ;;  %v12047_v11 = vcombine.low %v12026_v44, %v12027_v51  ;;  %v12054_v44 = vld [vmem:[#allocation31_spill] sm:$0xff]  ;;  %v12059_v51 = vld [vmem:[#allocation40_spill] sm:$0xff]  ;;  %vm12141_vm14 = vmmov %vm12135_vm10 }
 0x449   : > { %v4883_v5 = vsel %vm1489_vm11, %v12032_v59, %v12030_v20  ;;  %12039 = vst [vmem:[#allocation95_spill] sm:$0xff] %v10390_v41  ;;  %12040 = vst [vmem:[#allocation96_spill] sm:$0xff] %v10392_v58  ;;  %v3836_v20 = vsel %vm12041_vm13, %v11870_v33, %v3835_v6  ;;  %v12042_v59 = vrot.slane %v12017_v37, 4  ;;  %6388 = vmatprep.subr.bf16.mxu1 %v7130_v62  ;;  %v12055_v62 = vrot.slane %v12033_v7, 4  ;;  %v12062_v37 = vld [vmem:[#allocation17_spill] sm:$0xff] }
 0x44a   : > { %v3827_v22 = vsel %vm1489_vm11, %v12037_v49, %v12035_v12  ;;  %v12046_v12 = vrot.slane %v10022_v32, 4  ;;  %v4884_v33 = vsel %vm12048_vm4, %v12031_v63, %v4883_v5  ;;  %v7129_v6 = vcombine.low %v3844_v47, %v3852_v55  ;;  %vm12150_vm1 = vmmov %vm12135_vm10 }
 0x44b   : > { %v4875_v19 = vsel %vm1489_vm11, %v12044_v21, %v12042_v59  ;;  %6420 = vmatpush1.bf16.msra.mxu0 %v12047_v11  ;;  %v3828_v21 = vsel %vm12050_vm9, %v12036_v43, %v3827_v22  ;;  %v12051_v59 = vrot.slane %v12025_v4, 4  ;;  %v12056_v11 = vld [vmem:[#allocation21_spill] sm:$0xff]  ;;  %v12060_v7 = vrot.slane %v12059_v51, 4  ;;  %vm12154_vm13 = vmmov %vm12150_vm1 }
 0x44c   : > { %v3613_v49 = vsel %vm1489_vm11, %v12046_v12, %v12045_v30  ;;  %6431 = vmatprep.subr.bf16.mxu0 %v12049_v46  ;;  %v12053_v30 = vrot.slane %v12052_v1, 4  ;;  %v12057_v63 = vrot.slane %v12056_v11, 4  ;;  %v7122_v47 = vcombine.high %v3828_v21, %v3836_v20  ;;  %v10431_v43 = vpop.permute.xlu0 %4321  ;;  %6389 = vmatpush2.bf16.msra.mxu1 %v7129_v6  ;;  %v10433_v46 = vpop.permute.xlu1 %3527  ;;  %v12066_v6 = vld [vmem:[#allocation48_spill] sm:$0xff]  ;;  %vm12155_vm4 = vmmov %vm12150_vm1 }
 0x44d   : > { %v4876_v5 = vsel %vm11997_vm2, %v12043_v35, %v4875_v19  ;;  %v3614_v22 = vsel %vm1657_vm5, %v10022_v32, %v3613_v49  ;;  %v12063_v19 = vrot.slane %v9941_v28, 4  ;;  %v12064_v35 = vcombine.low %v10289_v23, %v10293_v57  ;;  %v12069_v23 = vld [vmem:[#allocation32_spill] sm:$0xff]  ;;  %vm12160_vm9 = vmmov %vm12150_vm1 }
 0x44e   : > { %v4867_v12 = vsel %vm1489_vm11, %v12053_v30, %v12051_v59  ;;  %v3621_v55 = vsel %vm1489_vm11, %v12057_v63, %v12055_v62  ;;  %v7250_v59 = vcombine.high %v4876_v5, %v4884_v33  ;;  %v12058_v30 = vrot.slane %v12038_v31, 4  ;;  %v12061_v62 = vld [vmem:[#allocation93_spill] sm:$0xff]  ;;  %6390 = vmatprep.subr.bf16.mxu1 %v7122_v47 }
 0x44f   : > { %v4647_v32 = vsel %vm1489_vm11, %v12063_v19, %v4604_v8  ;;  %6432 = vmatpush2.bf16.msra.mxu0 %v12064_v35  ;;  %v4868_v49 = vsel %vm12065_vm7, %v12052_v1, %v4867_v12  ;;  %v7249_v58 = vcombine.low %v4876_v5, %v4884_v33  ;;  %v12068_v19 = vrot.slane %v12054_v44, 4  ;;  %v12071_v35 = vld [vmem:[#allocation92_spill] sm:$0xff]  ;;  %v12076_v5 = vld [vmem:[#allocation62_spill] sm:$0xff]  ;;  %vm12175_vm7 = vmmov %vm11997_vm2 }
 0x450   : > { %v4859_v4 = vsel %vm1489_vm11, %v12060_v7, %v12058_v30  ;;  %v3622_v7 = vsel %vm1657_vm5, %v12056_v11, %v3621_v55  ;;  %v7121_v30 = vcombine.low %v3828_v21, %v3836_v20  ;;  %6433 = vmatprep.subr.bf16.mxu0 %v7250_v59  ;;  %v12070_v57 = vrot.slane %v12069_v23, 4  ;;  %v10461_v12 = vpop.permute.xlu0 %4549  ;;  %v10463_v31 = vpop.permute.xlu1 %3507  ;;  %v12073_v21 = vld [vmem:[#allocation94_spill] sm:$0xff] }
 0x451   : > { %v7114_v63 = vcombine.high %v3614_v22, %v3622_v7  ;;  %v4860_v8 = vsel %vm12067_vm8, %v12059_v51, %v4859_v4  ;;  %12072 = vst [vmem:[#allocation97_spill] sm:$0xff] %v10461_v12  ;;  %v4648_v33 = vsel %vm2005_vm12, %v9941_v28, %v4647_v32  ;;  %v12074_v4 = vrot.slane %v12062_v37, 4  ;;  %v12082_v37 = vld [vmem:[#allocation24_spill] sm:$0xff]  ;;  %vm12181_vm8 = vmmov %vm11997_vm2 }
 0x452   : > { %v4655_v47 = vsel %vm1489_vm11, %v12070_v57, %v12068_v19  ;;  %6391 = vmatpush2.bf16.msra.mxu1 %v7121_v30  ;;  %v7242_v20 = vcombine.high %v4860_v8, %v4868_v49  ;;  %v12075_v51 = vrot.slane %v11930_v40, 4  ;;  %v12077_v30 = vrot.slane %v12061_v62, 4 }
 0x453   : > { %6434 = vmatpush2.bf16.msra.mxu0 %v7249_v58  ;;  %6392 = vmatprep.subr.bf16.mxu1 %v7114_v63  ;;  %v12078_v19 = vrot.slane %v11934_v29, 4  ;;  %v7113_v1 = vcombine.low %v3614_v22, %v3622_v7  ;;  %v11540_v28 = vrot.slane %v10390_v41, 4  ;;  %v4656_v32 = vsel %vm2005_vm12, %v12069_v23, %v4655_v47 }
 0x454   : > { %v4639_v55 = vsel %vm1489_vm11, %v12075_v51, %v12074_v4  ;;  %6435 = vmatprep.subr.bf16.mxu0 %v7242_v20  ;;  %v12079_v11 = vrot.slane %v12066_v6, 4  ;;  %v12080_v4 = vld [vmem:[#allocation76_spill] sm:$0xff]  ;;  %v7241_v63 = vcombine.low %v4860_v8, %v4868_v49  ;;  %v7236_v59 = vcombine.high %v4648_v33, %v4656_v32  ;;  %v10488_v44 = vpop.permute.xlu0 %3043  ;;  %v10490_v22 = vpop.permute.xlu1 %3791  ;;  %v12084_v20 = vld [vmem:[#allocation61_spill] sm:$0xff] }
 0x455   : > { %v4631_v57 = vsel %vm1489_vm11, %v12078_v19, %v12077_v30  ;;  %v12081_v51 = vrot.slane %v12080_v4, 4  ;;  %v12083_v7 = vrot.slane %v12071_v35, 4  ;;  %v12085_v30 = vrot.slane %v12084_v20, 4 }
 0x456   : > { %6393 = vmatpush2.bf16.msra.mxu1 %v7113_v1  ;;  %v4632_v47 = vsel %vm2005_vm12, %v11934_v29, %v4631_v57  ;;  %v4640_v49 = vsel %vm2005_vm12, %v11930_v40, %v4639_v55  ;;  %v12086_v8 = vrot.slane %v12076_v5, 4  ;;  %v12089_v29 = vrot.slane %v11943_v53, 4  ;;  %v12090_v40 = vld [vmem:[#allocation98_spill] sm:$0xff]  ;;  %v12098_v55 = vld [vmem:[#allocation107_spill] sm:$0xff] }
 0x457   : > { %v3591_v58 = vsel %vm1489_vm11, %v12081_v51, %v12079_v11  ;;  %v3583_v23 = vsel %vm1489_vm11, %v12085_v30, %v12083_v7  ;;  %v12087_v11 = vrot.slane %v11940_v52, 4  ;;  %6436 = vmatpush2.bf16.msra.mxu0 %v7241_v63  ;;  %6491 = vmatprep.subr.bf16.mxu1 %v7236_v59  ;;  %v12088_v7 = vrot.slane %v12073_v21, 4  ;;  %v12091_v30 = vld [vmem:[#allocation18_spill] sm:$0xff]  ;;  %v12093_v59 = vld [vmem:[#allocation20_spill] sm:$0xff] }
 0x458   : > { %v3592_v51 = vsel %vm1657_vm5, %v12080_v4, %v3591_v58  ;;  %v7235_v4 = vcombine.low %v4648_v33, %v4656_v32  ;;  %v12096_v58 = vld [vmem:[#allocation100_spill] sm:$0xff]  ;;  %v12099_v41 = vrot.slane %v12082_v37, 4  ;;  %v10536_v33 = vpop.permute.xlu0 %4075  ;;  %v10538_v32 = vpop.permute.xlu1 %3301  ;;  %v12103_v62 = vrot.slane %v10431_v43, 4 }
 0x459   : > { %v4623_v1 = vsel %vm1489_vm11, %v12087_v11, %v12086_v8  ;;  %v4615_v57 = vsel %vm1489_vm11, %v12089_v29, %v12088_v7  ;;  %v12092_v8 = vrot.slane %v9805_v42, 4  ;;  %v12094_v11 = vld [vmem:[#allocation113_spill] sm:$0xff]  ;;  %v12097_v21 = vld [vmem:[#allocation52_spill] sm:$0xff]  ;;  %6395 = vmatmul.mubr.bf16.vlgmr.msra.gmra.mxu1 %v10126_v2  ;;  %v3584_v7 = vsel %vm1657_vm5, %v12084_v20, %v3583_v23 }
 0x45a   : > { %v12095_v19 = vcombine.high %v12093_v59, %v12094_v11  ;;  %v7228_v29 = vcombine.high %v4632_v47, %v4640_v49  ;;  %6492 = vmatpush1.bf16.msra.mxu1 %v7235_v4  ;;  %v7100_v2 = vcombine.high %v3584_v7, %v3592_v51  ;;  %v4624_v20 = vsel %vm2005_vm12, %v11940_v52, %v4623_v1 }
 0x45b   : > { %v3369_v63 = vsel %vm1489_vm11, %v12092_v8, %v11540_v28  ;;  %v12100_v8 = vld [vmem:[#allocation15_spill] sm:$0xff]  ;;  %v12104_v5 = vrot.slane %v10053_v13, 4  ;;  %v4616_v52 = vsel %vm2005_vm12, %v11943_v53, %v4615_v57  ;;  %v12106_v1 = vrot.slane %v12091_v30, 4  ;;  %7265 = vmatprep.mubr.msk.bf16.mxu1 %vm6272_vm3, %v10213_v34  ;;  %v12111_v53 = vld [vmem:[#allocation33_spill] sm:$0xff] }
 0x45c   : > { %6448 = vmatprep.subr.bf16.mxu0 %v12095_v19  ;;  %v12101_v28 = vrot.slane %v12100_v8, 4  ;;  %v12102_v19 = vld [vmem:[#allocation46_spill] sm:$0xff]  ;;  %6493 = vmatprep.subr.bf16.mxu1 %v7228_v29  ;;  %v3370_v4 = vsel %vm1574_vm6, %v9805_v42, %v3369_v63  ;;  %v12110_v42 = vrot.slane %v12097_v21, 4  ;;  %v12112_v57 = vrot.slane %v12111_v53, 4 }
 0x45d   : > { %6438 = vmatmul.mubr.bf16.vlgmr.msra.gmra.mxu0 %v12102_v19  ;;  %v12107_v19 = vrot.slane %v11895_v54, 4  ;;  %v7099_v29 = vcombine.low %v3584_v7, %v3592_v51  ;;  %v12114_v51 = vrot.slane %v11913_v56, 4  ;;  %v12115_v7 = vrot.slane %v12098_v55, 4 }
 0x45e   : > { %v3377_v6 = vsel %vm1489_vm11, %v12101_v28, %v12099_v41  ;;  %v4401_v41 = vsel %vm1489_vm11, %v12104_v5, %v12103_v62  ;;  %v12105_v28 = vcombine.low %v12093_v59, %v12094_v11  ;;  %v7227_v62 = vcombine.low %v4632_v47, %v4640_v49  ;;  %v10576_v49 = vld [vmem:[%s7780_s0 + $0x4] ss:$16 sps:$4 sm:$0xff]  }
 0x45f   : > { %v3361_v23 = vsel %vm1489_vm11, %v12107_v19, %v12106_v1  ;;  %v12108_v5 = vrot.slane %v12090_v40, 4  ;;  %v12109_v59 = vrot.slane %v11903_v17, 4  ;;  %v4409_v63 = vsel %vm1489_vm11, %v12112_v57, %v12110_v42  ;;  %6480 = vmatprep.mubr.bf16.mxu0 %v10576_v49  ;;  %v10581_v1 = vpop.permute.xlu1 %3771  ;;  %v12117_v42 = vld [vmem:[#allocation109_spill] sm:$0xff] }
 0x460   : > { %6449 = vmatpush1.bf16.msra.mxu0 %v12105_v28  ;;  %v7220_v47 = vcombine.high %v4616_v52, %v4624_v20  ;;  %v10579_v28 = vpop.permute.xlu0 %3005  ;;  %6494 = vmatpush1.bf16.msra.mxu1 %v7227_v62  ;;  %v4402_v19 = vsel %vm1922_vm15, %v10053_v13, %v4401_v41  ;;  %v12118_v57 = vrot.slane %v10055_v26, 4  ;;  %v12119_v12 = vrot.slane %v11970_v3, 4 }
 0x461   : > { %6450 = vmatprep.subr.bf16.mxu0 %v7100_v2  ;;  %v3353_v11 = vsel %vm1489_vm11, %v12109_v59, %v12108_v5  ;;  %v3378_v2 = vsel %vm1574_vm6, %v12100_v8, %v3377_v6  ;;  %v12113_v5 = vrot.slane %v12096_v58, 4  ;;  %v12116_v8 = vrot.slane %v11975_v39, 4 }
 0x462   : > { %v7092_v34 = vcombine.high %v3370_v4, %v3378_v2  ;;  %v4393_v13 = vsel %vm1489_vm11, %v12119_v12, %v12118_v57  ;;  %6495 = vmatprep.subr.bf16.mxu1 %v7220_v47  ;;  %v12121_v55 = vrot.slane %v11909_v61, 4  ;;  %v7219_v62 = vcombine.low %v4616_v52, %v4624_v20 }
 0x463   : > { %v3337_v6 = vsel %vm1489_vm11, %v12114_v51, %v12113_v5  ;;  %v4385_v59 = vsel %vm1489_vm11, %v12116_v8, %v12115_v7  ;;  %v3362_v5 = vsel %vm1574_vm6, %v11895_v54, %v3361_v23  ;;  %v12120_v51 = vrot.slane %v9986_v38, 4 }
 0x464   : > { %6451 = vmatpush1.bf16.msra.mxu0 %v7099_v29  ;;  %v11544_v8 = vrot.slane %v10488_v44, 4  ;;  %v4410_v12 = vsel %vm1922_vm15, %v12111_v53, %v4409_v63  ;;  %v7091_v57 = vcombine.low %v3370_v4, %v3378_v2  ;;  %v3354_v29 = vsel %vm1574_vm6, %v11903_v17, %v3353_v11  ;;  %v10617_v41 = vpop.permute.xlu0 %4813  ;;  %6496 = vmatpush1.bf16.msra.mxu1 %v7219_v62  ;;  %v12127_v62 = vld [vmem:[#allocation30_spill] sm:$0xff]  ;;  %v12130_v11 = vld [vmem:[#allocation56_spill] sm:$0xff] }
 0x465   : > { %v3345_v7 = vsel %vm1489_vm11, %v12121_v55, %v12120_v51  ;;  %6452 = vmatprep.subr.bf16.mxu0 %v7092_v34  ;;  %v7212_v47 = vcombine.high %v4402_v19, %v4410_v12  ;;  %v3338_v54 = vsel %vm1574_vm6, %v11913_v56, %v3337_v6  ;;  %v11545_v23 = vrot.slane %v10086_v9, 4  ;;  %v10619_v55 = vpop.permute.xlu1 %3281 }
 0x466   : > { %v7084_v34 = vcombine.high %v3354_v29, %v3362_v5  ;;  %v4386_v20 = vsel %vm1922_vm15, %v11975_v39, %v4385_v59  ;;  %v4394_v4 = vsel %vm1922_vm15, %v11970_v3, %v4393_v13  ;;  %v12122_v17 = vrot.slane %v10123_v50, 4  ;;  %v12126_v3 = vld [vmem:[#allocation110_spill] sm:$0xff] }
 0x467   : > { %v12123_v52 = vrot.slane %v11979_v16, 4  ;;  %6497 = vmatprep.subr.bf16.mxu1 %v7212_v47  ;;  %v3346_v53 = vsel %vm1574_vm6, %v11909_v61, %v3345_v7  ;;  %v12124_v63 = vrot.slane %v12117_v42, 4  ;;  %v12125_v39 = vrot.slane %v11981_v36, 4  ;;  %v12129_v47 = vld [vmem:[#allocation111_spill] sm:$0xff] }
 0x468   : > { %6453 = vmatpush1.bf16.msra.mxu0 %v7091_v57  ;;  %v12128_v13 = vrot.slane %v12127_v62, 4  ;;  %v7211_v57 = vcombine.low %v4402_v19, %v4410_v12  ;;  %v11547_v61 = vrot.slane %v12129_v47, 4  ;;  %v11546_v7 = vrot.slane %v10220_v0, 4  ;;  %v10653_v42 = vpop.permute.xlu0 %4529 }
 0x469   : > { %v4377_v56 = vsel %vm1489_vm11, %v12123_v52, %v12122_v17  ;;  %v4369_v2 = vsel %vm1489_vm11, %v12125_v39, %v12124_v63  ;;  %6454 = vmatprep.subr.bf16.mxu0 %v7084_v34  ;;  %v7083_v17 = vcombine.low %v3354_v29, %v3362_v5  ;;  %v7204_v52 = vcombine.high %v4386_v20, %v4394_v4  ;;  %v12131_v39 = vld [vmem:[#allocation16_spill] sm:$0xff] }
 0x46a   : > { %v3123_v51 = vsel %vm1489_vm11, %v12128_v13, %v11544_v8  ;;  %v12132_v6 = vrot.slane %v12131_v39, 4  ;;  %6498 = vmatpush1.bf16.msra.mxu1 %v7211_v57  ;;  %v10655_v13 = vpop.permute.xlu1 %3751  ;;  %v7076_v19 = vcombine.high %v3338_v54, %v3346_v53  ;;  %v4378_v12 = vsel %vm1922_vm15, %v11979_v16, %v4377_v56 }
 0x46b   : > { %v12133_v29 = vrot.slane %v10536_v33, 4  ;;  %v12134_v34 = vrot.slane %v10174_v25, 4  ;;  %6499 = vmatprep.subr.bf16.mxu1 %v7204_v52  ;;  %v4370_v57 = vsel %vm1922_vm15, %v11981_v36, %v4369_v2  ;;  %v12137_v16 = vrot.slane %v11928_v24, 4 }
 0x46c   : > { %v3131_v59 = vsel %vm1489_vm11, %v12132_v6, %v11545_v23  ;;  %6455 = vmatpush1.bf16.msra.mxu0 %v7083_v17  ;;  %v3124_v6 = vsel %vm12135_vm10, %v12127_v62, %v3123_v51  ;;  %v12136_v23 = vrot.slane %v10176_v48, 4  ;;  %v7203_v63 = vcombine.low %v4386_v20, %v4394_v4  ;;  %vm12185_vm10 = vmmov %vm11997_vm2 }
 0x46d   : > { %v4155_v8 = vsel %vm1489_vm11, %v12134_v34, %v12133_v29  ;;  %6456 = vmatprep.subr.bf16.mxu0 %v7076_v19  ;;  %v12138_v29 = vrot.slane %v12126_v3, 4  ;;  %v12139_v17 = vrot.slane %v11932_v18, 4  ;;  %v12140_v36 = vrot.slane %v11927_v45, 4  ;;  %v12144_v34 = vld [vmem:[#allocation79_spill] sm:$0xff] }
 0x46e   : > { %v3115_v56 = vsel %vm1489_vm11, %v12137_v16, %v12136_v23  ;;  %v7075_v62 = vcombine.low %v3338_v54, %v3346_v53  ;;  %v3132_v23 = vsel %vm12141_vm14, %v12131_v39, %v3131_v59  ;;  %v7196_v51 = vcombine.high %v4370_v57, %v4378_v12  ;;  %6500 = vmatpush1.bf16.msra.mxu1 %v7203_v63  ;;  %v10699_v54 = vpop.permute.xlu1 %3261  ;;  %v12146_v39 = vld [vmem:[#allocation59_spill] sm:$0xff]  ;;  %vm12190_vm14 = vmmov %vm11997_vm2 }
 0x46f   : > { %v3107_v52 = vsel %vm1489_vm11, %v12139_v17, %v12138_v29  ;;  %v4163_v2 = vsel %vm1489_vm11, %v12140_v36, %v11546_v7  ;;  %v12142_v20 = vrot.slane %v11931_v15, 4  ;;  %v12143_v19 = vrot.slane %v12130_v11, 4  ;;  %v10697_v17 = vpop.permute.xlu0 %4037 }
 0x470   : > { %v12145_v16 = vrot.slane %v12144_v34, 4  ;;  %v7068_v53 = vcombine.high %v3124_v6, %v3132_v23  ;;  %v4156_v59 = vsel %vm1839_vm0, %v10174_v25, %v4155_v8  ;;  %v12147_v7 = vrot.slane %v10280_v60, 4  ;;  %6457 = vmatpush1.bf16.msra.mxu0 %v7075_v62  ;;  %6501 = vmatprep.subr.bf16.mxu1 %v7196_v51 }
 0x471   : > { %v3091_v4 = vsel %vm1489_vm11, %v12142_v20, %v11547_v61  ;;  %v12148_v20 = vld [vmem:[#allocation103_spill] sm:$0xff]  ;;  %v3116_v63 = vsel %vm12150_vm1, %v11928_v24, %v3115_v56  ;;  %v11556_v8 = vrot.slane %v10309_v27, 4  ;;  %v7195_v36 = vcombine.low %v4370_v57, %v4378_v12  ;;  %v12156_v57 = vld [vmem:[#allocation88_spill] sm:$0xff]  ;;  %vm12195_vm1 = vmmov %vm11997_vm2 }
 0x472   : > { %v4139_v29 = vsel %vm1489_vm11, %v12145_v16, %v12143_v19  ;;  %v12149_v61 = vrot.slane %v12148_v20, 4  ;;  %v12151_v19 = vrot.slane %v10246_v14, 4  ;;  %v12152_v16 = vld [vmem:[#allocation80_spill] sm:$0xff]  ;;  %6458 = vmatprep.subr.bf16.mxu0 %v7068_v53  ;;  %v7067_v62 = vcombine.low %v3124_v6, %v3132_v23  ;;  %v10723_v11 = vpop.permute.xlu1 %3545 }
 0x473   : > { %v12153_v0 = vrot.slane %v12152_v16, 4  ;;  %v3108_v51 = vsel %vm12154_vm13, %v11932_v18, %v3107_v52  ;;  %v4324_v56 = vpop.permute.xlu0 %4323  ;;  %6502 = vmatpush1.bf16.msra.mxu1 %v7195_v36  ;;  %v4140_v12 = vsel %vm1839_vm0, %v12144_v34, %v4139_v29  ;;  %v12158_v18 = vld [vmem:[#allocation53_spill] sm:$0xff]  ;;  %v12162_v34 = vld [vmem:[#allocation68_spill] sm:$0xff]  ;;  %v12164_v36 = vld [vmem:[#allocation54_spill] sm:$0xff]  ;;  %vm12212_vm13 = vcmask 7168  }
 0x474   : > { %v4147_v5 = vsel %vm1489_vm11, %v12149_v61, %v12147_v7  ;;  %v4164_v61 = vsel %vm1839_vm0, %v11927_v45, %v4163_v2  ;;  %v11555_v7 = vrot.slane %v10328_v10, 4  ;;  %v7060_v60 = vcombine.high %v3108_v51, %v3116_v63  ;;  %6459 = vmatpush1.bf16.msra.mxu0 %v7067_v62 }
 0x475   : > { %v3099_v25 = vsel %vm1489_vm11, %v12153_v0, %v12151_v19  ;;  %v7188_v24 = vcombine.high %v4156_v59, %v4164_v61  ;;  %v3092_v0 = vsel %vm12155_vm4, %v11931_v15, %v3091_v4  ;;  %v4148_v45 = vsel %vm1839_vm0, %v12148_v20, %v4147_v5  ;;  %v12165_v19 = vld [vmem:[#allocation85_spill] sm:$0xff]  ;;  %vm12213_vm4 = vmmov %vm12212_vm13 }
 0x476   : > { %v12157_v2 = vrot.slane %v10617_v41, 4  ;;  %v12159_v52 = vrot.slane %v12158_v18, 4  ;;  %v4359_v53 = vrot.slane %v4324_v56, 4  ;;  %v3100_v15 = vsel %vm12160_vm9, %v12152_v16, %v3099_v25  ;;  %6460 = vmatprep.subr.bf16.mxu0 %v7060_v60  ;;  %v10760_v50 = vpop.permute.xlu1 %3055  ;;  %vm12221_vm9 = vmmov %vm12213_vm4 }
 0x477   : > { %6503 = vmatprep.subr.bf16.mxu1 %v7188_v24  ;;  %v12161_v4 = vrot.slane %v12146_v39, 4  ;;  %v12163_v29 = vrot.slane %v12162_v34, 4  ;;  %v12166_v6 = vrot.slane %v12165_v19, 4  ;;  %v7187_v62 = vcombine.low %v4156_v59, %v4164_v61  ;;  %v12167_v24 = vld [vmem:[#allocation37_spill] sm:$0xff]  ;;  %v10758_v20 = vpop.permute.xlu0 %3781 }
 0x478   : > { %v4893_v23 = vsel %vm1489_vm11, %v12159_v52, %v12157_v2  ;;  %v12168_v16 = vrot.slane %v12167_v24, 4  ;;  %v12169_v56 = vrot.slane %v10431_v43, 4  ;;  %12170 = vst [vmem:[#allocation72_spill] sm:$0xff] %v10758_v20  ;;  %v12171_v61 = vrot.slane %v12156_v57, 4  ;;  %v12180_v57 = vld [vmem:[#allocation26_spill] sm:$0xff] }
 0x479   : > { %v4123_v5 = vsel %vm1489_vm11, %v12163_v29, %v12161_v4  ;;  %v4131_v2 = vsel %vm1489_vm11, %v12166_v6, %v11556_v8  ;;  %v7059_v4 = vcombine.low %v3108_v51, %v3116_v63  ;;  %v7180_v29 = vcombine.high %v4140_v12, %v4148_v45  ;;  %6504 = vmatpush1.bf16.msra.mxu1 %v7187_v62  ;;  %v12174_v51 = vld [vmem:[#allocation96_spill] sm:$0xff] }
 0x47a   : > { %v4901_v25 = vsel %vm1489_vm11, %v12168_v16, %v11555_v7  ;;  %v4403_v52 = vsel %vm1489_vm11, %v12169_v56, %v4359_v53  ;;  %v7052_v6 = vcombine.high %v3092_v0, %v3100_v15  ;;  %v4894_v60 = vsel %vm11997_vm2, %v12158_v18, %v4893_v23  ;;  %v12172_v16 = vld [vmem:[#allocation108_spill] sm:$0xff]  ;;  %vm12226_vm2 = vmmov %vm12213_vm4 }
 0x47b   : > { %v10766_v59 = vsel %vm1922_vm15, %v10431_v43, %v4403_v52  ;;  %v12173_v7 = vrot.slane %v12172_v16, 4  ;;  %6461 = vmatpush1.bf16.msra.mxu0 %v7059_v4  ;;  %6505 = vmatprep.subr.bf16.mxu1 %v7180_v29  ;;  %v4132_v62 = vsel %vm1839_vm0, %v12165_v19, %v4131_v2  ;;  %v7179_v56 = vcombine.low %v4140_v12, %v4148_v45  ;;  %v12177_v52 = vld [vmem:[#allocation83_spill] sm:$0xff]  ;;  %v10787_v2 = vpop.permute.xlu0 %3291  ;;  %v10789_v12 = vpop.permute.xlu1 %4579 }
 0x47c   : > { %6462 = vmatprep.subr.bf16.mxu0 %v7052_v6  ;;  %v4124_v18 = vsel %vm1839_vm0, %v12162_v34, %v4123_v5  ;;  %v4902_v43 = vsel %vm12175_vm7, %v12167_v24, %v4901_v25  ;;  %v12176_v23 = vrot.slane %v12164_v36, 4  ;;  %v12178_v8 = vrot.slane %v12177_v52, 4  ;;  %v12183_v24 = vld [vmem:[#allocation91_spill] sm:$0xff]  ;;  %vm12231_vm7 = vmmov %vm12226_vm2 }
 0x47d   : > { %v4885_v63 = vsel %vm1489_vm11, %v12173_v7, %v12171_v61  ;;  %v12179_v61 = vld [vmem:[#allocation45_spill] sm:$0xff]  ;;  %v7051_v29 = vcombine.low %v3092_v0, %v3100_v15  ;;  %v7260_v53 = vcombine.high %v4894_v60, %v4902_v43  ;;  %v3563_v19 = vrot.slane %v12180_v57, 4  ;;  %6506 = vmatpush1.bf16.msra.mxu1 %v7179_v56  ;;  %v12186_v6 = vld [vmem:[#allocation71_spill] sm:$0xff] }
 0x47e   : > { %v4877_v7 = vsel %vm1489_vm11, %v12178_v8, %v12176_v23  ;;  %v11560_v4 = vrot.slane %v12179_v61, 4  ;;  %v7172_v45 = vcombine.high %v4124_v18, %v4132_v62  ;;  %v4886_v34 = vsel %vm12181_vm8, %v12172_v16, %v4885_v63  ;;  %vm12234_vm8 = vmmov %vm12226_vm2 }
 0x47f   : > { %v12182_v5 = vrot.slane %v12174_v51, 4  ;;  %v12184_v25 = vrot.slane %v12183_v24, 4  ;;  %v3568_v0 = vrot.slane %v10433_v46, 4  ;;  %6463 = vmatpush1.bf16.msra.mxu0 %v7051_v29  ;;  %6517 = vmatprep.subr.bf16.mxu1 %v7260_v53  ;;  %v7259_v57 = vcombine.low %v4894_v60, %v4902_v43  ;;  %v12188_v51 = vld [vmem:[#allocation86_spill] sm:$0xff]  ;;  %v10809_v46 = vpop.permute.xlu0 %4303  ;;  %v10811_v53 = vpop.permute.xlu1 %3035 }
 0x480   : > { %6464 = vmatprep.subr.bf16.mxu0 %v7172_v45  ;;  %v4878_v15 = vsel %vm12185_vm10, %v12177_v52, %v4877_v7  ;;  %v12187_v56 = vrot.slane %v12186_v6, 4  ;;  %v7171_v63 = vcombine.low %v4124_v18, %v4132_v62  ;;  %v12189_v36 = vrot.slane %v12188_v51, 4  ;;  %v7539_v60 = vld [vmem:[#allocation3 + $0xb8] ss:$40 sps:$4 sm:$0xff]  }
 0x481   : > { %v4869_v8 = vsel %vm1489_vm11, %v12184_v25, %v12182_v5  ;;  %v7252_v23 = vcombine.high %v4878_v15, %v4886_v34  ;;  %6518 = vmatpush2.bf16.msra.mxu1 %v7259_v57  ;;  %v12191_v52 = vld [vmem:[#allocation27_spill] sm:$0xff]  ;;  %v12192_v29 = vld [vmem:[#allocation22_spill] sm:$0xff]  ;;  %v12193_v25 = vld [vmem:[#allocation112_spill] sm:$0xff] }
 0x482   : > { %v4861_v16 = vsel %vm1489_vm11, %v12187_v56, %v11560_v4  ;;  %v3601_v5 = vsel %vm1489_vm11, %v12189_v36, %v3563_v19  ;;  %v4870_v43 = vsel %vm12190_vm14, %v12183_v24, %v4869_v8  ;;  %v3553_v7 = vrot.slane %v12191_v52, 4  ;;  %v7537_v24 = vld [vmem:[#allocation3 + $0xb4] ss:$40 sps:$4 sm:$0xff]  }
 0x483   : > { %v12194_v62 = vrot.slane %v12193_v25, 4  ;;  %v3558_v56 = vrot.slane %v10463_v31, 4  ;;  %6465 = vmatpush2.bf16.msra.mxu0 %v7171_v63  ;;  %6519 = vmatprep.subr.bf16.mxu1 %v7252_v23  ;;  %v7251_v19 = vcombine.low %v4878_v15, %v4886_v34  ;;  %v4862_v57 = vsel %vm12195_vm1, %v12186_v6, %v4861_v16  ;;  %v10825_v4 = vpop.permute.xlu0 %3535  ;;  %v10827_v45 = vpop.permute.xlu1 %4559  ;;  %v12198_v16 = vld [vmem:[#allocation81_spill] sm:$0xff] }
 0x484   : > { %6466 = vmatprep.subr.bf16.mxu0 %v7539_v60  ;;  %v7244_v8 = vcombine.high %v4862_v57, %v4870_v43  ;;  %v3602_v31 = vsel %vm1657_vm5, %v12188_v51, %v3601_v5  ;;  %v12196_v34 = vrot.slane %v12071_v35, 4  ;;  %v12197_v6 = vrot.slane %v12192_v29, 4  ;;  %v12202_v51 = vld [vmem:[#allocation57_spill] sm:$0xff]  ;;  %v7540_v29 = vld [vmem:[#allocation3 + $0x64] ss:$40 sps:$4 sm:$0xff]  }
 0x485   : > { %v3609_v18 = vsel %vm1489_vm11, %v12194_v62, %v3568_v0  ;;  %6520 = vmatpush2.bf16.msra.mxu1 %v7251_v19  ;;  %v7542_v0 = vld [vmem:[#allocation3 + $0x68] ss:$40 sps:$4 sm:$0xff]   ;;  %v12199_v23 = vrot.slane %v12198_v16, 4  ;;  %v3327_v36 = vrot.slane %v10787_v2, 4  ;;  %v3317_v5 = vrot.slane %v12202_v51, 4 }
 0x486   : > { %v3610_v63 = vsel %vm1657_vm5, %v12193_v25, %v3609_v18  ;;  %v3585_v15 = vsel %vm1489_vm11, %v12196_v34, %v3553_v7  ;;  %v12200_v62 = vld [vmem:[#allocation48_spill] sm:$0xff]  ;;  %6521 = vmatprep.subr.bf16.mxu1 %v7244_v8  ;;  %v12203_v7 = vrot.slane %v10758_v20, 4  ;;  %v12204_v18 = vld [vmem:[#allocation25_spill] sm:$0xff] }
 0x487   : > { %v3845_v60 = vsel %vm1489_vm11, %v12199_v23, %v12197_v6  ;;  %v12201_v19 = vrot.slane %v12200_v62, 4  ;;  %6467 = vmatpush2.bf16.msra.mxu0 %v7537_v24  ;;  %v12205_v34 = vrot.slane %v12204_v18, 4  ;;  %v7243_v6 = vcombine.low %v4862_v57, %v4870_v43  ;;  %v12208_v8 = vld [vmem:[#allocation36_spill] sm:$0xff]  ;;  %v10859_v10 = vpop.permute.xlu0 %3045  ;;  %v10861_v20 = vpop.permute.xlu1 %3015 }
 0x488   : > { %6468 = vmatprep.subr.bf16.mxu0 %v7542_v0  ;;  %v3332_v23 = vrot.slane %v10538_v32, 4  ;;  %v12207_v24 = vrot.slane %v10490_v22, 4  ;;  %v12209_v51 = vrot.slane %v12208_v8, 4  ;;  %v3586_v43 = vsel %vm1657_vm5, %v12071_v35, %v3585_v15  ;;  %v12210_v0 = vld [vmem:[#allocation95_spill] sm:$0xff] }
 0x489   : > { %v3593_v52 = vsel %vm1489_vm11, %v12201_v19, %v3558_v56  ;;  %v3861_v61 = vsel %vm1489_vm11, %v12205_v34, %v12203_v7  ;;  %v7110_v56 = vcombine.high %v3602_v31, %v3610_v63  ;;  %v12206_v19 = vld [vmem:[#allocation47_spill] sm:$0xff]  ;;  %6522 = vmatpush2.bf16.msra.mxu1 %v7243_v6  ;;  %v3322_v57 = vrot.slane %v10619_v55, 4  ;;  %v12216_v55 = vld [vmem:[#allocation104_spill] sm:$0xff] }
 0x48a   : > { %v3869_v25 = vsel %vm1489_vm11, %v12209_v51, %v12207_v24  ;;  %v7545_v7 = vld [vmem:[#allocation3 + $0x18] ss:$40 sps:$4 sm:$0xff]   ;;  %v3594_v32 = vsel %vm1657_vm5, %v12200_v62, %v3593_v52  ;;  %v12211_v34 = vrot.slane %v12210_v0, 4  ;;  %v3862_v6 = vsel %vm12212_vm13, %v12204_v18, %v3861_v61 }
 0x48b   : > { %6469 = vmatpush2.bf16.msra.mxu0 %v7540_v29  ;;  %6534 = vmatprep.subr.bf16.mxu1 %v7110_v56  ;;  %v10875_v24 = vsel %vm12213_vm4, %v12198_v16, %v3845_v60  ;;  %v12214_v35 = vrot.slane %v12090_v40, 4  ;;  %v12215_v52 = vrot.slane %v10581_v1, 4  ;;  %v12217_v62 = vrot.slane %v12216_v55, 4  ;;  %v12218_v56 = vld [vmem:[#allocation58_spill] sm:$0xff] }
 0x48c   : > { %v3371_v2 = vsel %vm1489_vm11, %v12211_v34, %v3327_v36  ;;  %6470 = vmatprep.subr.bf16.mxu0 %v7545_v7  ;;  %v7109_v36 = vcombine.low %v3602_v31, %v3610_v63  ;;  %v3307_v61 = vrot.slane %v12218_v56, 4  ;;  %v12219_v18 = vrot.slane %v12082_v37, 4  ;;  %v7543_v60 = vld [vmem:[#allocation3 + $0x14] ss:$40 sps:$4 sm:$0xff]   ;;  %v10891_v34 = vld [vmem:[%s7780_s0 + $0x8] ss:$16 sps:$4 sm:$0xff]   ;;  %v10901_v63 = vpop.permute.xlu0 %4283  ;;  %v10903_v56 = vpop.permute.xlu1 %4539 }
 0x48d   : > { %v3355_v15 = vsel %vm1489_vm11, %v12214_v35, %v3317_v5  ;;  %v3853_v51 = vsel %vm1489_vm11, %v12217_v62, %v12215_v52  ;;  %12220 = vst [vmem:[#allocation84_spill] sm:$0xff] %v10891_v34  ;;  %6524 = vmatmul.mubr.bf16.vlgmr.msra.gmra.mxu1 %v10891_v34  ;;  %v3870_v5 = vsel %vm12221_vm9, %v12208_v8, %v3869_v25  ;;  %v12222_v52 = vrot.slane %v12206_v19, 4  ;;  %v12223_v62 = vld [vmem:[#allocation70_spill] sm:$0xff]  ;;  %v12228_v34 = vld [vmem:[#allocation89_spill] sm:$0xff] }
 0x48e   : > { %v3379_v16 = vsel %vm1489_vm11, %v12219_v18, %v3332_v23  ;;  %v7102_v35 = vcombine.high %v3586_v43, %v3594_v32  ;;  %v12224_v7 = vrot.slane %v12223_v62, 4  ;;  %6535 = vmatpush1.bf16.msra.mxu1 %v7109_v36  ;;  %v7140_v23 = vcombine.high %v3862_v6, %v3870_v5  ;;  %6566 = vmatprep.mubr.bf16.mxu1 %v10576_v49 }
 0x48f   : > { %v3372_v18 = vsel %vm1574_vm6, %v12210_v0, %v3371_v2  ;;  %v12225_v25 = vrot.slane %v12091_v30, 4  ;;  %v3312_v29 = vrot.slane %v10699_v54, 4  ;;  %6471 = vmatpush2.bf16.msra.mxu0 %v7543_v60  ;;  %v3356_v36 = vsel %vm1574_vm6, %v12090_v40, %v3355_v15  ;;  %v12232_v15 = vld [vmem:[#allocation60_spill] sm:$0xff] }
 0x490   : > { %v3829_v31 = vsel %vm1489_vm11, %v12224_v7, %v12222_v52  ;;  %6536 = vmatprep.subr.bf16.mxu1 %v7102_v35  ;;  %v3854_v52 = vsel %vm12226_vm2, %v12216_v55, %v3853_v51  ;;  %v12227_v7 = vrot.slane %v10655_v13, 4  ;;  %v12229_v2 = vrot.slane %v12228_v34, 4  ;;  %6472 = vmatprep.subr.bf16.mxu0 %v7140_v23  ;;  %v10931_v23 = vpop.permute.xlu1 %4047 }
 0x491   : > { %v3363_v8 = vsel %vm1489_vm11, %v12225_v25, %v3322_v57  ;;  %v3572_v0 = vrot.slane %v10825_v4, 4  ;;  %v7101_v57 = vcombine.low %v3586_v43, %v3594_v32  ;;  %v3380_v54 = vsel %vm1574_vm6, %v12082_v37, %v3379_v16 }
 0x492   : > { %v3837_v49 = vsel %vm1489_vm11, %v12229_v2, %v12227_v7  ;;  %v12230_v60 = vrot.slane %v12096_v58, 4  ;;  %v7139_v51 = vcombine.low %v3862_v6, %v3870_v5  ;;  %v7094_v35 = vcombine.high %v3372_v18, %v3380_v54  ;;  %v4078_v2 = vpop.permute.xlu0 %4077 }
 0x493   : > { %v3830_v40 = vsel %vm12231_vm7, %v12223_v62, %v3829_v31  ;;  %v3071_v25 = vrot.slane %v12232_v15, 4  ;;  %v3577_v7 = vrot.slane %v10723_v11, 4  ;;  %6537 = vmatpush1.bf16.msra.mxu1 %v7101_v57  ;;  %v7132_v43 = vcombine.high %v10875_v24, %v3854_v52  ;;  %v12235_v62 = vld [vmem:[#allocation97_spill] sm:$0xff]  ;;  %vm12300_vm7 = vmmov %vm12226_vm2 }
 0x494   : > { %v3339_v55 = vsel %vm1489_vm11, %v12230_v60, %v3307_v61  ;;  %v3364_v37 = vsel %vm1574_vm6, %v12091_v30, %v3363_v8  ;;  %v12233_v32 = vrot.slane %v9986_v38, 4  ;;  %v3081_v61 = vrot.slane %v10859_v10, 4  ;;  %6473 = vmatpush2.bf16.msra.mxu0 %v7139_v51  ;;  %6538 = vmatprep.subr.bf16.mxu1 %v7094_v35  ;;  %v12236_v60 = vld [vmem:[#allocation64_spill] sm:$0xff] }
 0x495   : > { %v4113_v16 = vrot.slane %v4078_v2, 4  ;;  %v3838_v5 = vsel %vm12234_vm8, %v12228_v34, %v3837_v49  ;;  %v4595_v31 = vrot.slane %v12235_v62, 4  ;;  %v4610_v57 = vrot.slane %v10789_v12, 4  ;;  %6474 = vmatprep.subr.bf16.mxu0 %v7132_v43  ;;  %v12239_v12 = vld [vmem:[#allocation39_spill] sm:$0xff]  ;;  %v10961_v43 = vpop.permute.xlu1 %4333 }
 0x496   : > { %v3347_v6 = vsel %vm1489_vm11, %v12233_v32, %v3312_v29  ;;  %v12237_v30 = vrot.slane %v12236_v60, 4  ;;  %v7093_v29 = vcombine.low %v3372_v18, %v3380_v54  ;;  %v3086_v10 = vrot.slane %v10760_v50, 4  ;;  %v10959_v32 = vpop.permute.xlu0 %4057 }
 0x497   : > { %v12238_v51 = vrot.slane %v10536_v33, 4  ;;  %v7131_v34 = vcombine.low %v10875_v24, %v3854_v52  ;;  %v7086_v49 = vcombine.high %v3356_v36, %v3364_v37  ;;  %v12240_v15 = vrot.slane %v12239_v12, 4 }
 0x498   : > { %v3615_v8 = vsel %vm1489_vm11, %v12237_v30, %v3572_v0  ;;  %6539 = vmatpush1.bf16.msra.mxu1 %v7093_v29  ;;  %v7124_v18 = vcombine.high %v3830_v40, %v3838_v5  ;;  %v3348_v50 = vsel %vm1574_vm6, %v9986_v38, %v3347_v6  ;;  %v3076_v24 = vrot.slane %v10811_v53, 4 }
 0x499   : > { %v4157_v35 = vsel %vm1489_vm11, %v12238_v51, %v4113_v16  ;;  %v3623_v2 = vsel %vm1489_vm11, %v12240_v15, %v3577_v7  ;;  %v12241_v52 = vrot.slane %v10488_v44, 4  ;;  %6475 = vmatpush2.bf16.msra.mxu0 %v7131_v34  ;;  %6540 = vmatprep.subr.bf16.mxu1 %v7086_v49  ;;  %v3616_v62 = vsel %vm1657_vm5, %v12236_v60, %v3615_v8  ;;  %v12246_v8 = vld [vmem:[#allocation93_spill] sm:$0xff] }
 0x49a   : > { %v10967_v54 = vsel %vm1839_vm0, %v10536_v33, %v4157_v35  ;;  %v3340_v30 = vsel %vm1574_vm6, %v12096_v58, %v3339_v55  ;;  %v12242_v38 = vrot.slane %v12126_v3, 4  ;;  %v12243_v33 = vld [vmem:[#allocation31_spill] sm:$0xff]  ;;  %v4600_v51 = vrot.slane %v10827_v45, 4  ;;  %6476 = vmatprep.subr.bf16.mxu0 %v7124_v18 }
 0x49b   : > { %v3125_v16 = vsel %vm1489_vm11, %v12241_v52, %v3081_v61  ;;  %v12244_v29 = vrot.slane %v12243_v33, 4  ;;  %v7085_v61 = vcombine.low %v3356_v36, %v3364_v37  ;;  %v12245_v35 = vrot.slane %v10086_v9, 4 }
 0x49c   : > { %v3109_v6 = vsel %vm1489_vm11, %v12242_v38, %v3071_v25  ;;  %v7123_v60 = vcombine.low %v3830_v40, %v3838_v5  ;;  %v3624_v58 = vsel %vm1657_vm5, %v12239_v12, %v3623_v2  ;;  %v7078_v55 = vcombine.high %v3340_v30, %v3348_v50  ;;  %v11002_v12 = vpop.permute.xlu1 %4313 }
 0x49d   : > { %v4657_v53 = vsel %vm1489_vm11, %v12244_v29, %v4610_v57  ;;  %v3133_v34 = vsel %vm1489_vm11, %v12245_v35, %v3086_v10  ;;  %v12247_v49 = vrot.slane %v12246_v8, 4  ;;  %v3061_v15 = vrot.slane %v10579_v28, 4  ;;  %v10993_v57 = vpop.permute.xlu0 %3763  ;;  %6541 = vmatpush1.bf16.msra.mxu1 %v7085_v61  ;;  %v12258_v35 = vld [vmem:[#allocation94_spill] sm:$0xff] }
 0x49e   : > { %v7116_v45 = vcombine.high %v3616_v62, %v3624_v58  ;;  %vm12248_vm6 = vcmask 89088   ;;  %v4585_v37 = vrot.slane %v10653_v42, 4  ;;  %v12249_v40 = vrot.slane %v10176_v48, 4  ;;  %6477 = vmatpush2.bf16.msra.mxu0 %v7123_v60  ;;  %6542 = vmatprep.subr.bf16.mxu1 %v7078_v55  ;;  %v12260_v60 = vld [vmem:[#allocation62_spill] sm:$0xff] }
 0x49f   : > { %v4633_v25 = vsel %vm1489_vm11, %v12247_v49, %v4595_v31  ;;  %v3126_v36 = vsel %vm12248_vm6, %v10488_v44, %v3125_v16  ;;  %v3066_v10 = vrot.slane %v10861_v20, 4  ;;  %v4658_v28 = vsel %vm2005_vm12, %v12243_v33, %v4657_v53  ;;  %v12250_v31 = vld [vmem:[#allocation17_spill] sm:$0xff]  ;;  %vm12252_vm10 = vmmov %vm12248_vm6  ;;  %v12255_v53 = vld [vmem:[#allocation43_spill] sm:$0xff] }
 0x4a0   : > { %v3117_v5 = vsel %vm1489_vm11, %v12249_v40, %v3076_v24  ;;  %v12251_v2 = vrot.slane %v12250_v31, 4  ;;  %v4590_v44 = vrot.slane %v10903_v56, 4  ;;  %6478 = vmatprep.subr.bf16.mxu0 %v7116_v45  ;;  %v7077_v42 = vcombine.low %v3340_v30, %v3348_v50  ;;  %vm12253_vm14 = vmmov %vm12248_vm6 }
 0x4a1   : > { %v3134_v24 = vsel %vm12252_vm10, %v10086_v9, %v3133_v34  ;;  %v7115_v52 = vcombine.low %v3616_v62, %v3624_v58  ;;  %v3110_v16 = vsel %vm12253_vm14, %v12126_v3, %v3109_v6  ;;  %v12254_v38 = vrot.slane %v12129_v47, 4  ;;  %v4816_v29 = vpop.permute.xlu0 %4815  ;;  %vm12256_vm1 = vmmov %vm12248_vm6  ;;  %v4294_v6 = vpop.permute.xlu1 %4293 }
 0x4a2   : > { %v4641_v18 = vsel %vm1489_vm11, %v12251_v2, %v4600_v51  ;;  %v7070_v20 = vcombine.high %v3126_v36, %v3134_v24  ;;  %6543 = vmatpush1.bf16.msra.mxu1 %v7077_v42  ;;  %v7238_v51 = vcombine.high %v12255_v53, %v4658_v28  ;;  %v3118_v56 = vsel %vm12256_vm1, %v10176_v48, %v3117_v5  ;;  %v11041_v5 = vld [vmem:[%s7780_s0] ss:$16 sps:$4 sm:$0xff]   ;;  %vm12263_vm13 = vmmov %vm12256_vm1  ;;  %v7561_v42 = vld [vmem:[%s7780_s0 + $0xc] ss:$16 sps:$4 sm:$0xff]  }
 0x4a3   : > { %v3093_v33 = vsel %vm1489_vm11, %v12254_v38, %v3061_v15  ;;  %v4634_v50 = vsel %vm2005_vm12, %v12246_v8, %v4633_v25  ;;  %v12257_v9 = vrot.slane %v10246_v14, 4  ;;  %v4098_v3 = vrot.slane %v10931_v23, 4  ;;  %6479 = vmatpush2.bf16.msra.mxu0 %v7115_v52  ;;  %vm12267_vm9 = vmmov %vm12256_vm1 }
 0x4a4   : > { %v4851_v30 = vrot.slane %v4816_v29, 4  ;;  %6544 = vmatprep.subr.bf16.mxu1 %v7070_v20  ;;  %v4642_v61 = vsel %vm2005_vm12, %v12250_v31, %v4641_v18  ;;  %v12259_v34 = vrot.slane %v12258_v35, 4  ;;  %v12261_v58 = vrot.slane %v12260_v60, 4  ;;  %6577 = vmatprep.subr.bf16.mxu0 %v7238_v51  ;;  %vm12302_vm6 = vmmov %vm12226_vm2 }
 0x4a5   : > { %v3101_v62 = vsel %vm1489_vm11, %v12257_v9, %v3066_v10  ;;  %v4364_v8 = vrot.slane %v10961_v43, 4  ;;  %v7069_v49 = vcombine.low %v3126_v36, %v3134_v24  ;;  %v4093_v23 = vrot.slane %v10697_v17, 4  ;;  %v11066_v20 = vpop.permute.xlu0 %3743 }
 0x4a6   : > { %v4617_v48 = vsel %vm1489_vm11, %v12259_v34, %v4585_v37  ;;  %v4625_v55 = vsel %vm1489_vm11, %v12261_v58, %v4590_v44  ;;  %v12262_v25 = vrot.slane %v10617_v41, 4  ;;  %v7237_v45 = vcombine.low %v12255_v53, %v4658_v28  ;;  %6481 = vmatmul.mubr.bf16.vlgmr.msra.gmra.mxu0 %v11041_v5  ;;  %v4088_v28 = vpop.permute.xlu1 %4087  ;;  %v12272_v58 = vld [vmem:[#allocation23_spill] sm:$0xff] }
 0x4a7   : > { %v7062_v40 = vcombine.high %v3110_v16, %v3118_v56  ;;  %6545 = vmatpush1.bf16.msra.mxu1 %v7069_v49  ;;  %v7230_v37 = vcombine.high %v4634_v50, %v4642_v61  ;;  %v3102_v43 = vsel %vm12263_vm13, %v10246_v14, %v3101_v62  ;;  %vm12264_vm4 = vcmask 957440   ;;  %7266 = vmatprep.mubr.msk.bf16.mxu0 %vm6272_vm3, %v7561_v42  ;;  %v7551_v42 = vld [vmem:[#allocation3 + $0x70] ss:$40 sps:$4 sm:$0xff]   ;;  %vm12292_vm3 = vmmov %vm12226_vm2 }
 0x4a8   : > { %v4895_v15 = vsel %vm1489_vm11, %v12262_v25, %v4851_v30  ;;  %v12265_v36 = vrot.slane %v10309_v27, 4  ;;  %6578 = vmatpush1.bf16.msra.mxu0 %v7237_v45  ;;  %v4626_v31 = vsel %vm2005_vm12, %v12260_v60, %v4625_v55  ;;  %v12266_v2 = vrot.slane %v12097_v21, 4 }
 0x4a9   : > { %v11048_v17 = vsel %vm12264_vm4, %v10617_v41, %v4895_v15  ;;  %6546 = vmatprep.subr.bf16.mxu1 %v7062_v40  ;;  %v4354_v14 = vrot.slane %v11002_v12, 4  ;;  %v7061_v44 = vcombine.low %v3110_v16, %v3118_v56  ;;  %6579 = vmatprep.subr.bf16.mxu0 %v7230_v37  ;;  %v3094_v41 = vsel %vm12267_vm9, %v12129_v47, %v3093_v33  ;;  %v12274_v15 = vld [vmem:[#allocation109_spill] sm:$0xff] }
 0x4aa   : > { %v4133_v10 = vsel %vm1489_vm11, %v12265_v36, %v4098_v3  ;;  %v4411_v18 = vsel %vm1489_vm11, %v12266_v2, %v4364_v8  ;;  %v12268_v24 = vrot.slane %v12146_v39, 4  ;;  %v7229_v38 = vcombine.low %v4634_v50, %v4642_v61  ;;  %v3794_v33 = vpop.permute.xlu1 %3793  ;;  %v12270_v61 = vld [vmem:[#allocation107_spill] sm:$0xff] }
 0x4ab   : > { %v7054_v29 = vcombine.high %v3094_v41, %v3102_v43  ;;  %v4618_v53 = vsel %vm2005_vm12, %v12258_v35, %v4617_v48  ;;  %v4349_v12 = vrot.slane %v10809_v46, 4  ;;  %6547 = vmatpush1.bf16.msra.mxu1 %v7061_v44  ;;  %v4134_v47 = vsel %vm1839_vm0, %v10309_v27, %v4133_v10  ;;  %v3784_v48 = vpop.permute.xlu0 %3783  ;;  %vm12285_vm12 = vmmov %vm12226_vm2 }
 0x4ac   : > { %v4125_v52 = vsel %vm1489_vm11, %v12268_v24, %v4093_v23  ;;  %v7222_v16 = vcombine.high %v4618_v53, %v4626_v31  ;;  %6580 = vmatpush1.bf16.msra.mxu0 %v7229_v38  ;;  %v4412_v51 = vsel %vm1922_vm15, %v12097_v21, %v4411_v18  ;;  %v12269_v56 = vrot.slane %v10055_v26, 4  ;;  %v7546_v18 = vld [vmem:[#allocation3 + $0xbc] ss:$40 sps:$4 sm:$0xff]   ;;  %v12278_v38 = vld [vmem:[#allocation72_spill] sm:$0xff] }
 0x4ad   : > { %6548 = vmatprep.subr.bf16.mxu1 %v7054_v29  ;;  %v4344_v9 = vrot.slane %v4294_v6, 4  ;;  %v7053_v62 = vcombine.low %v3094_v41, %v3102_v43  ;;  %v4126_v46 = vsel %vm1839_vm0, %v12146_v39, %v4125_v52  ;;  %v7221_v3 = vcombine.low %v4618_v53, %v4626_v31 }
 0x4ae   : > { %v4395_v50 = vsel %vm1489_vm11, %v12269_v56, %v4354_v14  ;;  %6581 = vmatprep.subr.bf16.mxu0 %v7222_v16  ;;  %v7174_v30 = vcombine.high %v4126_v46, %v4134_v47  ;;  %v12271_v27 = vrot.slane %v12270_v61, 4  ;;  %v4339_v34 = vrot.slane %v10901_v63, 4  ;;  %v4068_v60 = vpop.permute.xlu1 %4067  ;;  %v7548_v63 = vld [vmem:[#allocation3 + $0xc0] ss:$40 sps:$4 sm:$0xff]  }
 0x4af   : > { %6549 = vmatpush1.bf16.msra.mxu1 %v7053_v62  ;;  %v7214_v21 = vcombine.high %v10766_v59, %v4412_v51  ;;  %v4396_v6 = vsel %vm1922_vm15, %v10055_v26, %v4395_v50  ;;  %v12273_v39 = vrot.slane %v12272_v58, 4  ;;  %v4118_v8 = vrot.slane %v4088_v28, 4  ;;  %v12276_v28 = vld [vmem:[#allocation49_spill] sm:$0xff]  ;;  %v4796_v44 = vpop.permute.xlu0 %4795 }
 0x4b0   : > { %v4387_v35 = vsel %vm1489_vm11, %v12271_v27, %v4349_v12  ;;  %6582 = vmatpush1.bf16.msra.mxu0 %v7221_v3  ;;  %6550 = vmatprep.subr.bf16.mxu1 %v7174_v30  ;;  %v7173_v49 = vcombine.low %v4126_v46, %v4134_v47  ;;  %v7213_v23 = vcombine.low %v10766_v59, %v4412_v51  ;;  %v12275_v45 = vrot.slane %v12274_v15, 4  ;;  %v12281_v51 = vld [vmem:[#allocation66_spill] sm:$0xff]  ;;  %v7549_v62 = vld [vmem:[#allocation3 + $0x6c] ss:$40 sps:$4 sm:$0xff]  }
 0x4b1   : > { %v4379_v55 = vsel %vm1489_vm11, %v12273_v39, %v4344_v9  ;;  %6583 = vmatprep.subr.bf16.mxu0 %v7214_v21  ;;  %v4388_v25 = vsel %vm1922_vm15, %v12270_v61, %v4387_v35  ;;  %v3819_v26 = vrot.slane %v3784_v48, 4  ;;  %v3824_v43 = vrot.slane %v3794_v33, 4  ;;  %v12283_v46 = vld [vmem:[#allocation56_spill] sm:$0xff] }
 0x4b2   : > { %v4371_v40 = vsel %vm1489_vm11, %v12275_v45, %v4339_v34  ;;  %v7206_v37 = vcombine.high %v4388_v25, %v4396_v6  ;;  %v3774_v36 = vpop.permute.xlu1 %3773  ;;  %v4380_v10 = vsel %vm1922_vm15, %v12272_v58, %v4379_v55  ;;  %v12277_v59 = vrot.slane %v12276_v28, 4  ;;  %v7554_v35 = vld [vmem:[#allocation3 + $0x20] ss:$40 sps:$4 sm:$0xff]   ;;  %v12288_v55 = vld [vmem:[#allocation74_spill] sm:$0xff] }
 0x4b3   : > { %6551 = vmatpush2.bf16.msra.mxu1 %v7173_v49  ;;  %v4108_v2 = vrot.slane %v4068_v60, 4  ;;  %v4103_v14 = vrot.slane %v10959_v32, 4  ;;  %v7205_v41 = vcombine.low %v4388_v25, %v4396_v6  ;;  %v4372_v24 = vsel %vm1922_vm15, %v12274_v15, %v4371_v40  ;;  %vm12286_vm15 = vmmov %vm12226_vm2  ;;  %v3538_v60 = vpop.permute.xlu0 %3537  ;;  %v12290_v25 = vld [vmem:[#allocation22_spill] sm:$0xff] }
 0x4b4   : > { %6584 = vmatpush1.bf16.msra.mxu0 %v7213_v23  ;;  %6552 = vmatprep.subr.bf16.mxu1 %v7548_v63  ;;  %v4165_v31 = vsel %vm1489_vm11, %v12277_v59, %v4118_v8  ;;  %v7198_v52 = vcombine.high %v4372_v24, %v4380_v10  ;;  %v12279_v29 = vrot.slane %v12278_v38, 4  ;;  %v12280_v12 = vrot.slane %v10490_v22, 4  ;;  %v7552_v63 = vld [vmem:[#allocation3 + $0x1c] ss:$40 sps:$4 sm:$0xff]  }
 0x4b5   : > { %6585 = vmatprep.subr.bf16.mxu0 %v7206_v37  ;;  %v3814_v47 = vrot.slane %v3774_v36, 4  ;;  %v4166_v32 = vsel %vm1839_vm0, %v12276_v28, %v4165_v31  ;;  %v12282_v56 = vrot.slane %v12281_v51, 4  ;;  %v12284_v3 = vrot.slane %v12283_v46, 4 }
 0x4b6   : > { %v3863_v53 = vsel %vm1489_vm11, %v12279_v29, %v3819_v26  ;;  %v3871_v16 = vsel %vm1489_vm11, %v12280_v12, %v3824_v43  ;;  %v4826_v33 = vpop.permute.xlu1 %4825  ;;  %v3809_v61 = vrot.slane %v10993_v57, 4  ;;  %v7197_v27 = vcombine.low %v4372_v24, %v4380_v10 }
 0x4b7   : > { %6553 = vmatpush2.bf16.msra.mxu1 %v7546_v18  ;;  %v4149_v50 = vsel %vm1489_vm11, %v12282_v56, %v4108_v2  ;;  %v4856_v9 = vrot.slane %v4826_v33, 4  ;;  %v4141_v30 = vsel %vm1489_vm11, %v12284_v3, %v4103_v14  ;;  %v7190_v34 = vcombine.high %v10967_v54, %v4166_v32 }
 0x4b8   : > { %6586 = vmatpush1.bf16.msra.mxu0 %v7205_v41  ;;  %6554 = vmatprep.subr.bf16.mxu1 %v7551_v42  ;;  %v3864_v21 = vsel %vm12285_vm12, %v12278_v38, %v3863_v53  ;;  %v3872_v48 = vsel %vm12286_vm15, %v10490_v22, %v3871_v16  ;;  %v12287_v6 = vrot.slane %v10581_v1, 4  ;;  %v4150_v57 = vsel %vm1839_vm0, %v12281_v51, %v4149_v50  ;;  %v4776_v41 = vpop.permute.xlu0 %4775  ;;  %v12298_v53 = vld [vmem:[#allocation88_spill] sm:$0xff] }
 0x4b9   : > { %6587 = vmatprep.subr.bf16.mxu0 %v7198_v52  ;;  %v12289_v8 = vrot.slane %v12288_v55, 4  ;;  %v4142_v22 = vsel %vm1839_vm0, %v12283_v46, %v4141_v30  ;;  %v12291_v15 = vrot.slane %v12290_v25, 4  ;;  %v3799_v40 = vrot.slane %v11066_v20, 4  ;;  %vm12294_vm0 = vmmov %vm12264_vm4  ;;  %v12296_v52 = vld [vmem:[#allocation54_spill] sm:$0xff] }
 0x4ba   : > { %v3855_v58 = vsel %vm1489_vm11, %v12287_v6, %v3814_v47  ;;  %v3754_v39 = vpop.permute.xlu1 %3753  ;;  %v7189_v37 = vcombine.low %v10967_v54, %v4166_v32  ;;  %v7142_v26 = vcombine.high %v3864_v21, %v3872_v48  ;;  %v4841_v43 = vrot.slane %v4796_v44, 4  ;;  %vm12301_vm8 = vmmov %vm12294_vm0 }
 0x4bb   : > { %6555 = vmatpush2.bf16.msra.mxu1 %v7549_v62  ;;  %v4903_v49 = vsel %vm1489_vm11, %v12289_v8, %v4856_v9  ;;  %v3804_v23 = vrot.slane %v3754_v39, 4  ;;  %v3847_v45 = vsel %vm1489_vm11, %v12291_v15, %v3809_v61  ;;  %v7182_v36 = vcombine.high %v4142_v22, %v4150_v57  ;;  %vm12303_vm10 = vmmov %vm12294_vm0 }
 0x4bc   : > { %6588 = vmatpush1.bf16.msra.mxu0 %v7197_v27  ;;  %6556 = vmatprep.subr.bf16.mxu1 %v7554_v35  ;;  %v3856_v10 = vsel %vm12292_vm3, %v10581_v1, %v3855_v58  ;;  %v12293_v28 = vrot.slane %v10655_v13, 4  ;;  %v4904_v2 = vsel %vm12294_vm0, %v12288_v55, %v4903_v49  ;;  %v7141_v18 = vcombine.low %v3864_v21, %v3872_v48  ;;  %v12306_v58 = vld [vmem:[#allocation96_spill] sm:$0xff]  ;;  %vm12308_vm14 = vmmov %vm12294_vm0 }
 0x4bd   : > { %6589 = vmatprep.subr.bf16.mxu0 %v7190_v34  ;;  %v3848_v54 = vsel %vm12226_vm2, %v12290_v25, %v3847_v45  ;;  %v12295_v14 = vrot.slane %v12206_v19, 4  ;;  %v3573_v44 = vrot.slane %v3538_v60, 4  ;;  %v7181_v42 = vcombine.low %v4142_v22, %v4150_v57  ;;  %v12304_v34 = vld [vmem:[#allocation45_spill] sm:$0xff]  ;;  %vm12309_vm1 = vmmov %vm12294_vm0 }
 0x4be   : > { %v3839_v59 = vsel %vm1489_vm11, %v12293_v28, %v3804_v23  ;;  %v4806_v31 = vpop.permute.xlu1 %4805  ;;  %v7134_v24 = vcombine.high %v3848_v54, %v3856_v10  ;;  %v12297_v38 = vrot.slane %v12296_v52, 4  ;;  %v12299_v12 = vrot.slane %v12298_v53, 4 }
 0x4bf   : > { %6557 = vmatpush2.bf16.msra.mxu1 %v7552_v63  ;;  %v4846_v20 = vrot.slane %v4806_v31, 4  ;;  %v3831_v1 = vsel %vm1489_vm11, %v12295_v14, %v3799_v40  ;;  %v7262_v47 = vcombine.high %v11048_v17, %v4904_v2  ;;  %v3840_v33 = vsel %vm12300_vm7, %v10655_v13, %v3839_v59  ;;  %v7562_v59 = vld [vmem:[%s7790_s21] sm:$0xff]  ;;  %v7563_v14 = vld [vmem:[%s7790_s21 + $0x8] sm:$0xff] }
 0x4c0   : > { %6590 = vmatpush1.bf16.msra.mxu0 %v7189_v37  ;;  %6558 = vmatprep.subr.bf16.mxu1 %v7142_v26  ;;  %v4879_v29 = vsel %vm1489_vm11, %v12297_v38, %v4841_v43  ;;  %v4831_v56 = vrot.slane %v4776_v41, 4  ;;  %v7133_v9 = vcombine.low %v3848_v54, %v3856_v10  ;;  %v3832_v62 = vsel %vm12302_vm6, %v12206_v19, %v3831_v1  ;;  %v7565_v38 = vld [vmem:[%s7790_s21 + $0x48] sm:$0xff] }
 0x4c1   : > { %6591 = vmatprep.subr.bf16.mxu0 %v7182_v36  ;;  %v4887_v16 = vsel %vm1489_vm11, %v12299_v12, %v4846_v20  ;;  %v3617_v46 = vsel %vm1489_vm11, %v3572_v0, %v3573_v44  ;;  %v7261_v3 = vcombine.low %v11048_v17, %v4904_v2  ;;  %v7126_v13 = vcombine.high %v3832_v62, %v3840_v33 }
 0x4c2   : > { %v3548_v32 = vpop.permute.xlu1 %3547  ;;  %v4888_v51 = vsel %vm12301_vm8, %v12298_v53, %v4887_v16  ;;  %v4880_v30 = vsel %vm12303_vm10, %v12296_v52, %v4879_v29  ;;  %v12305_v0 = vrot.slane %v12304_v34, 4  ;;  %v7125_v48 = vcombine.low %v3832_v62, %v3840_v33 }
 0x4c3   : > { %6559 = vmatpush2.bf16.msra.mxu1 %v7141_v18  ;;  %v3578_v50 = vrot.slane %v3548_v32, 4  ;;  %v7254_v27 = vcombine.high %v4880_v30, %v4888_v51  ;;  %v3618_v60 = vsel %vm1657_vm5, %v10825_v4, %v3617_v46  ;;  %v7253_v6 = vcombine.low %v4880_v30, %v4888_v51  ;;  %v12310_v4 = vld [vmem:[#allocation84_spill] sm:$0xff] }
 0x4c4   : > { %6592 = vmatpush1.bf16.msra.mxu0 %v7181_v42  ;;  %6560 = vmatprep.subr.bf16.mxu1 %v7134_v24  ;;  %v4863_v17 = vsel %vm1489_vm11, %v12305_v0, %v4831_v56  ;;  %v12307_v39 = vrot.slane %v12306_v58, 4  ;;  %v7564_v42 = vld [vmem:[%s7790_s21 + $0x40] sm:$0xff] }
 0x4c5   : > { %6603 = vmatprep.subr.bf16.mxu0 %v7262_v47  ;;  %v3625_v61 = vsel %vm1489_vm11, %v3577_v7, %v3578_v50 }
 0x4c6   : > { %v4786_v35 = vpop.permute.xlu1 %4785  ;;  %v3626_v19 = vsel %vm1657_vm5, %v10723_v11, %v3625_v61  ;;  %v4864_v11 = vsel %vm12308_vm14, %v12304_v34, %v4863_v17  ;;  %v7567_v34 = vld [vmem:[%s7790_s21 + $0x18] sm:$0xff] }
 0x4c7   : > { %6561 = vmatpush2.bf16.msra.mxu1 %v7133_v9  ;;  %v4836_v21 = vrot.slane %v4786_v35, 4  ;;  %v7118_v7 = vcombine.high %v3618_v60, %v3626_v19  ;;  %v7117_v8 = vcombine.low %v3618_v60, %v3626_v19 }
 0x4c8   : > { %6604 = vmatpush2.bf16.msra.mxu0 %v7261_v3  ;;  %6562 = vmatprep.subr.bf16.mxu1 %v7126_v13  ;;  %v7566_v13 = vld [vmem:[%s7790_s21 + $0x10] sm:$0xff] }
 0x4c9   : > { %6605 = vmatprep.subr.bf16.mxu0 %v7254_v27  ;;  %v4871_v57 = vsel %vm1489_vm11, %v12307_v39, %v4836_v21 }
 0x4ca   : > { %v4872_v55 = vsel %vm12309_vm1, %v12306_v58, %v4871_v57 }
 0x4cb   : > { %6563 = vmatpush2.bf16.msra.mxu1 %v7125_v48  ;;  %v7245_v49 = vcombine.low %v4864_v11, %v4872_v55  ;;  %v7246_v23 = vcombine.high %v4864_v11, %v4872_v55  ;;  %v7568_v48 = vld [vmem:[%s7790_s21 + $0x50] sm:$0xff] }
 0x4cc   : > { %6606 = vmatpush2.bf16.msra.mxu0 %v7253_v6  ;;  %6564 = vmatprep.subr.bf16.mxu1 %v7118_v7  ;;  %v7569_v7 = vld [vmem:[%s7790_s21 + $0x58] sm:$0xff] }
 0x4cd   : > { %6607 = vmatprep.subr.bf16.mxu0 %v7246_v23 }
 0x4cf   : > { %6565 = vmatpush2.bf16.msra.mxu1 %v7117_v8 }
 0x4d0   : > { %6608 = vmatpush2.bf16.msra.mxu0 %v7245_v49 }
 0x4d2   : > { %6567 = vmatmul.mubr.bf16.vlgmr.msra.gmra.mxu1 %v11041_v5 }
 0x4d3   : > { %6610 = vmatmul.mubr.bf16.vlgmr.msra.gmra.mxu0 %v12310_v4 }
 0x4d4   : > { %v6353_v63 = vpop.f32.mrf.mxu1 }
 0x4d6   : > { %v6355_v22 = vpop.f32.mrf.mxu1 }
 0x4d8   : > { %v6357_v45 = vpop.f32.mrf.mxu1 }
 0x4da   : > { %v6359_v28 = vpop.f32.mrf.mxu1 }
 0x4ea   : > { %v6310_v25 = vpop.f32.mrf.mxu0 }
 0x4eb   : > { %v6354_v15 = vadd.f32 %v6353_v63, %v6310_v25 }
 0x4ec   : > { %v6312_v40 = vpop.f32.mrf.mxu0 }
 0x4ed   : > { %vm6620_vm11 = vcmp.ge.f32.partialorder %v6354_v15, 0.0  ;;  %v6636_v37 = vmul.f32 0.1, %v6354_v15  ;;  %v6356_v26 = vadd.f32 %v6355_v22, %v6312_v40  ;;  %v7570_v40 = vld [vmem:[%s7790_s21 + $0x20] sm:$0xff] }
 0x4ee   : > { %v6314_v43 = vpop.f32.mrf.mxu0 }
 0x4ef   : > { %v6652_v36 = vsel %vm6620_vm11, %v6354_v15, %v6636_v37  ;;  %vm6621_vm5 = vcmp.ge.f32.partialorder %v6356_v26, 0.0  ;;  %v6637_v10 = vmul.f32 0.1, %v6356_v26  ;;  %v6358_v5 = vadd.f32 %v6357_v45, %v6314_v43 }
 0x4f0   : > { %v6668_v31 = vadd.f32 %v7562_v59, %v6652_v36  ;;  %v6316_v2 = vpop.f32.mrf.mxu0 }
 0x4f1   : > { %v6653_v20 = vsel %vm6621_vm5, %v6356_v26, %v6637_v10  ;;  %vm6628_vm13 = vcmp.ge.f32.partialorder %v6358_v5, 0.0  ;;  %v6644_v18 = vmul.f32 0.1, %v6358_v5  ;;  %v6360_v54 = vadd.f32 %v6359_v28, %v6316_v2  ;;  %v7572_v2 = vld [vmem:[%s7790_s21 + $0x60] sm:$0xff] }
 0x4f2   : > { %6684 = vst [vmem:[%s7790_s21] sm:$0xff] %v6668_v31  ;;  %v6669_v1 = vadd.f32 %v7563_v14, %v6653_v20 }
 0x4f3   : > { %v6660_v44 = vsel %vm6628_vm13, %v6358_v5, %v6644_v18  ;;  %vm6629_vm4 = vcmp.ge.f32.partialorder %v6360_v54, 0.0  ;;  %v6645_v41 = vmul.f32 0.1, %v6360_v54  ;;  %v7571_v5 = vld [vmem:[%s7790_s21 + $0x28] sm:$0xff] }
 0x4f4   : > { %6685 = vst [vmem:[%s7790_s21 + $0x8] sm:$0xff] %v6669_v1  ;;  %v6676_v24 = vadd.f32 %v7564_v42, %v6660_v44 }
 0x4f5   : > { %v6661_v52 = vsel %vm6629_vm4, %v6360_v54, %v6645_v41  ;;  %v7573_v54 = vld [vmem:[%s7790_s21 + $0x68] sm:$0xff] }
 0x4f6   : > { %6692 = vst [vmem:[%s7790_s21 + $0x40] sm:$0xff] %v6676_v24  ;;  %v6677_v29 = vadd.f32 %v7565_v38, %v6661_v52 }
 0x4f8   : > { %6693 = vst [vmem:[%s7790_s21 + $0x48] sm:$0xff] %v6677_v29 }
 0x519   : > { %v6396_v53 = vpop.f32.mrf.mxu1 }
 0x51b   : > { %v6398_v47 = vpop.f32.mrf.mxu1 }
 0x51d   : > { %v6439_v12 = vpop.f32.mrf.mxu0  ;;  %v6400_v56 = vpop.f32.mrf.mxu1 }
 0x51e   : > { %v6440_v16 = vadd.f32 %v6439_v12, %v6396_v53 }
 0x51f   : > { %v6441_v33 = vpop.f32.mrf.mxu0  ;;  %v6402_v3 = vpop.f32.mrf.mxu1 }
 0x520   : > { %vm6622_vm9 = vcmp.ge.f32.partialorder %v6440_v16, 0.0  ;;  %v6638_v32 = vmul.f32 0.1, %v6440_v16  ;;  %v6442_v51 = vadd.f32 %v6441_v33, %v6398_v47 }
 0x521   : > { %v6443_v50 = vpop.f32.mrf.mxu0 }
 0x522   : > { %v6654_v9 = vsel %vm6622_vm9, %v6440_v16, %v6638_v32  ;;  %vm6623_vm12 = vcmp.ge.f32.partialorder %v6442_v51, 0.0  ;;  %v6639_v62 = vmul.f32 0.1, %v6442_v51  ;;  %v6444_v46 = vadd.f32 %v6443_v50, %v6400_v56  ;;  %v7574_v32 = vld [vmem:[%s7790_s21 + $0x30] sm:$0xff] }
 0x523   : > { %v6670_v30 = vadd.f32 %v7566_v13, %v6654_v9  ;;  %v6445_v61 = vpop.f32.mrf.mxu0 }
 0x524   : > { %v6655_v27 = vsel %vm6623_vm12, %v6442_v51, %v6639_v62  ;;  %vm6630_vm15 = vcmp.ge.f32.partialorder %v6444_v46, 0.0  ;;  %v6646_v35 = vmul.f32 0.1, %v6444_v46  ;;  %v6446_v19 = vadd.f32 %v6445_v61, %v6402_v3  ;;  %v7576_v61 = vld [vmem:[%s7790_s21 + $0x70] sm:$0xff] }
 0x525   : > { %6686 = vst [vmem:[%s7790_s21 + $0x10] sm:$0xff] %v6670_v30  ;;  %v6671_v0 = vadd.f32 %v7567_v34, %v6655_v27 }
 0x526   : > { %v6662_v17 = vsel %vm6630_vm15, %v6444_v46, %v6646_v35  ;;  %vm6631_vm3 = vcmp.ge.f32.partialorder %v6446_v19, 0.0  ;;  %v6647_v21 = vmul.f32 0.1, %v6446_v19  ;;  %v7575_v46 = vld [vmem:[%s7790_s21 + $0x38] sm:$0xff] }
 0x527   : > { %6687 = vst [vmem:[%s7790_s21 + $0x18] sm:$0xff] %v6671_v0  ;;  %v6678_v60 = vadd.f32 %v7568_v48, %v6662_v17 }
 0x528   : > { %v6663_v6 = vsel %vm6631_vm3, %v6446_v19, %v6647_v21  ;;  %v7577_v19 = vld [vmem:[%s7790_s21 + $0x78] sm:$0xff] }
 0x529   : > { %6694 = vst [vmem:[%s7790_s21 + $0x50] sm:$0xff] %v6678_v60  ;;  %v6679_v58 = vadd.f32 %v7569_v7, %v6663_v6 }
 0x52b   : > { %6695 = vst [vmem:[%s7790_s21 + $0x58] sm:$0xff] %v6679_v58 }
 0x54d   : > { %v6525_v39 = vpop.f32.mrf.mxu1 }
 0x54f   : > { %v6527_v57 = vpop.f32.mrf.mxu1 }
 0x551   : > { %v6529_v8 = vpop.f32.mrf.mxu1 }
 0x553   : > { %v6531_v45 = vpop.f32.mrf.mxu1 }
 0x566   : > { %v6482_v11 = vpop.f32.mrf.mxu0 }
 0x567   : > { %v6526_v55 = vadd.f32 %v6525_v39, %v6482_v11 }
 0x568   : > { %v6484_v49 = vpop.f32.mrf.mxu0 }
 0x569   : > { %vm6624_vm0 = vcmp.ge.f32.partialorder %v6526_v55, 0.0  ;;  %v6640_v23 = vmul.f32 0.1, %v6526_v55  ;;  %v6528_v4 = vadd.f32 %v6527_v57, %v6484_v49 }
 0x56a   : > { %v6486_v63 = vpop.f32.mrf.mxu0 }
 0x56b   : > { %v6656_v22 = vsel %vm6624_vm0, %v6526_v55, %v6640_v23  ;;  %vm6625_vm2 = vcmp.ge.f32.partialorder %v6528_v4, 0.0  ;;  %v6641_v25 = vmul.f32 0.1, %v6528_v4  ;;  %v6530_v15 = vadd.f32 %v6529_v8, %v6486_v63 }
 0x56c   : > { %v6672_v37 = vadd.f32 %v7570_v40, %v6656_v22  ;;  %v6488_v26 = vpop.f32.mrf.mxu0 }
 0x56d   : > { %v6657_v43 = vsel %vm6625_vm2, %v6528_v4, %v6641_v25  ;;  %vm6632_vm7 = vcmp.ge.f32.partialorder %v6530_v15, 0.0  ;;  %v6648_v36 = vmul.f32 0.1, %v6530_v15  ;;  %v6532_v10 = vadd.f32 %v6531_v45, %v6488_v26 }
 0x56e   : > { %6688 = vst [vmem:[%s7790_s21 + $0x20] sm:$0xff] %v6672_v37  ;;  %v6673_v28 = vadd.f32 %v7571_v5, %v6657_v43 }
 0x56f   : > { %v6664_v59 = vsel %vm6632_vm7, %v6530_v15, %v6648_v36  ;;  %vm6633_vm8 = vcmp.ge.f32.partialorder %v6532_v10, 0.0  ;;  %v6649_v31 = vmul.f32 0.1, %v6532_v10 }
 0x570   : > { %6689 = vst [vmem:[%s7790_s21 + $0x28] sm:$0xff] %v6673_v28  ;;  %v6680_v20 = vadd.f32 %v7572_v2, %v6664_v59 }
 0x571   : > { %v6665_v18 = vsel %vm6633_vm8, %v6532_v10, %v6649_v31 }
 0x572   : > { %6696 = vst [vmem:[%s7790_s21 + $0x60] sm:$0xff] %v6680_v20  ;;  %v6681_v14 = vadd.f32 %v7573_v54, %v6665_v18 }
 0x574   : > { %6697 = vst [vmem:[%s7790_s21 + $0x68] sm:$0xff] %v6681_v14 }
 0x592   : > { %v6568_v1 = vpop.f32.mrf.mxu1 }
 0x593   : > { %v6611_v44 = vpop.f32.mrf.mxu0 }
 0x594   : > { %v6612_v41 = vadd.f32 %v6611_v44, %v6568_v1  ;;  %v6570_v42 = vpop.f32.mrf.mxu1 }
 0x595   : > { %v6613_v24 = vpop.f32.mrf.mxu0 }
 0x596   : > { %vm6626_vm6 = vcmp.ge.f32.partialorder %v6612_v41, 0.0  ;;  %v6642_v52 = vmul.f32 0.1, %v6612_v41  ;;  %v6614_v38 = vadd.f32 %v6613_v24, %v6570_v42  ;;  %v6572_v29 = vpop.f32.mrf.mxu1 }
 0x597   : > { %v6615_v53 = vpop.f32.mrf.mxu0 }
 0x598   : > { %v6658_v12 = vsel %vm6626_vm6, %v6612_v41, %v6642_v52  ;;  %vm6627_vm10 = vcmp.ge.f32.partialorder %v6614_v38, 0.0  ;;  %v6643_v16 = vmul.f32 0.1, %v6614_v38  ;;  %v6616_v47 = vadd.f32 %v6615_v53, %v6572_v29  ;;  %v6574_v33 = vpop.f32.mrf.mxu1 }
 0x599   : > { %v6674_v51 = vadd.f32 %v7574_v32, %v6658_v12  ;;  %v6617_v56 = vpop.f32.mrf.mxu0 }
 0x59a   : > { %v6659_v50 = vsel %vm6627_vm10, %v6614_v38, %v6643_v16  ;;  %vm6634_vm14 = vcmp.ge.f32.partialorder %v6616_v47, 0.0  ;;  %v6650_v9 = vmul.f32 0.1, %v6616_v47  ;;  %v6618_v62 = vadd.f32 %v6617_v56, %v6574_v33 }
 0x59b   : > { %6690 = vst [vmem:[%s7790_s21 + $0x30] sm:$0xff] %v6674_v51  ;;  %v6675_v3 = vadd.f32 %v7575_v46, %v6659_v50 }
 0x59c   : > { %v6666_v13 = vsel %vm6634_vm14, %v6616_v47, %v6650_v9  ;;  %vm6635_vm1 = vcmp.ge.f32.partialorder %v6618_v62, 0.0  ;;  %v6651_v30 = vmul.f32 0.1, %v6618_v62 }
 0x59d   : > { %6691 = vst [vmem:[%s7790_s21 + $0x38] sm:$0xff] %v6675_v3  ;;  %v6682_v27 = vadd.f32 %v7576_v61, %v6666_v13 }
 0x59e   : > { %v6667_v35 = vsel %vm6635_vm1, %v6618_v62, %v6651_v30 }
 0x59f   : > { %6698 = vst [vmem:[%s7790_s21 + $0x70] sm:$0xff] %v6682_v27  ;;  %v6683_v34 = vadd.f32 %v7577_v19, %v6667_v35 }
 0x5a1   : > { %6699 = vst [vmem:[%s7790_s21 + $0x78] sm:$0xff] %v6683_v34 }
 0x5a2 PF: > { %s12311_s0 = sld [smem:[#allocation10_spill]] }
 0x5a3   : > { %s12312_s17 = sld [smem:[#allocation8_spill]] }
 0x5a4   : > { %s12313_s18 = sld [smem:[#allocation9_spill]] }
 0x5a5   : > { %s12314_s19 = sld [smem:[#allocation11_spill]] }
 0x5a6   : > { %s12315_s20 = sld [smem:[#allocation12_spill]] }
 0x5a8   : > { %s22_s21 = sadd.s32 1, %s12311_s0  }
 0x5a9   : > { %p19_p8 = scmp.ge.s32.totalorder %s22_s21, 6  }
 0x5ab   :  { %21 = sbr.rel (!%p19_p8) target bundleno = 4 (0x4), region = 130 }

</bundles_post_ra>
